<compile_context>
chip_gen: v5e
topology: v5e:2x2
jax: 0.10.0
libtpu: 0.0.40
codegen_flags: <defaults>
</compile_context>

<pallas_src>
import numpy as np

import jax
import jax.numpy as jnp
from jax.experimental import pallas as pl
from jax.experimental.pallas import tpu as pltpu


# Flat-row offsets of the 2x2 (row-block, col-block) groups: 11*d_row + d_col.
_OFFS = (0, 1, 11, 12)


# ----------------------------------------------------------------------------
# The fused Pallas kernel: conv1 -> conv2 -> conv3 -> fc1, all in VMEM.
#
# Slab layouts (flat row index = 11*block_row + block_col everywhere):
#   x_ref  : (121, 256) bf16   input, block = 8x8 pixels; lane = (pr*8+pc)*4 + ci
#   y1_ref : (109, 128) f32    conv1 out, block = 2x2 positions;
#                              lane = (alpha*2+beta)*32 + co,  y1 pos = (2a+alpha, 2b+beta)
#   y2_ref : ( 97,  64) f32    conv2 out, row = 11*oh + ow, lane = co
#   y3     : ( 73,  64) f32    conv3 out, row = 11*h  + w , lane = co
# Rows whose column part exceeds the valid range are garbage; they are never
# read by a valid output and their fc weights are exactly zero.
# ----------------------------------------------------------------------------
def _convnet_kernel(x_ref, w1_ref, b1_ref, w2_ref, b2_ref, w3_ref, b3_ref,
                    wfc_ref, bfc_ref, out_ref, y1_ref, y2_ref):
    # ---- conv1: 84x84x4 -> 20x20x32, k=8, s=4, + bias + ReLU -----------------
    # 4 dense dots (109,256)x(256,128); the 64 taps & 4 output parities are
    # folded into K=256 / N=128, accumulation stays in f32.
    acc1 = jnp.zeros((109, 128), jnp.float32)
    for g, off in enumerate(_OFFS):
        acc1 += jnp.dot(x_ref[off:off + 109, :], w1_ref[g],
                        preferred_element_type=jnp.float32)
    y1_ref[...] = jnp.maximum(acc1 + b1_ref[...], 0.0)

    # ---- conv2: 20x20x32 -> 9x9x64, k=4, s=2, + bias + ReLU ------------------
    # Stride-2 already resolved by y1's parity-in-lanes layout: 4 dense dots
    # (97,128)x(128,64) at the same constant offsets {0,1,11,12}.
    acc2 = jnp.zeros((97, 64), jnp.float32)
    for g, off in enumerate(_OFFS):
        a = y1_ref[off:off + 97, :].astype(jnp.bfloat16)
        acc2 += jnp.dot(a, w2_ref[g], preferred_element_type=jnp.float32)
    y2_ref[...] = jnp.maximum(acc2 + b2_ref[...], 0.0)

    # ---- conv3: 9x9x64 -> 7x7x64, k=3, s=1, + bias + ReLU --------------------
    # 9 dense per-tap dots (73,64)x(64,64) with constant offsets 11*i + j.
    acc3 = jnp.zeros((73, 64), jnp.float32)
    for i in range(3):
        for j in range(3):
            off = 11 * i + j
            a = y2_ref[off:off + 73, :].astype(jnp.bfloat16)
            acc3 += jnp.dot(a, w3_ref[3 * i + j],
                            preferred_element_type=jnp.float32)
    y3 = jnp.maximum(acc3 + b3_ref[...], 0.0)            # (73, 64) f32

    # ---- fc1: 3136 -> 4 as VPU multiply + reduce (weights pre-laid on y3) ----
    lane = jax.lax.broadcasted_iota(jnp.int32, (1, 4), 1)
    out = bfc_ref[...]
    for o in range(4):
        w = wfc_ref[o].astype(jnp.float32)               # zeros at garbage rows
        s = jnp.sum(y3 * w, axis=1, keepdims=True)       # (73, 1) lane reduce
        s = jnp.sum(s, axis=0, keepdims=True)            # (1, 1)  sublane reduce
        out = out + jnp.where(lane == o, s, 0.0)
    out_ref[...] = out


# ----------------------------------------------------------------------------
# One-time parameter preparation (hoisted out of the hot path).
# ----------------------------------------------------------------------------
def prepare_params(params):
    """Re-lays PyTorch conv/fc weights onto the kernel's slab layouts (dense,
    ~0.4 MB of bf16 total — replaces the old ~8 MB banded matrices)."""
    w1, b1, w2, b2, w3, b3, wf, bf = [np.asarray(p, np.float32) for p in params]

    # conv1 grouped weights -> (4, 256, 128)
    #   group   = (da, db)             -> flat offset 11*da + db  in {0,1,11,12}
    #   K lane  = (pr*8 + pc)*4 + ci   (input 8x8 phase, in-channel)
    #   N lane  = (alpha*2 + beta)*32 + co  (output 2x2 parity, out-channel)
    m1 = np.zeros((2, 2, 8, 8, 4, 2, 2, 32), np.float32)
    for alpha in range(2):
        for beta in range(2):
            for i in range(8):
                for j in range(8):
                    da, pr = divmod(4 * alpha + i, 8)
                    db, pc = divmod(4 * beta + j, 8)
                    m1[da, db, pr, pc, :, alpha, beta, :] = w1[:, :, i, j].T
    m1 = m1.reshape(4, 256, 128)

    # conv2 grouped weights -> (4, 128, 64)
    #   group = (di, dj) -> offset 11*di + dj ; K lane = (alpha*2+beta)*32 + ci
    m2 = np.zeros((2, 2, 2, 2, 32, 64), np.float32)
    for di in range(2):
        for dj in range(2):
            for alpha in range(2):
                for beta in range(2):
                    m2[di, dj, alpha, beta, :, :] = w2[:, :, 2 * di + alpha,
                                                       2 * dj + beta].T
    m2 = m2.reshape(4, 128, 64)

    # conv3 per-tap dense weights -> (9, 64, 64), tap index 3*i + j.
    m3 = np.zeros((3, 3, 64, 64), np.float32)
    for i in range(3):
        for j in range(3):
            m3[i, j] = w3[:, :, i, j].T
    m3 = m3.reshape(9, 64, 64)

    # Biases tiled to the output lane layouts.
    b1w = np.tile(b1, 4).reshape(1, 128)      # lane = (alpha*2+beta)*32 + co
    b2w = b2.reshape(1, 64)
    b3w = b3.reshape(1, 64)

    # fc1: PyTorch reshape(-1) flattens (C, H, W): flat = c*49 + 7*h + w.
    # Re-lay onto y3's slab (row = 11*h + w, lane = c); garbage rows get zeros.
    wf4 = wf.reshape(4, 64, 7, 7)             # (o, c, h, w)
    wfc = np.zeros((4, 73, 64), np.float32)
    for h in range(7):
        for w in range(7):
            wfc[:, 11 * h + w, :] = wf4[:, :, h, w]
    bfc = bf.reshape(1, 4)

    return (jnp.asarray(m1, jnp.bfloat16), jnp.asarray(b1w, jnp.float32),
            jnp.asarray(m2, jnp.bfloat16), jnp.asarray(b2w, jnp.float32),
            jnp.asarray(m3, jnp.bfloat16), jnp.asarray(b3w, jnp.float32),
            jnp.asarray(wfc, jnp.bfloat16), jnp.asarray(bfc, jnp.float32))


# ----------------------------------------------------------------------------
# Forward wrapper: cheap input phase-split in XLA, then ONE pallas_call.
# ----------------------------------------------------------------------------
def _forward_impl(x_nchw, prepped):
    m1, b1w, m2, b2w, m3, b3w, wfc, bfc = prepped
    assert x_nchw.shape == (1, 4, 84, 84)     # fc1 expects 64*7*7 -> batch = 1

    # NCHW -> (121, 256) phase-split slab: input pixel (8A+pr, 8B+pc, c) lives
    # at row 11*A + B, lane (pr*8+pc)*4 + c.  Rows/cols 84..87 are zero padding
    # that only ever multiplies zero weight entries.
    x = jnp.transpose(x_nchw[0], (1, 2, 0))                     # (84, 84, 4)
    x = jnp.pad(x, ((0, 4), (0, 4), (0, 0)))                    # (88, 88, 4)
    x = x.reshape(11, 8, 11, 8, 4).transpose(0, 2, 1, 3, 4)     # (11,11,8,8,4)
    x = x.reshape(121, 256).astype(jnp.bfloat16)

    out = pl.pallas_call(
        _convnet_kernel,
        out_shape=jax.ShapeDtypeStruct((1, 4), jnp.float32),
        in_specs=[pl.BlockSpec(memory_space=pltpu.MemorySpace.VMEM)] * 9,
        out_specs=pl.BlockSpec(memory_space=pltpu.MemorySpace.VMEM),
        scratch_shapes=[
            pltpu.VMEM((109, 128), jnp.float32),   # conv1 output slab
            pltpu.VMEM((97, 64), jnp.float32),     # conv2 output slab
        ],
        # Total residency ~0.7 MB -> well under the default scoped VMEM limit
        # on every generation (incl. v7x); no vmem_limit override needed.
    )(x, m1, b1w, m2, b2w, m3, b3w, wfc, bfc)
    return out.reshape(-1)                                       # (4,)


convnet_forward = jax.jit(_forward_impl)


# ----------------------------------------------------------------------------
# Pure-JAX f32 reference (for self-check only)
# ----------------------------------------------------------------------------
def ref_forward(x_nchw, params):
    w1, b1, w2, b2, w3, b3, wf, bf = params

    def conv(x, w, b, s):
        y = jax.lax.conv_general_dilated(
            x, w, (s, s), "VALID", dimension_numbers=("NCHW", "OIHW", "NCHW"))
        return jax.nn.relu(y + b.reshape(1, -1, 1, 1))

    y = conv(x_nchw, w1, b1, 4)
    y = conv(y, w2, b2, 2)
    y = conv(y, w3, b3, 1)
    flat = y.reshape(-1)
    return flat @ wf.T + bf


if __name__ == "__main__":
    key = jax.random.PRNGKey(0)
    ks = jax.random.split(key, 9)

    # Deterministic synthetic parameters (shapes from ConvNet.__init__)
    w1 = 0.05 * jax.random.normal(ks[0], (32, 4, 8, 8), jnp.float32)
    b1 = 0.05 * jax.random.normal(ks[1], (32,), jnp.float32)
    w2 = 0.05 * jax.random.normal(ks[2], (64, 32, 4, 4), jnp.float32)
    b2 = 0.05 * jax.random.normal(ks[3], (64,), jnp.float32)
    w3 = 0.05 * jax.random.normal(ks[4], (64, 64, 3, 3), jnp.float32)
    b3 = 0.05 * jax.random.normal(ks[5], (64,), jnp.float32)
    wf = 0.05 * jax.random.normal(ks[6], (4, 64 * 7 * 7), jnp.float32)
    bf = 0.05 * jax.random.normal(ks[7], (4,), jnp.float32)
    params = (w1, b1, w2, b2, w3, b3, wf, bf)

    # One-time weight preparation (hoisted out of the per-inference hot path).
    prepped = prepare_params(params)

    x = jax.random.normal(ks[8], (1, 4, 84, 84), jnp.float32)

    out = convnet_forward(x, prepped)
    out = jax.block_until_ready(out)

    ref = ref_forward(x, params)
    assert out.shape == (4,), out.shape
    # bf16 matmul path vs f32 reference -> looser tolerance than pure f32.
    assert jnp.allclose(out, ref, rtol=5e-2, atol=5e-2), (out, ref)

    print("KERNEL_OK")
</pallas_src>

<mosaic_0001>
module attributes {stable_mosaic.version = 11 : i64} {
  func.func @_convnet_kernel(%arg0: memref<121x256xbf16, #tpu.memory_space<vmem>>, %arg1: memref<4x256x128xbf16, #tpu.memory_space<vmem>>, %arg2: memref<1x128xf32, #tpu.memory_space<vmem>>, %arg3: memref<4x128x64xbf16, #tpu.memory_space<vmem>>, %arg4: memref<1x64xf32, #tpu.memory_space<vmem>>, %arg5: memref<9x64x64xbf16, #tpu.memory_space<vmem>>, %arg6: memref<1x64xf32, #tpu.memory_space<vmem>>, %arg7: memref<4x73x64xbf16, #tpu.memory_space<vmem>>, %arg8: memref<1x4xf32, #tpu.memory_space<vmem>>, %arg9: memref<1x4xf32, #tpu.memory_space<vmem>>, %arg10: memref<109x128xf32, #tpu.memory_space<vmem>>, %arg11: memref<97x64xf32, #tpu.memory_space<vmem>>) attributes {dimension_semantics = [], scalar_prefetch = 0 : i64, scratch_operands = 2 : i64, tpu.core_type = #tpu.core_type<tc>} {
    %cst = arith.constant 0.000000e+00 : f32
    %0 = vector.broadcast %cst : f32 to vector<109x128xf32>
    %c0 = arith.constant 0 : index
    %c0_0 = arith.constant 0 : index
    %1 = vector.load %arg0[%c0, %c0_0] : memref<121x256xbf16, #tpu.memory_space<vmem>>, vector<109x256xbf16>
    %c0_1 = arith.constant 0 : index
    %c0_2 = arith.constant 0 : index
    %c0_3 = arith.constant 0 : index
    %2 = vector.load %arg1[%c0_1, %c0_2, %c0_3] : memref<4x256x128xbf16, #tpu.memory_space<vmem>>, vector<1x256x128xbf16>
    %3 = vector.shape_cast %2 : vector<1x256x128xbf16> to vector<256x128xbf16>
    %cst_4 = arith.constant dense<0.000000e+00> : vector<109x128xf32>
    %4 = tpu.matmul %1, %3, %cst_4 {dimension_numbers = #tpu.dot_dimension_numbers<[1], [0], [0], [1], [0, 0, 1, 1], [], []>} : vector<109x256xbf16>, vector<256x128xbf16>, vector<109x128xf32> -> vector<109x128xf32>
    %5 = arith.addf %0, %4 : vector<109x128xf32>
    %c1 = arith.constant 1 : index
    %c0_5 = arith.constant 0 : index
    %6 = vector.load %arg0[%c1, %c0_5] : memref<121x256xbf16, #tpu.memory_space<vmem>>, vector<109x256xbf16>
    %c1_6 = arith.constant 1 : index
    %c0_7 = arith.constant 0 : index
    %c0_8 = arith.constant 0 : index
    %7 = vector.load %arg1[%c1_6, %c0_7, %c0_8] : memref<4x256x128xbf16, #tpu.memory_space<vmem>>, vector<1x256x128xbf16>
    %8 = vector.shape_cast %7 : vector<1x256x128xbf16> to vector<256x128xbf16>
    %cst_9 = arith.constant dense<0.000000e+00> : vector<109x128xf32>
    %9 = tpu.matmul %6, %8, %cst_9 {dimension_numbers = #tpu.dot_dimension_numbers<[1], [0], [0], [1], [0, 0, 1, 1], [], []>} : vector<109x256xbf16>, vector<256x128xbf16>, vector<109x128xf32> -> vector<109x128xf32>
    %10 = arith.addf %5, %9 : vector<109x128xf32>
    %c11 = arith.constant 11 : index
    %c0_10 = arith.constant 0 : index
    %11 = vector.load %arg0[%c11, %c0_10] : memref<121x256xbf16, #tpu.memory_space<vmem>>, vector<109x256xbf16>
    %c2 = arith.constant 2 : index
    %c0_11 = arith.constant 0 : index
    %c0_12 = arith.constant 0 : index
    %12 = vector.load %arg1[%c2, %c0_11, %c0_12] : memref<4x256x128xbf16, #tpu.memory_space<vmem>>, vector<1x256x128xbf16>
    %13 = vector.shape_cast %12 : vector<1x256x128xbf16> to vector<256x128xbf16>
    %cst_13 = arith.constant dense<0.000000e+00> : vector<109x128xf32>
    %14 = tpu.matmul %11, %13, %cst_13 {dimension_numbers = #tpu.dot_dimension_numbers<[1], [0], [0], [1], [0, 0, 1, 1], [], []>} : vector<109x256xbf16>, vector<256x128xbf16>, vector<109x128xf32> -> vector<109x128xf32>
    %15 = arith.addf %10, %14 : vector<109x128xf32>
    %c12 = arith.constant 12 : index
    %c0_14 = arith.constant 0 : index
    %16 = vector.load %arg0[%c12, %c0_14] : memref<121x256xbf16, #tpu.memory_space<vmem>>, vector<109x256xbf16>
    %c3 = arith.constant 3 : index
    %c0_15 = arith.constant 0 : index
    %c0_16 = arith.constant 0 : index
    %17 = vector.load %arg1[%c3, %c0_15, %c0_16] : memref<4x256x128xbf16, #tpu.memory_space<vmem>>, vector<1x256x128xbf16>
    %18 = vector.shape_cast %17 : vector<1x256x128xbf16> to vector<256x128xbf16>
    %cst_17 = arith.constant dense<0.000000e+00> : vector<109x128xf32>
    %19 = tpu.matmul %16, %18, %cst_17 {dimension_numbers = #tpu.dot_dimension_numbers<[1], [0], [0], [1], [0, 0, 1, 1], [], []>} : vector<109x256xbf16>, vector<256x128xbf16>, vector<109x128xf32> -> vector<109x128xf32>
    %20 = arith.addf %15, %19 : vector<109x128xf32>
    %c0_18 = arith.constant 0 : index
    %c0_19 = arith.constant 0 : index
    %21 = vector.load %arg2[%c0_18, %c0_19] : memref<1x128xf32, #tpu.memory_space<vmem>>, vector<1x128xf32>
    %22 = vector.broadcast %21 : vector<1x128xf32> to vector<109x128xf32>
    %23 = arith.addf %20, %22 : vector<109x128xf32>
    %cst_20 = arith.constant 0.000000e+00 : f32
    %24 = vector.broadcast %cst_20 : f32 to vector<109x128xf32>
    %25 = arith.maximumf %23, %24 : vector<109x128xf32>
    %c0_21 = arith.constant 0 : index
    %c0_22 = arith.constant 0 : index
    %26 = vector.load %arg10[%c0_21, %c0_22] : memref<109x128xf32, #tpu.memory_space<vmem>>, vector<109x128xf32>
    tpu.vector_store %arg10[%c0_21, %c0_22], %25 {strides = array<i32>} : memref<109x128xf32, #tpu.memory_space<vmem>>, vector<109x128xf32>,
    %cst_23 = arith.constant 0.000000e+00 : f32
    %27 = vector.broadcast %cst_23 : f32 to vector<97x64xf32>
    %c0_24 = arith.constant 0 : index
    %c0_25 = arith.constant 0 : index
    %28 = vector.load %arg10[%c0_24, %c0_25] : memref<109x128xf32, #tpu.memory_space<vmem>>, vector<97x128xf32>
    %29 = arith.truncf %28 : vector<97x128xf32> to vector<97x128xbf16>
    %c0_26 = arith.constant 0 : index
    %c0_27 = arith.constant 0 : index
    %c0_28 = arith.constant 0 : index
    %30 = vector.load %arg3[%c0_26, %c0_27, %c0_28] : memref<4x128x64xbf16, #tpu.memory_space<vmem>>, vector<1x128x64xbf16>
    %31 = vector.shape_cast %30 : vector<1x128x64xbf16> to vector<128x64xbf16>
    %cst_29 = arith.constant dense<0.000000e+00> : vector<97x64xf32>
    %32 = tpu.matmul %29, %31, %cst_29 {dimension_numbers = #tpu.dot_dimension_numbers<[1], [0], [0], [1], [0, 0, 1, 1], [], []>} : vector<97x128xbf16>, vector<128x64xbf16>, vector<97x64xf32> -> vector<97x64xf32>
    %33 = arith.addf %27, %32 : vector<97x64xf32>
    %c1_30 = arith.constant 1 : index
    %c0_31 = arith.constant 0 : index
    %34 = vector.load %arg10[%c1_30, %c0_31] : memref<109x128xf32, #tpu.memory_space<vmem>>, vector<97x128xf32>
    %35 = arith.truncf %34 : vector<97x128xf32> to vector<97x128xbf16>
    %c1_32 = arith.constant 1 : index
    %c0_33 = arith.constant 0 : index
    %c0_34 = arith.constant 0 : index
    %36 = vector.load %arg3[%c1_32, %c0_33, %c0_34] : memref<4x128x64xbf16, #tpu.memory_space<vmem>>, vector<1x128x64xbf16>
    %37 = vector.shape_cast %36 : vector<1x128x64xbf16> to vector<128x64xbf16>
    %cst_35 = arith.constant dense<0.000000e+00> : vector<97x64xf32>
    %38 = tpu.matmul %35, %37, %cst_35 {dimension_numbers = #tpu.dot_dimension_numbers<[1], [0], [0], [1], [0, 0, 1, 1], [], []>} : vector<97x128xbf16>, vector<128x64xbf16>, vector<97x64xf32> -> vector<97x64xf32>
    %39 = arith.addf %33, %38 : vector<97x64xf32>
    %c11_36 = arith.constant 11 : index
    %c0_37 = arith.constant 0 : index
    %40 = vector.load %arg10[%c11_36, %c0_37] : memref<109x128xf32, #tpu.memory_space<vmem>>, vector<97x128xf32>
    %41 = arith.truncf %40 : vector<97x128xf32> to vector<97x128xbf16>
    %c2_38 = arith.constant 2 : index
    %c0_39 = arith.constant 0 : index
    %c0_40 = arith.constant 0 : index
    %42 = vector.load %arg3[%c2_38, %c0_39, %c0_40] : memref<4x128x64xbf16, #tpu.memory_space<vmem>>, vector<1x128x64xbf16>
    %43 = vector.shape_cast %42 : vector<1x128x64xbf16> to vector<128x64xbf16>
    %cst_41 = arith.constant dense<0.000000e+00> : vector<97x64xf32>
    %44 = tpu.matmul %41, %43, %cst_41 {dimension_numbers = #tpu.dot_dimension_numbers<[1], [0], [0], [1], [0, 0, 1, 1], [], []>} : vector<97x128xbf16>, vector<128x64xbf16>, vector<97x64xf32> -> vector<97x64xf32>
    %45 = arith.addf %39, %44 : vector<97x64xf32>
    %c12_42 = arith.constant 12 : index
    %c0_43 = arith.constant 0 : index
    %46 = vector.load %arg10[%c12_42, %c0_43] : memref<109x128xf32, #tpu.memory_space<vmem>>, vector<97x128xf32>
    %47 = arith.truncf %46 : vector<97x128xf32> to vector<97x128xbf16>
    %c3_44 = arith.constant 3 : index
    %c0_45 = arith.constant 0 : index
    %c0_46 = arith.constant 0 : index
    %48 = vector.load %arg3[%c3_44, %c0_45, %c0_46] : memref<4x128x64xbf16, #tpu.memory_space<vmem>>, vector<1x128x64xbf16>
    %49 = vector.shape_cast %48 : vector<1x128x64xbf16> to vector<128x64xbf16>
    %cst_47 = arith.constant dense<0.000000e+00> : vector<97x64xf32>
    %50 = tpu.matmul %47, %49, %cst_47 {dimension_numbers = #tpu.dot_dimension_numbers<[1], [0], [0], [1], [0, 0, 1, 1], [], []>} : vector<97x128xbf16>, vector<128x64xbf16>, vector<97x64xf32> -> vector<97x64xf32>
    %51 = arith.addf %45, %50 : vector<97x64xf32>
    %c0_48 = arith.constant 0 : index
    %c0_49 = arith.constant 0 : index
    %52 = vector.load %arg4[%c0_48, %c0_49] : memref<1x64xf32, #tpu.memory_space<vmem>>, vector<1x64xf32>
    %53 = vector.broadcast %52 : vector<1x64xf32> to vector<97x64xf32>
    %54 = arith.addf %51, %53 : vector<97x64xf32>
    %cst_50 = arith.constant 0.000000e+00 : f32
    %55 = vector.broadcast %cst_50 : f32 to vector<97x64xf32>
    %56 = arith.maximumf %54, %55 : vector<97x64xf32>
    %c0_51 = arith.constant 0 : index
    %c0_52 = arith.constant 0 : index
    %57 = vector.load %arg11[%c0_51, %c0_52] : memref<97x64xf32, #tpu.memory_space<vmem>>, vector<97x64xf32>
    tpu.vector_store %arg11[%c0_51, %c0_52], %56 {strides = array<i32>} : memref<97x64xf32, #tpu.memory_space<vmem>>, vector<97x64xf32>,
    %cst_53 = arith.constant 0.000000e+00 : f32
    %58 = vector.broadcast %cst_53 : f32 to vector<73x64xf32>
    %c0_54 = arith.constant 0 : index
    %c0_55 = arith.constant 0 : index
    %59 = vector.load %arg11[%c0_54, %c0_55] : memref<97x64xf32, #tpu.memory_space<vmem>>, vector<73x64xf32>
    %60 = arith.truncf %59 : vector<73x64xf32> to vector<73x64xbf16>
    %c0_56 = arith.constant 0 : index
    %c0_57 = arith.constant 0 : index
    %c0_58 = arith.constant 0 : index
    %61 = vector.load %arg5[%c0_56, %c0_57, %c0_58] : memref<9x64x64xbf16, #tpu.memory_space<vmem>>, vector<1x64x64xbf16>
    %62 = vector.shape_cast %61 : vector<1x64x64xbf16> to vector<64x64xbf16>
    %cst_59 = arith.constant dense<0.000000e+00> : vector<73x64xf32>
    %63 = tpu.matmul %60, %62, %cst_59 {dimension_numbers = #tpu.dot_dimension_numbers<[1], [0], [0], [1], [0, 0, 1, 1], [], []>} : vector<73x64xbf16>, vector<64x64xbf16>, vector<73x64xf32> -> vector<73x64xf32>
    %64 = arith.addf %58, %63 : vector<73x64xf32>
    %c1_60 = arith.constant 1 : index
    %c0_61 = arith.constant 0 : index
    %65 = vector.load %arg11[%c1_60, %c0_61] : memref<97x64xf32, #tpu.memory_space<vmem>>, vector<73x64xf32>
    %66 = arith.truncf %65 : vector<73x64xf32> to vector<73x64xbf16>
    %c1_62 = arith.constant 1 : index
    %c0_63 = arith.constant 0 : index
    %c0_64 = arith.constant 0 : index
    %67 = vector.load %arg5[%c1_62, %c0_63, %c0_64] : memref<9x64x64xbf16, #tpu.memory_space<vmem>>, vector<1x64x64xbf16>
    %68 = vector.shape_cast %67 : vector<1x64x64xbf16> to vector<64x64xbf16>
    %cst_65 = arith.constant dense<0.000000e+00> : vector<73x64xf32>
    %69 = tpu.matmul %66, %68, %cst_65 {dimension_numbers = #tpu.dot_dimension_numbers<[1], [0], [0], [1], [0, 0, 1, 1], [], []>} : vector<73x64xbf16>, vector<64x64xbf16>, vector<73x64xf32> -> vector<73x64xf32>
    %70 = arith.addf %64, %69 : vector<73x64xf32>
    %c2_66 = arith.constant 2 : index
    %c0_67 = arith.constant 0 : index
    %71 = vector.load %arg11[%c2_66, %c0_67] : memref<97x64xf32, #tpu.memory_space<vmem>>, vector<73x64xf32>
    %72 = arith.truncf %71 : vector<73x64xf32> to vector<73x64xbf16>
    %c2_68 = arith.constant 2 : index
    %c0_69 = arith.constant 0 : index
    %c0_70 = arith.constant 0 : index
    %73 = vector.load %arg5[%c2_68, %c0_69, %c0_70] : memref<9x64x64xbf16, #tpu.memory_space<vmem>>, vector<1x64x64xbf16>
    %74 = vector.shape_cast %73 : vector<1x64x64xbf16> to vector<64x64xbf16>
    %cst_71 = arith.constant dense<0.000000e+00> : vector<73x64xf32>
    %75 = tpu.matmul %72, %74, %cst_71 {dimension_numbers = #tpu.dot_dimension_numbers<[1], [0], [0], [1], [0, 0, 1, 1], [], []>} : vector<73x64xbf16>, vector<64x64xbf16>, vector<73x64xf32> -> vector<73x64xf32>
    %76 = arith.addf %70, %75 : vector<73x64xf32>
    %c11_72 = arith.constant 11 : index
    %c0_73 = arith.constant 0 : index
    %77 = vector.load %arg11[%c11_72, %c0_73] : memref<97x64xf32, #tpu.memory_space<vmem>>, vector<73x64xf32>
    %78 = arith.truncf %77 : vector<73x64xf32> to vector<73x64xbf16>
    %c3_74 = arith.constant 3 : index
    %c0_75 = arith.constant 0 : index
    %c0_76 = arith.constant 0 : index
    %79 = vector.load %arg5[%c3_74, %c0_75, %c0_76] : memref<9x64x64xbf16, #tpu.memory_space<vmem>>, vector<1x64x64xbf16>
    %80 = vector.shape_cast %79 : vector<1x64x64xbf16> to vector<64x64xbf16>
    %cst_77 = arith.constant dense<0.000000e+00> : vector<73x64xf32>
    %81 = tpu.matmul %78, %80, %cst_77 {dimension_numbers = #tpu.dot_dimension_numbers<[1], [0], [0], [1], [0, 0, 1, 1], [], []>} : vector<73x64xbf16>, vector<64x64xbf16>, vector<73x64xf32> -> vector<73x64xf32>
    %82 = arith.addf %76, %81 : vector<73x64xf32>
    %c12_78 = arith.constant 12 : index
    %c0_79 = arith.constant 0 : index
    %83 = vector.load %arg11[%c12_78, %c0_79] : memref<97x64xf32, #tpu.memory_space<vmem>>, vector<73x64xf32>
    %84 = arith.truncf %83 : vector<73x64xf32> to vector<73x64xbf16>
    %c4 = arith.constant 4 : index
    %c0_80 = arith.constant 0 : index
    %c0_81 = arith.constant 0 : index
    %85 = vector.load %arg5[%c4, %c0_80, %c0_81] : memref<9x64x64xbf16, #tpu.memory_space<vmem>>, vector<1x64x64xbf16>
    %86 = vector.shape_cast %85 : vector<1x64x64xbf16> to vector<64x64xbf16>
    %cst_82 = arith.constant dense<0.000000e+00> : vector<73x64xf32>
    %87 = tpu.matmul %84, %86, %cst_82 {dimension_numbers = #tpu.dot_dimension_numbers<[1], [0], [0], [1], [0, 0, 1, 1], [], []>} : vector<73x64xbf16>, vector<64x64xbf16>, vector<73x64xf32> -> vector<73x64xf32>
    %88 = arith.addf %82, %87 : vector<73x64xf32>
    %c13 = arith.constant 13 : index
    %c0_83 = arith.constant 0 : index
    %89 = vector.load %arg11[%c13, %c0_83] : memref<97x64xf32, #tpu.memory_space<vmem>>, vector<73x64xf32>
    %90 = arith.truncf %89 : vector<73x64xf32> to vector<73x64xbf16>
    %c5 = arith.constant 5 : index
    %c0_84 = arith.constant 0 : index
    %c0_85 = arith.constant 0 : index
    %91 = vector.load %arg5[%c5, %c0_84, %c0_85] : memref<9x64x64xbf16, #tpu.memory_space<vmem>>, vector<1x64x64xbf16>
    %92 = vector.shape_cast %91 : vector<1x64x64xbf16> to vector<64x64xbf16>
    %cst_86 = arith.constant dense<0.000000e+00> : vector<73x64xf32>
    %93 = tpu.matmul %90, %92, %cst_86 {dimension_numbers = #tpu.dot_dimension_numbers<[1], [0], [0], [1], [0, 0, 1, 1], [], []>} : vector<73x64xbf16>, vector<64x64xbf16>, vector<73x64xf32> -> vector<73x64xf32>
    %94 = arith.addf %88, %93 : vector<73x64xf32>
    %c22 = arith.constant 22 : index
    %c0_87 = arith.constant 0 : index
    %95 = vector.load %arg11[%c22, %c0_87] : memref<97x64xf32, #tpu.memory_space<vmem>>, vector<73x64xf32>
    %96 = arith.truncf %95 : vector<73x64xf32> to vector<73x64xbf16>
    %c6 = arith.constant 6 : index
    %c0_88 = arith.constant 0 : index
    %c0_89 = arith.constant 0 : index
    %97 = vector.load %arg5[%c6, %c0_88, %c0_89] : memref<9x64x64xbf16, #tpu.memory_space<vmem>>, vector<1x64x64xbf16>
    %98 = vector.shape_cast %97 : vector<1x64x64xbf16> to vector<64x64xbf16>
    %cst_90 = arith.constant dense<0.000000e+00> : vector<73x64xf32>
    %99 = tpu.matmul %96, %98, %cst_90 {dimension_numbers = #tpu.dot_dimension_numbers<[1], [0], [0], [1], [0, 0, 1, 1], [], []>} : vector<73x64xbf16>, vector<64x64xbf16>, vector<73x64xf32> -> vector<73x64xf32>
    %100 = arith.addf %94, %99 : vector<73x64xf32>
    %c23 = arith.constant 23 : index
    %c0_91 = arith.constant 0 : index
    %101 = vector.load %arg11[%c23, %c0_91] : memref<97x64xf32, #tpu.memory_space<vmem>>, vector<73x64xf32>
    %102 = arith.truncf %101 : vector<73x64xf32> to vector<73x64xbf16>
    %c7 = arith.constant 7 : index
    %c0_92 = arith.constant 0 : index
    %c0_93 = arith.constant 0 : index
    %103 = vector.load %arg5[%c7, %c0_92, %c0_93] : memref<9x64x64xbf16, #tpu.memory_space<vmem>>, vector<1x64x64xbf16>
    %104 = vector.shape_cast %103 : vector<1x64x64xbf16> to vector<64x64xbf16>
    %cst_94 = arith.constant dense<0.000000e+00> : vector<73x64xf32>
    %105 = tpu.matmul %102, %104, %cst_94 {dimension_numbers = #tpu.dot_dimension_numbers<[1], [0], [0], [1], [0, 0, 1, 1], [], []>} : vector<73x64xbf16>, vector<64x64xbf16>, vector<73x64xf32> -> vector<73x64xf32>
    %106 = arith.addf %100, %105 : vector<73x64xf32>
    %c24 = arith.constant 24 : index
    %c0_95 = arith.constant 0 : index
    %107 = vector.load %arg11[%c24, %c0_95] : memref<97x64xf32, #tpu.memory_space<vmem>>, vector<73x64xf32>
    %108 = arith.truncf %107 : vector<73x64xf32> to vector<73x64xbf16>
    %c8 = arith.constant 8 : index
    %c0_96 = arith.constant 0 : index
    %c0_97 = arith.constant 0 : index
    %109 = vector.load %arg5[%c8, %c0_96, %c0_97] : memref<9x64x64xbf16, #tpu.memory_space<vmem>>, vector<1x64x64xbf16>
    %110 = vector.shape_cast %109 : vector<1x64x64xbf16> to vector<64x64xbf16>
    %cst_98 = arith.constant dense<0.000000e+00> : vector<73x64xf32>
    %111 = tpu.matmul %108, %110, %cst_98 {dimension_numbers = #tpu.dot_dimension_numbers<[1], [0], [0], [1], [0, 0, 1, 1], [], []>} : vector<73x64xbf16>, vector<64x64xbf16>, vector<73x64xf32> -> vector<73x64xf32>
    %112 = arith.addf %106, %111 : vector<73x64xf32>
    %c0_99 = arith.constant 0 : index
    %c0_100 = arith.constant 0 : index
    %113 = vector.load %arg6[%c0_99, %c0_100] : memref<1x64xf32, #tpu.memory_space<vmem>>, vector<1x64xf32>
    %114 = vector.broadcast %113 : vector<1x64xf32> to vector<73x64xf32>
    %115 = arith.addf %112, %114 : vector<73x64xf32>
    %cst_101 = arith.constant 0.000000e+00 : f32
    %116 = vector.broadcast %cst_101 : f32 to vector<73x64xf32>
    %117 = arith.maximumf %115, %116 : vector<73x64xf32>
    %118 = tpu.iota {dimensions = array<i32: 1>} : vector<1x4xi32>
    %c0_102 = arith.constant 0 : index
    %c0_103 = arith.constant 0 : index
    %119 = vector.load %arg8[%c0_102, %c0_103] : memref<1x4xf32, #tpu.memory_space<vmem>>, vector<1x4xf32>
    %c0_104 = arith.constant 0 : index
    %c0_105 = arith.constant 0 : index
    %c0_106 = arith.constant 0 : index
    %120 = vector.load %arg7[%c0_104, %c0_105, %c0_106] : memref<4x73x64xbf16, #tpu.memory_space<vmem>>, vector<1x73x64xbf16>
    %121 = vector.shape_cast %120 : vector<1x73x64xbf16> to vector<73x64xbf16>
    %122 = arith.extf %121 : vector<73x64xbf16> to vector<73x64xf32>
    %123 = arith.mulf %117, %122 : vector<73x64xf32>
    %cst_107 = arith.constant dense<0.000000e+00> : vector<73xf32>
    %124 = vector.multi_reduction <add>, %123, %cst_107 [1] : vector<73x64xf32> to vector<73xf32>
    %125 = vector.shape_cast %124 : vector<73xf32> to vector<73x1xf32>
    %cst_108 = arith.constant dense<0.000000e+00> : vector<1xf32>
    %126 = vector.multi_reduction <add>, %125, %cst_108 [0] : vector<73x1xf32> to vector<1xf32>
    %127 = vector.shape_cast %126 : vector<1xf32> to vector<1x1xf32>
    %c0_i32 = arith.constant 0 : i32
    %128 = vector.broadcast %c0_i32 : i32 to vector<1x4xi32>
    %129 = arith.cmpi eq, %118, %128 : vector<1x4xi32>
    %cst_109 = arith.constant 0.000000e+00 : f32
    %130 = vector.shape_cast %127 : vector<1x1xf32> to vector<1x1xf32>
    %131 = vector.broadcast %130 : vector<1x1xf32> to vector<1x4xf32>
    %132 = vector.broadcast %cst_109 : f32 to vector<1x4xf32>
    %133 = arith.select %129, %131, %132 : vector<1x4xi1>, vector<1x4xf32>
    %134 = arith.addf %119, %133 : vector<1x4xf32>
    %c1_110 = arith.constant 1 : index
    %c0_111 = arith.constant 0 : index
    %c0_112 = arith.constant 0 : index
    %135 = vector.load %arg7[%c1_110, %c0_111, %c0_112] : memref<4x73x64xbf16, #tpu.memory_space<vmem>>, vector<1x73x64xbf16>
    %136 = vector.shape_cast %135 : vector<1x73x64xbf16> to vector<73x64xbf16>
    %137 = arith.extf %136 : vector<73x64xbf16> to vector<73x64xf32>
    %138 = arith.mulf %117, %137 : vector<73x64xf32>
    %cst_113 = arith.constant dense<0.000000e+00> : vector<73xf32>
    %139 = vector.multi_reduction <add>, %138, %cst_113 [1] : vector<73x64xf32> to vector<73xf32>
    %140 = vector.shape_cast %139 : vector<73xf32> to vector<73x1xf32>
    %cst_114 = arith.constant dense<0.000000e+00> : vector<1xf32>
    %141 = vector.multi_reduction <add>, %140, %cst_114 [0] : vector<73x1xf32> to vector<1xf32>
    %142 = vector.shape_cast %141 : vector<1xf32> to vector<1x1xf32>
    %c1_i32 = arith.constant 1 : i32
    %143 = vector.broadcast %c1_i32 : i32 to vector<1x4xi32>
    %144 = arith.cmpi eq, %118, %143 : vector<1x4xi32>
    %cst_115 = arith.constant 0.000000e+00 : f32
    %145 = vector.shape_cast %142 : vector<1x1xf32> to vector<1x1xf32>
    %146 = vector.broadcast %145 : vector<1x1xf32> to vector<1x4xf32>
    %147 = vector.broadcast %cst_115 : f32 to vector<1x4xf32>
    %148 = arith.select %144, %146, %147 : vector<1x4xi1>, vector<1x4xf32>
    %149 = arith.addf %134, %148 : vector<1x4xf32>
    %c2_116 = arith.constant 2 : index
    %c0_117 = arith.constant 0 : index
    %c0_118 = arith.constant 0 : index
    %150 = vector.load %arg7[%c2_116, %c0_117, %c0_118] : memref<4x73x64xbf16, #tpu.memory_space<vmem>>, vector<1x73x64xbf16>
    %151 = vector.shape_cast %150 : vector<1x73x64xbf16> to vector<73x64xbf16>
    %152 = arith.extf %151 : vector<73x64xbf16> to vector<73x64xf32>
    %153 = arith.mulf %117, %152 : vector<73x64xf32>
    %cst_119 = arith.constant dense<0.000000e+00> : vector<73xf32>
    %154 = vector.multi_reduction <add>, %153, %cst_119 [1] : vector<73x64xf32> to vector<73xf32>
    %155 = vector.shape_cast %154 : vector<73xf32> to vector<73x1xf32>
    %cst_120 = arith.constant dense<0.000000e+00> : vector<1xf32>
    %156 = vector.multi_reduction <add>, %155, %cst_120 [0] : vector<73x1xf32> to vector<1xf32>
    %157 = vector.shape_cast %156 : vector<1xf32> to vector<1x1xf32>
    %c2_i32 = arith.constant 2 : i32
    %158 = vector.broadcast %c2_i32 : i32 to vector<1x4xi32>
    %159 = arith.cmpi eq, %118, %158 : vector<1x4xi32>
    %cst_121 = arith.constant 0.000000e+00 : f32
    %160 = vector.shape_cast %157 : vector<1x1xf32> to vector<1x1xf32>
    %161 = vector.broadcast %160 : vector<1x1xf32> to vector<1x4xf32>
    %162 = vector.broadcast %cst_121 : f32 to vector<1x4xf32>
    %163 = arith.select %159, %161, %162 : vector<1x4xi1>, vector<1x4xf32>
    %164 = arith.addf %149, %163 : vector<1x4xf32>
    %c3_122 = arith.constant 3 : index
    %c0_123 = arith.constant 0 : index
    %c0_124 = arith.constant 0 : index
    %165 = vector.load %arg7[%c3_122, %c0_123, %c0_124] : memref<4x73x64xbf16, #tpu.memory_space<vmem>>, vector<1x73x64xbf16>
    %166 = vector.shape_cast %165 : vector<1x73x64xbf16> to vector<73x64xbf16>
    %167 = arith.extf %166 : vector<73x64xbf16> to vector<73x64xf32>
    %168 = arith.mulf %117, %167 : vector<73x64xf32>
    %cst_125 = arith.constant dense<0.000000e+00> : vector<73xf32>
    %169 = vector.multi_reduction <add>, %168, %cst_125 [1] : vector<73x64xf32> to vector<73xf32>
    %170 = vector.shape_cast %169 : vector<73xf32> to vector<73x1xf32>
    %cst_126 = arith.constant dense<0.000000e+00> : vector<1xf32>
    %171 = vector.multi_reduction <add>, %170, %cst_126 [0] : vector<73x1xf32> to vector<1xf32>
    %172 = vector.shape_cast %171 : vector<1xf32> to vector<1x1xf32>
    %c3_i32 = arith.constant 3 : i32
    %173 = vector.broadcast %c3_i32 : i32 to vector<1x4xi32>
    %174 = arith.cmpi eq, %118, %173 : vector<1x4xi32>
    %cst_127 = arith.constant 0.000000e+00 : f32
    %175 = vector.shape_cast %172 : vector<1x1xf32> to vector<1x1xf32>
    %176 = vector.broadcast %175 : vector<1x1xf32> to vector<1x4xf32>
    %177 = vector.broadcast %cst_127 : f32 to vector<1x4xf32>
    %178 = arith.select %174, %176, %177 : vector<1x4xi1>, vector<1x4xf32>
    %179 = arith.addf %164, %178 : vector<1x4xf32>
    %c0_128 = arith.constant 0 : index
    %c0_129 = arith.constant 0 : index
    %180 = vector.load %arg9[%c0_128, %c0_129] : memref<1x4xf32, #tpu.memory_space<vmem>>, vector<1x4xf32>
    tpu.vector_store %arg9[%c0_128, %c0_129], %179 {strides = array<i32>} : memref<1x4xf32, #tpu.memory_space<vmem>>, vector<1x4xf32>,
    return
  }
}

</mosaic_0001>

<bundles_post_ra>
// kernel: _forward_impl.1
= control target key start
LH: loop header
LB: loop body
LE: loop exit
PB: predicated region body
PF: predicated region fallthrough
CT: control target
= control target key end

     0   :  { %s5951_s0 = inlined_call_operand.vmem [shape: bf16[121,256], index: 0, kind: input, shape index: {}]   ;;  %s5952_s1 = inlined_call_operand.vmem [shape: bf16[4,256,128], index: 1, kind: input, shape index: {}]   ;;  %s5953_s2 = inlined_call_operand.vmem [shape: f32[1,128], index: 2, kind: input, shape index: {}]   ;;  %s5954_s3 = inlined_call_operand.vmem [shape: bf16[4,128,64], index: 3, kind: input, shape index: {}]   ;;  %s5955_s4 = inlined_call_operand.vmem [shape: f32[1,64], index: 4, kind: input, shape index: {}]   ;;  %s5956_s5 = inlined_call_operand.vmem [shape: bf16[9,64,64], index: 5, kind: input, shape index: {}]   ;;  %s5957_s6 = inlined_call_operand.vmem [shape: f32[1,64], index: 6, kind: input, shape index: {}]   ;;  %s5958_s7 = inlined_call_operand.vmem [shape: bf16[4,73,64], index: 7, kind: input, shape index: {}]   ;;  %s5959_s8 = inlined_call_operand.vmem [shape: f32[1,4], index: 8, kind: input, shape index: {}]   ;;  %s5960_s9 = inlined_call_operand.hbm [shape: f32[1,4], index: 9, kind: output, shape index: {}]  }
   0x1   :  { %v4419_v0 = vld [vmem:[%s5952_s1 + $0xb8] sm:$0xff]  ;;  %v4418_v1 = vld [vmem:[%s5952_s1 + $0xb0] sm:$0xff]  ;;  %v4417_v4 = vld [vmem:[%s5952_s1 + $0xa8] sm:$0xff] }
   0x2   :  { %4635 = vmatpush.bf16.msra.mxu1 %v4419_v0  ;;  %4636 = vmatpush.bf16.msra.mxu2 %v4419_v0  ;;  %v4411_v2 = vld [vmem:[%s5952_s1 + $0x78] sm:$0xff]  ;;  %v4410_v3 = vld [vmem:[%s5952_s1 + $0x70] sm:$0xff]  ;;  %v4409_v5 = vld [vmem:[%s5952_s1 + $0x68] sm:$0xff] }
   0x3   :  { %390 = vmatpush.bf16.msra.mxu0 %v4419_v0  ;;  %632 = vmatpush.bf16.msra.mxu3 %v4411_v2  ;;  %v4416_v6 = vld [vmem:[%s5952_s1 + $0xa0] sm:$0xff] }
   0x6   :  { %4637 = vmatpush.bf16.msra.mxu1 %v4418_v1  ;;  %4638 = vmatpush.bf16.msra.mxu2 %v4418_v1 }
   0x7   :  { %391 = vmatpush.bf16.msra.mxu0 %v4418_v1  ;;  %633 = vmatpush.bf16.msra.mxu3 %v4410_v3 }
   0xa   :  { %4639 = vmatpush.bf16.msra.mxu1 %v4417_v4  ;;  %4640 = vmatpush.bf16.msra.mxu2 %v4417_v4 }
   0xb   :  { %14 = vsyncpa [#allocation5], 0  ;;  %v3469_v7 = vld [vmem:[%s5951_s0 + $0x40] sm:$0xf]  ;;  %v4391_v8 = vld [vmem:[%s5951_s0 + $0x44] sm:$0xf0]  ;;  %392 = vmatpush.bf16.msra.mxu0 %v4417_v4  ;;  %634 = vmatpush.bf16.msra.mxu3 %v4409_v5 }
   0xc   :  { %v4408_v9 = vld [vmem:[%s5952_s1 + $0x60] sm:$0xff]  ;;  %v4415_v10 = vld [vmem:[%s5952_s1 + $0x98] sm:$0xff]  ;;  %v4765_v11 = vor.u32 %v4391_v8, %v3469_v7  ;;  %v4395_v13 = vld [vmem:[%s5951_s0 + $0x64] sm:$0x70]  ;;  %vm169_vm0 = vsmask.f32 7424 }
   0xd   :  { %v3485_v12 = vld [vmem:[%s5951_s0 + $0x60] sm:$0xf]  ;;  %v3477_v14 = vld [vmem:[%s5951_s0 + $0x50] sm:$0xf]  ;;  %v4393_v15 = vld [vmem:[%s5951_s0 + $0x54] sm:$0xf0] }
   0xe   :  { %4641 = vmatpush.bf16.msra.mxu1 %v4416_v6  ;;  %4642 = vmatpush.bf16.msra.mxu2 %v4416_v6  ;;  %v4407_v16 = vld [vmem:[%s5952_s1 + $0x58] sm:$0xff]  ;;  %v4782_v17 = vor.u32 %v4395_v13, %v3485_v12  ;;  %v4414_v18 = vld [vmem:[%s5952_s1 + $0x90] sm:$0xff]  ;;  %v4787_v19 = vor.u32 %v4393_v15, %v3477_v14  ;;  %v230_v20 = vshll.u32 %v4765_v11, 16  ;;  %v4413_v23 = vld [vmem:[%s5952_s1 + $0x88] sm:$0xff]  ;;  %v242_v25 = vshrl.u32 %v4765_v11, 16  ;;  %s3394_s22 = sshll.u32 %s5960_s9, 4  ;;  %s3395_s22 = int_to_ptr.hbm [resolvable:$true] %s3394_s22 }
   0xf   :  { %393 = vmatpush.bf16.msra.mxu0 %v4416_v6  ;;  %635 = vmatpush.bf16.msra.mxu3 %v4408_v9  ;;  %v4406_v21 = vld [vmem:[%s5952_s1 + $0x50] sm:$0xff]  ;;  %v3437_v27 = vld [vmem:[%s5951_s0] sm:$0xf]  ;;  %v4405_v28 = vld [vmem:[%s5952_s1 + $0x48] sm:$0xff]  ;;  %vm779_vm1 = vsmask.f32 6400 }
  0x10   :  { %v262_v22 = vshll.u32 %v4782_v17, 16  ;;  %v4797_v24 = vrot.slane %v230_v20, 1  ;;  %v246_v26 = vshll.u32 %v4787_v19, 16  ;;  %v4383_v29 = vld [vmem:[%s5951_s0 + $0x4] sm:$0xf0]  ;;  %v274_v31 = vshrl.u32 %v4782_v17, 16 }
  0x11   :  { %v4813_v32 = vor.u32 %v4383_v29, %v3437_v27  ;;  %v3445_v33 = vld [vmem:[%s5951_s0 + $0x10] sm:$0xf]  ;;  %v4385_v34 = vld [vmem:[%s5951_s0 + $0x14] sm:$0xf0]  ;;  %v4412_v35 = vld [vmem:[%s5952_s1 + $0x80] sm:$0xff]  ;;  %v258_v60 = vshrl.u32 %v4787_v19, 16 }
  0x12   :  { %4643 = vmatpush.bf16.msra.mxu1 %v4415_v10  ;;  %4644 = vmatpush.bf16.msra.mxu2 %v4415_v10  ;;  %v4810_v30 = vrot.slane %v262_v22, 1  ;;  %v244_v36 = vor.u32 %v242_v25, %v4797_v24  ;;  %v248_v37 = vrot.slane %v246_v26, 1  ;;  %v4825_v38 = vor.u32 %v4385_v34, %v3445_v33  ;;  %v4403_v39 = vld [vmem:[%s5952_s1 + $0x38] sm:$0xff]  ;;  %v4404_v42 = vld [vmem:[%s5952_s1 + $0x40] sm:$0xff]  ;;  %v3439_v47 = vld [vmem:[%s5951_s0 + $0x8] sm:$0xf0] }
  0x13   :  { %394 = vmatpush.bf16.msra.mxu0 %v4415_v10  ;;  %636 = vmatpush.bf16.msra.mxu3 %v4407_v16  ;;  %v4427_v40 = vld [vmem:[%s5952_s1 + $0xf8] sm:$0xff]  ;;  %v173_v41 = vshll.u32 %v4813_v32, 16  ;;  %v171_v43 = vshrl.u32 %v4813_v32, 16  ;;  %v4382_v46 = vld [vmem:[%s5951_s0 + $0x4] sm:$0xf]  ;;  %v4402_v52 = vld [vmem:[%s5952_s1 + $0x30] sm:$0xff] }
  0x14   :  { %v178_v44 = vshll.u32 %v4825_v38, 16  ;;  %v276_v45 = vor.u32 %v274_v31, %v4810_v30  ;;  %v249_v49 = vsel %vm169_vm0, %v244_v36, %v248_v37  ;;  %v4487_v50 = vld [vmem:[%s5952_s1 + $0x1f8] sm:$0xff]  ;;  %v4426_v53 = vld [vmem:[%s5952_s1 + $0xf0] sm:$0xff]  ;;  %v3442_v55 = vor.u32 %v4382_v46, %v3439_v47  ;;  %v4401_v58 = vld [vmem:[%s5952_s1 + $0x28] sm:$0xff] }
  0x15   :  { %v175_v48 = vrot.slane %v173_v41, 1  ;;  %v4486_v57 = vld [vmem:[%s5952_s1 + $0x1f0] sm:$0xff]  ;;  %v4425_v59 = vld [vmem:[%s5952_s1 + $0xe8] sm:$0xff]  ;;  %v4400_v61 = vld [vmem:[%s5952_s1 + $0x20] sm:$0xff]  ;;  %v260_v1 = vor.u32 %v258_v60, %v248_v37  ;;  %v194_v5 = vshrl.u32 %v4825_v38, 16  ;;  %vm1225_vm2 = vcmask 1045504  }
  0x16   :  { %4645 = vmatpush.bf16.msra.mxu1 %v4414_v18  ;;  %4646 = vmatpush.bf16.msra.mxu2 %v4414_v18  ;;  %v180_v51 = vrot.slane %v178_v44, 1  ;;  %v4424_v62 = vld [vmem:[%s5952_s1 + $0xe0] sm:$0xff]  ;;  %v4387_v0 = vld [vmem:[%s5951_s0 + $0x24] sm:$0xf0]  ;;  %v4399_v3 = vld [vmem:[%s5952_s1 + $0x18] sm:$0xff]  ;;  %vm2081_vm3 = vcmask 523264  }
  0x17   :  { %395 = vmatpush.bf16.msra.mxu0 %v4414_v18  ;;  %637 = vmatpush.bf16.msra.mxu3 %v4406_v21  ;;  %v176_v54 = vor.u32 %v175_v48, %v171_v43  ;;  %v3453_v63 = vld [vmem:[%s5951_s0 + $0x20] sm:$0xf]  ;;  %v4423_v4 = vld [vmem:[%s5952_s1 + $0xd8] sm:$0xff]  ;;  %v265_v7 = vsel %vm169_vm0, %v260_v1, %v4810_v30  ;;  %v4398_v8 = vld [vmem:[%s5952_s1 + $0x10] sm:$0xff]  ;;  %v185_v18 = vshll.u32 %v3442_v55, 16  ;;  %vm2094_vm4 = vcmask 516096  }
  0x18   :  { %v4879_v2 = vor.u32 %v4387_v0, %v3453_v63  ;;  %v196_v9 = vor.u32 %v194_v5, %v180_v51  ;;  %v4422_v12 = vld [vmem:[%s5952_s1 + $0xd0] sm:$0xff]  ;;  %v3447_v14 = vld [vmem:[%s5951_s0 + $0x18] sm:$0xf0]  ;;  %v4485_v16 = vld [vmem:[%s5952_s1 + $0x1e8] sm:$0xff]  ;;  %vm3133_vm5 = vcmask 1040384   ;;  %vm3385_vm10 = vcmask 24576  }
  0x19   :  { %v181_v56 = vsel %vm169_vm0, %v176_v54, %v180_v51  ;;  %v4384_v13 = vld [vmem:[%s5951_s0 + $0x14] sm:$0xf]  ;;  %v4397_v21 = vld [vmem:[%s5952_s1 + $0x8] sm:$0xff]  ;;  %v187_v25 = vrot.slane %v185_v18, 1  ;;  %v4396_v27 = vld [vmem:[%s5952_s1] sm:$0xff] }
  0x1a   :  { %4647 = vmatpush.bf16.msra.mxu1 %v4413_v23  ;;  %4648 = vmatpush.bf16.msra.mxu2 %v4413_v23  ;;  %v198_v6 = vshll.u32 %v4879_v2, 16  ;;  %v3450_v20 = vor.u32 %v4384_v13, %v3447_v14  ;;  %v4421_v22 = vld [vmem:[%s5952_s1 + $0xc8] sm:$0xff]  ;;  %v4479_v29 = vld [vmem:[%s5952_s1 + $0x1b8] sm:$0xff]  ;;  %v3461_v31 = vld [vmem:[%s5951_s0 + $0x30] sm:$0xf] }
  0x1b   :  { %396 = vmatpush.bf16.msra.mxu0 %v4413_v23  ;;  %638 = vmatpush.bf16.msra.mxu3 %v4405_v28  ;;  %v183_v23 = vshrl.u32 %v3442_v55, 16  ;;  %v4420_v28 = vld [vmem:[%s5952_s1 + $0xc0] sm:$0xff]  ;;  %v4457_v30 = vld [vmem:[%s5952_s1 + $0x178] sm:$0xff]  ;;  %v4478_v37 = vld [vmem:[%s5952_s1 + $0x1b0] sm:$0xff] }
  0x1c   :  { %v200_v10 = vrot.slane %v198_v6, 1  ;;  %v190_v26 = vshll.u32 %v3450_v20, 16  ;;  %v4389_v33 = vld [vmem:[%s5951_s0 + $0x34] sm:$0xf0]  ;;  %v3455_v46 = vld [vmem:[%s5951_s0 + $0x28] sm:$0xf0] }
  0x1d   :  { %v188_v34 = vor.u32 %v187_v25, %v183_v23  ;;  %v4931_v36 = vor.u32 %v4389_v33, %v3461_v31  ;;  %v4477_v47 = vld [vmem:[%s5952_s1 + $0x1a8] sm:$0xff]  ;;  %v4484_v48 = vld [vmem:[%s5952_s1 + $0x1e0] sm:$0xff]  ;;  %v4388_v60 = vld [vmem:[%s5951_s0 + $0x34] sm:$0xf] }
  0x1e   :  { %4649 = vmatpush.bf16.msra.mxu1 %v4412_v35  ;;  %4650 = vmatpush.bf16.msra.mxu2 %v4412_v35  ;;  %v201_v15 = vsel %vm169_vm0, %v196_v9, %v200_v10  ;;  %v4476_v51 = vld [vmem:[%s5952_s1 + $0x1a0] sm:$0xff]  ;;  %v4483_v63 = vld [vmem:[%s5952_s1 + $0x1d8] sm:$0xff]  ;;  %v4474_v13 = vld [vmem:[%s5952_s1 + $0x190] sm:$0xff] }
  0x1f   :  { %639 = vmatpush.bf16.msra.mxu3 %v4404_v42  ;;  %397 = vmatpush.bf16.msra.mxu0 %v4412_v35  ;;  %v192_v35 = vrot.slane %v190_v26, 1  ;;  %v214_v41 = vshll.u32 %v4931_v36, 16  ;;  %v4390_v9 = vld [vmem:[%s5951_s0 + $0x44] sm:$0xf]  ;;  %v4392_v25 = vld [vmem:[%s5951_s0 + $0x54] sm:$0xf] }
  0x20   :  { %v3479_v26 = vld [vmem:[%s5951_s0 + $0x58] sm:$0xf0]  ;;  %v4451_v31 = vld [vmem:[%s5952_s1 + $0x148] sm:$0xff]  ;;  %v4444_v33 = vld [vmem:[%s5952_s1 + $0x110] sm:$0xff] }
  0x21   :  { %418 = vmatmul.bf16.vlgmr.msra.gmra.mxu1 %v249_v49  ;;  %428 = vmatmul.bf16.vlgmr.msra.gmra.mxu2 %v276_v45  ;;  %v193_v42 = vsel %vm169_vm0, %v188_v34, %v192_v35  ;;  %v216_v44 = vrot.slane %v214_v41, 1  ;;  %v4386_v45 = vld [vmem:[%s5951_s0 + $0x24] sm:$0xf]  ;;  %v3487_v41 = vld [vmem:[%s5951_s0 + $0x68] sm:$0x70] }
  0x22   :  { %588 = vmatpush.bf16.msrb.mxu2 %v4403_v39  ;;  %434 = vmatpush.bf16.msrb.mxu1 %v4427_v40  ;;  %v4456_v39 = vld [vmem:[%s5952_s1 + $0x170] sm:$0xff]  ;;  %v210_v40 = vshrl.u32 %v4879_v2, 16  ;;  %v3458_v49 = vor.u32 %v4386_v45, %v3455_v46  ;;  %v4450_v45 = vld [vmem:[%s5952_s1 + $0x140] sm:$0xff]  ;;  %v3653_v46 = vld [vmem:[%s5951_s0 + $0x8] sm:$0xe] }
  0x23   :  { %1410 = vmatpush.bf16.msrb.mxu3 %v4487_v50  ;;  %398 = vmatmul.bf16.vlgmr.msra.gmra.mxu0 %v181_v56 }
  0x24   :  { %640 = vmatmul.bf16.vlgmr.msra.gmra.mxu3 %v3442_v55  ;;  %v212_v43 = vor.u32 %v210_v40, %v200_v10  ;;  %v206_v54 = vshll.u32 %v3458_v49, 16  ;;  %v218_v5 = vshrl.u32 %v3458_v49, 16  ;;  %v3471_v10 = vld [vmem:[%s5951_s0 + $0x48] sm:$0xf0] }
  0x25   :  { %v3474_v14 = vor.u32 %v4390_v9, %v3471_v10 }
  0x26   :  { %589 = vmatpush.bf16.msrb.mxu2 %v4402_v52  ;;  %435 = vmatpush.bf16.msrb.mxu1 %v4426_v53  ;;  %v217_v50 = vsel %vm169_vm0, %v212_v43, %v216_v44  ;;  %v4454_v52 = vld [vmem:[%s5952_s1 + $0x160] sm:$0xff]  ;;  %v202_v53 = vshrl.u32 %v3450_v20, 16  ;;  %v208_v56 = vrot.slane %v206_v54, 1  ;;  %v3807_v54 = vld [vmem:[%s5951_s0 + $0x10] sm:$0xf0] }
  0x27   :  { %1411 = vmatpush.bf16.msrb.mxu3 %v4486_v57  ;;  %v226_v57 = vshrl.u32 %v4931_v36, 16  ;;  %v250_v34 = vshrl.u32 %v3474_v14, 16  ;;  %v4480_v43 = vld [vmem:[%s5952_s1 + $0x1c0] sm:$0xff] }
  0x28   :  { %v204_v55 = vor.u32 %v202_v53, %v192_v35 }
  0x2a   :  { %590 = vmatpush.bf16.msrb.mxu2 %v4401_v58  ;;  %436 = vmatpush.bf16.msrb.mxu1 %v4425_v59  ;;  %v209_v58 = vsel %vm169_vm0, %v204_v55, %v208_v56  ;;  %v228_v59 = vor.u32 %v226_v57, %v216_v44  ;;  %v4442_v55 = vld [vmem:[%s5952_s1 + $0x100] sm:$0xff] }
  0x2b   :  { %1412 = vmatpush.bf16.msrb.mxu3 %v4485_v16  ;;  %v4446_v16 = vld [vmem:[%s5952_s1 + $0x120] sm:$0xff] }
  0x2c   :  { %v233_v1 = vsel %vm169_vm0, %v228_v59, %v4797_v24  ;;  %v3815_v59 = vld [vmem:[%s5951_s0 + $0x20] sm:$0xf0] }
  0x2e   :  { %591 = vmatpush.bf16.msrb.mxu2 %v4400_v61  ;;  %437 = vmatpush.bf16.msrb.mxu1 %v4424_v62  ;;  %v3463_v61 = vld [vmem:[%s5951_s0 + $0x38] sm:$0xf0] }
  0x2f   :  { %1413 = vmatpush.bf16.msrb.mxu3 %v4484_v48  ;;  %v4449_v62 = vld [vmem:[%s5952_s1 + $0x138] sm:$0xff]  ;;  %v3466_v0 = vor.u32 %v4388_v60, %v3463_v61  ;;  %v4431_v48 = vld [vmem:[%s5951_s0 + $0x1c] sm:$0xf0] }
  0x30   :  { %1014 = vmatpush.bf16.msrb.mxu0 %v4449_v62 }
  0x31   :  { %423 = vmatmul.bf16.gmra.mxu1 %v265_v7  ;;  %v222_v6 = vshll.u32 %v3466_v0, 16  ;;  %v220_v7 = vor.u32 %v218_v5, %v208_v56  ;;  %v234_v18 = vshrl.u32 %v3466_v0, 16 }
  0x32   :  { %592 = vmatpush.bf16.msrb.mxu2 %v4399_v3  ;;  %438 = vmatpush.bf16.msrb.mxu1 %v4423_v4  ;;  %v4453_v3 = vld [vmem:[%s5952_s1 + $0x158] sm:$0xff]  ;;  %v4448_v4 = vld [vmem:[%s5952_s1 + $0x130] sm:$0xff] }
  0x33   :  { %403 = vmatmul.bf16.gmra.mxu0 %v201_v15  ;;  %1414 = vmatpush.bf16.msrb.mxu3 %v4483_v63  ;;  %v4452_v15 = vld [vmem:[%s5952_s1 + $0x150] sm:$0xff] }
  0x34   :  { %645 = vmatmul.bf16.gmra.mxu3 %v3450_v20  ;;  %1015 = vmatpush.bf16.msrb.mxu0 %v4448_v4  ;;  %v238_v20 = vshll.u32 %v3474_v14, 16 }
  0x36   :  { %593 = vmatpush.bf16.msrb.mxu2 %v4398_v8  ;;  %439 = vmatpush.bf16.msrb.mxu1 %v4422_v12  ;;  %v224_v8 = vrot.slane %v222_v6, 1  ;;  %v4447_v12 = vld [vmem:[%s5952_s1 + $0x128] sm:$0xff] }
  0x38   :  { %v225_v24 = vsel %vm169_vm0, %v220_v7, %v224_v8  ;;  %1016 = vmatpush.bf16.msrb.mxu0 %v4447_v12  ;;  %v3669_v12 = vld [vmem:[%s5951_s0 + $0x28] sm:$0xf] }
  0x3a   :  { %594 = vmatpush.bf16.msrb.mxu2 %v4397_v21  ;;  %440 = vmatpush.bf16.msrb.mxu1 %v4421_v22  ;;  %v236_v21 = vor.u32 %v234_v18, %v224_v8  ;;  %v240_v22 = vrot.slane %v238_v20, 1  ;;  %v3823_v18 = vld [vmem:[%s5951_s0 + $0x30] sm:$0xf0] }
  0x3c   :  { %1017 = vmatpush.bf16.msrb.mxu0 %v4446_v16  ;;  %v241_v23 = vsel %vm169_vm0, %v236_v21, %v240_v22 }
  0x3e   :  { %595 = vmatpush.bf16.msrb.mxu2 %v4396_v27  ;;  %441 = vmatpush.bf16.msrb.mxu1 %v4420_v28  ;;  %v4445_v27 = vld [vmem:[%s5952_s1 + $0x118] sm:$0xff]  ;;  %v4473_v28 = vld [vmem:[%s5952_s1 + $0x188] sm:$0xff] }
  0x40   :  { %1018 = vmatpush.bf16.msrb.mxu0 %v4445_v27 }
  0x41   :  { %596 = vmatmul.bf16.vlgmr.msrb.gmra.mxu2 %v4813_v32  ;;  %442 = vmatmul.bf16.vlgmr.msrb.gmra.mxu1 %v193_v42  ;;  %v4455_v32 = vld [vmem:[%s5952_s1 + $0x168] sm:$0xff]  ;;  %v4472_v42 = vld [vmem:[%s5952_s1 + $0x180] sm:$0xff] }
  0x42   :  { %1366 = vmatpush.bf16.msra.mxu2 %v4479_v29  ;;  %1058 = vmatpush.bf16.msra.mxu1 %v4457_v30  ;;  %v4481_v29 = vld [vmem:[%s5952_s1 + $0x1c8] sm:$0xff]  ;;  %v3482_v30 = vor.u32 %v4392_v25, %v3479_v26  ;;  %v3655_v26 = vld [vmem:[%s5951_s0 + $0x10] sm:$0xf0] }
  0x43   :  { %408 = vmatmul.bf16.gmra.mxu0 %v217_v50  ;;  %v4428_v25 = vld [vmem:[%s5951_s0 + $0xc] sm:$0xe] }
  0x44   :  { %650 = vmatmul.bf16.gmra.mxu3 %v3458_v49  ;;  %v254_v35 = vshll.u32 %v3482_v30, 16  ;;  %1019 = vmatpush.bf16.msrb.mxu0 %v4444_v33  ;;  %v266_v50 = vshrl.u32 %v3482_v30, 16 }
  0x46   :  { %1367 = vmatpush.bf16.msra.mxu2 %v4478_v37  ;;  %1059 = vmatpush.bf16.msra.mxu1 %v4456_v39  ;;  %v256_v37 = vrot.slane %v254_v35, 1  ;;  %v4394_v39 = vld [vmem:[%s5951_s0 + $0x64] sm:$0xf] }
  0x47   :  { %v5051_v44 = vor.u32 %v4394_v39, %v3487_v41  ;;  %v4459_v39 = vld [vmem:[%s5951_s0 + $0xc] sm:$0xf0]  ;;  %v4461_v41 = vld [vmem:[%s5951_s0 + $0x1c] sm:$0xf0] }
  0x48   :  { %v268_v5 = vor.u32 %v266_v50, %v256_v37 }
  0x49   :  { %v270_v53 = vshll.u32 %v5051_v44, 16 }
  0x4a   :  { %1368 = vmatpush.bf16.msra.mxu2 %v4477_v47  ;;  %1060 = vmatpush.bf16.msra.mxu1 %v4455_v32  ;;  %v4429_v47 = vld [vmem:[%s5951_s0 + $0xc] sm:$0xf0]  ;;  %v3661_v32 = vld [vmem:[%s5951_s0 + $0x18] sm:$0xf] }
  0x4b   :  { %v3654_v49 = vor.u32 %v4429_v47, %v3653_v46  ;;  %v272_v6 = vrot.slane %v270_v53, 1  ;;  %v4435_v46 = vld [vmem:[%s5951_s0 + $0x3c] sm:$0xf0] }
  0x4d   :  { %v781_v56 = vshrl.u32 %v3654_v49, 16  ;;  %v784_v57 = vshll.u32 %v3654_v49, 16  ;;  %v273_v10 = vsel %vm169_vm0, %v268_v5, %v272_v6 }
  0x4e   :  { %1369 = vmatpush.bf16.msra.mxu2 %v4476_v51  ;;  %1061 = vmatpush.bf16.msra.mxu1 %v4454_v52  ;;  %v4458_v51 = vld [vmem:[%s5951_s0 + $0xc] sm:$0xc]  ;;  %v3662_v52 = vor.u32 %v4431_v48, %v3661_v32 }
  0x4f   :  { %v783_v62 = vrot.slane %v781_v56, 1  ;;  %v4464_v56 = vld [vmem:[%s5951_s0 + $0x3c] sm:$0xf] }
  0x50   :  { %v789_v60 = vshrl.u32 %v3662_v52, 16  ;;  %v792_v61 = vshll.u32 %v3662_v52, 16 }
  0x51   :  { %601 = vmatmul.bf16.gmra.mxu2 %v4825_v38  ;;  %447 = vmatmul.bf16.gmra.mxu1 %v209_v58  ;;  %v4475_v38 = vld [vmem:[%s5952_s1 + $0x198] sm:$0xff] }
  0x52   :  { %1370 = vmatpush.bf16.msra.mxu2 %v4475_v38  ;;  %1062 = vmatpush.bf16.msra.mxu1 %v4453_v3  ;;  %v4460_v58 = vld [vmem:[%s5951_s0 + $0x1c] sm:$0xf]  ;;  %v786_v38 = vrot.slane %v784_v57, 2  ;;  %v791_v63 = vrot.slane %v789_v60, 1  ;;  %v3831_v57 = vld [vmem:[%s5951_s0 + $0x40] sm:$0xf0] }
  0x53   :  { %413 = vmatmul.bf16.gmra.mxu0 %v233_v1  ;;  %v3810_v1 = vor.u32 %v4458_v51, %v3807_v54  ;;  %v3818_v3 = vor.u32 %v4460_v58, %v3815_v59 }
  0x54   :  { %655 = vmatmul.bf16.gmra.mxu3 %v3466_v0  ;;  %v794_v0 = vrot.slane %v792_v61, 2  ;;  %v787_v4 = vor.u32 %v786_v38, %v783_v62 }
  0x55   :  { %v1230_v9 = vrot.slane %v3818_v3, 2  ;;  %v4432_v3 = vld [vmem:[%s5951_s0 + $0x2c] sm:$0xf] }
  0x56   :  { %1371 = vmatpush.bf16.msra.mxu2 %v4474_v13  ;;  %1063 = vmatpush.bf16.msra.mxu1 %v4452_v15  ;;  %v795_v7 = vor.u32 %v794_v0, %v791_v63  ;;  %v3834_v63 = vor.u32 %v4464_v56, %v3831_v57 }
  0x58   :  { %v796_v8 = vsel %vm779_vm1, %v787_v4, %v795_v7  ;;  %v3671_v4 = vld [vmem:[%s5951_s0 + $0x30] sm:$0xf0] }
  0x5a   :  { %1372 = vmatpush.bf16.msra.mxu2 %v4473_v28  ;;  %1064 = vmatpush.bf16.msra.mxu1 %v4451_v31  ;;  %v4430_v28 = vld [vmem:[%s5951_s0 + $0x1c] sm:$0xf]  ;;  %v3658_v31 = vor.u32 %v4428_v25, %v3655_v26 }
  0x5e   :  { %1373 = vmatpush.bf16.msra.mxu2 %v4472_v42  ;;  %1065 = vmatpush.bf16.msra.mxu1 %v4450_v45  ;;  %v798_v42 = vshrl.u32 %v3658_v31, 16 }
  0x60   :  { %v800_v51 = vrot.slane %v798_v42, 1 }
  0x61   :  { %606 = vmatmul.bf16.gmra.mxu2 %v4879_v2  ;;  %452 = vmatmul.bf16.gmra.mxu1 %v225_v24  ;;  %v4482_v2 = vld [vmem:[%s5952_s1 + $0x1d0] sm:$0xff]  ;;  %v1229_v24 = vrot.slane %v3810_v1, 2 }
  0x62   :  { %1415 = vmatpush.bf16.msrb.mxu3 %v4482_v2  ;;  %v4433_v2 = vld [vmem:[%s5951_s0 + $0x2c] sm:$0xf0] }
  0x63   :  { %v1231_v13 = vsel %vm1225_vm2, %v1229_v24, %v1230_v9 }
  0x64   :  { %660 = vmatmul.bf16.gmra.mxu3 %v3474_v14  ;;  %v3670_v14 = vor.u32 %v4433_v2, %v3669_v12  ;;  %v3821_v2 = vld [vmem:[%s5951_s0 + $0x28] sm:$0xf] }
  0x66   :  { %1416 = vmatpush.bf16.msrb.mxu3 %v4481_v29  ;;  %v815_v15 = vshrl.u32 %v3670_v14, 16  ;;  %v818_v16 = vshll.u32 %v3670_v14, 16  ;;  %v3663_v29 = vld [vmem:[%s5951_s0 + $0x20] sm:$0xf0]  ;;  %v4463_v14 = vld [vmem:[%s5951_s0 + $0x2c] sm:$0xf0] }
  0x68   :  { %v817_v20 = vrot.slane %v815_v15, 1  ;;  %v820_v21 = vrot.slane %v818_v16, 2  ;;  %v3685_v15 = vld [vmem:[%s5951_s0 + $0x48] sm:$0xf] }
  0x6a   :  { %1417 = vmatpush.bf16.msrb.mxu3 %v4480_v43  ;;  %v801_v43 = vshll.u32 %v3658_v31, 16 }
  0x6c   :  { %v803_v52 = vrot.slane %v801_v43, 2  ;;  %v3679_v43 = vld [vmem:[%s5951_s0 + $0x40] sm:$0xf0] }
  0x6e   :  { %v804_v0 = vor.u32 %v803_v52, %v800_v51  ;;  %v4465_v51 = vld [vmem:[%s5951_s0 + $0x3c] sm:$0xf0]  ;;  %v3693_v52 = vld [vmem:[%s5951_s0 + $0x58] sm:$0xf] }
  0x71   :  { %611 = vmatmul.bf16.gmra.mxu2 %v4931_v36  ;;  %457 = vmatmul.bf16.gmra.mxu1 %v241_v23  ;;  %v252_v36 = vor.u32 %v250_v34, %v240_v22  ;;  %v821_v22 = vor.u32 %v820_v21, %v817_v20  ;;  %v277_v23 = vshrl.u32 %v5051_v44, 16  ;;  %v3666_v34 = vor.u32 %v4430_v28, %v3663_v29  ;;  %v4437_v20 = vld [vmem:[%s5951_s0 + $0x4c] sm:$0xf0]  ;;  %v4466_v29 = vld [vmem:[%s5951_s0 + $0x4c] sm:$0xf] }
  0x72   :  { %v3686_v21 = vor.u32 %v4437_v20, %v3685_v15  ;;  %v4436_v20 = vld [vmem:[%s5951_s0 + $0x4c] sm:$0xf] }
  0x73   :  { %v257_v40 = vsel %vm169_vm0, %v252_v36, %v256_v37  ;;  %v279_v33 = vor.u32 %v277_v23, %v272_v6  ;;  %v3805_v37 = vld [vmem:[%s5951_s0 + $0x8] sm:$0xc] }
  0x74   :  { %665 = vmatmul.bf16.gmra.mxu3 %v3482_v30  ;;  %v822_v30 = vsel %vm779_vm1, %v795_v7, %v821_v22  ;;  %v3806_v32 = vor.u32 %v4459_v39, %v3805_v37  ;;  %v3674_v7 = vor.u32 %v4432_v3, %v3671_v4  ;;  %v851_v23 = vshrl.u32 %v3686_v21, 16 }
  0x75   :  { %v854_v25 = vshll.u32 %v3686_v21, 16  ;;  %v3687_v21 = vld [vmem:[%s5951_s0 + $0x50] sm:$0xf0] }
  0x76   :  { %v1226_v60 = vrot.slane %v3806_v32, 2  ;;  %v824_v16 = vshrl.u32 %v3674_v7, 16  ;;  %v853_v31 = vrot.slane %v851_v23, 1 }
  0x78   :  { %v826_v26 = vrot.slane %v824_v16, 1 }
  0x81   :  { %616 = vmatmul.bf16.gmra.mxu2 %v4765_v11  ;;  %462 = vmatmul.bf16.gmra.mxu1 %v257_v40  ;;  %v4443_v11 = vld [vmem:[%s5952_s1 + $0x108] sm:$0xff]  ;;  %v3813_v40 = vld [vmem:[%s5951_s0 + $0x18] sm:$0xf]  ;;  %s4681_s1 = smov [#allocation4]  }
  0x82   :  { %1020 = vmatpush.bf16.msrb.mxu0 %v4443_v11  ;;  %v809_v11 = vshll.u32 %v3666_v34, 16  ;;  %v3814_v48 = vor.u32 %v4461_v41, %v3813_v40  ;;  %s3392_s20 = sshll.u32 %s4681_s1, 4  ;;  %s3393_s20 = int_to_ptr.vmem [resolvable:$true] %s3392_s20 }
  0x84   :  { %670 = vmatmul.bf16.gmra.mxu3 %v5051_v44  ;;  %v806_v44 = vshrl.u32 %v3666_v34, 16  ;;  %v811_v54 = vrot.slane %v809_v11, 2  ;;  %v1227_v61 = vrot.slane %v3814_v48, 2 }
  0x86   :  { %1021 = vmatpush.bf16.msrb.mxu0 %v4442_v55  ;;  %v808_v53 = vrot.slane %v806_v44, 1  ;;  %v1228_v6 = vsel %vm1225_vm2, %v1226_v60, %v1227_v61 }
  0x88   :  { %v812_v1 = vor.u32 %v811_v54, %v808_v53 }
  0x89   :  { %1022 = vmatmul.bf16.vlgmr.msrb.gmra.mxu0 %v796_v8  ;;  %v1238_v8 = vrot.slane %v3834_v63, 2 }
  0x91   :  { %621 = vmatmul.bf16.gmra.mxu2 %v4787_v19  ;;  %467 = vmatmul.bf16.gmra.mxu1 %v273_v10  ;;  %v4462_v19 = vld [vmem:[%s5951_s0 + $0x2c] sm:$0xf] }
  0x92   :  { %v3826_v27 = vor.u32 %v4462_v19, %v3823_v18  ;;  %v827_v19 = vshll.u32 %v3674_v7, 16  ;;  %v3847_v7 = vld [vmem:[%s5951_s0 + $0x60] sm:$0xf0] }
  0x94   :  { %1418 = vmatmul.bf16.vlgmr.msrb.gmra.mxu3 %v1231_v13  ;;  %v1234_v35 = vrot.slane %v3826_v27, 2  ;;  %v829_v27 = vrot.slane %v827_v19, 2 }
  0x96   :  { %v1235_v45 = vsel %vm1225_vm2, %v1230_v9, %v1234_v35  ;;  %v813_v9 = vsel %vm779_vm1, %v804_v0, %v812_v1  ;;  %v1239_v18 = vsel %vm1225_vm2, %v1234_v35, %v1238_v8  ;;  %v830_v41 = vor.u32 %v829_v27, %v826_v26  ;;  %v4511_v26 = vld [vmem:[%s5954_s3 + $0xb8] sm:$0xff] }
  0x97   :  { %v3690_v27 = vor.u32 %v4436_v20, %v3687_v21  ;;  %1854 = vmatpush.bf16.msrb.mxu2 %v4511_v26  ;;  %v4502_v26 = vld [vmem:[%s5954_s3 + $0x70] sm:$0xff] }
  0x98   :  { %v831_v32 = vsel %vm779_vm1, %v812_v1, %v830_v41 }
  0x99   :  { %1027 = vmatmul.bf16.gmra.mxu0 %v822_v30  ;;  %v3839_v30 = vld [vmem:[%s5951_s0 + $0x50] sm:$0xf0] }
  0x9a   :  { %v3842_v40 = vor.u32 %v4466_v29, %v3839_v30 }
  0x9e   :  { %v5118_v36 = vpop.f32.mrf.mxu1 }
  0xa0   :  { %v399_v13 = vpop.f32.mrf.mxu0 }
  0xa1   :  { %626 = vmatmul.bf16.gmra.mxu2 %v4782_v17  ;;  %v3677_v17 = vld [vmem:[%s5951_s0 + $0x38] sm:$0xf]  ;;  %472 = vmatmul.bf16.gmra.mxu1 %v279_v33  ;;  %v856_v33 = vrot.slane %v854_v25, 2 }
  0xa2   :  { %v3678_v47 = vor.u32 %v4435_v46, %v3677_v17  ;;  %v4434_v17 = vld [vmem:[%s5951_s0 + $0x3c] sm:$0xf]  ;;  %v5198_v46 = vrot.slane %v3842_v40, 2 }
  0xa3   :  { %v857_v37 = vor.u32 %v856_v33, %v853_v31 }
  0xa4   :  { %1423 = vmatmul.bf16.gmra.mxu3 %v1235_v45  ;;  %v833_v49 = vshrl.u32 %v3678_v47, 16  ;;  %v836_v50 = vshll.u32 %v3678_v47, 16  ;;  %v5161_v10 = vpop.f32.mrf.mxu2  ;;  %v3682_v45 = vor.u32 %v4434_v17, %v3679_v43  ;;  %v1243_v57 = vsel %vm1225_vm2, %v1238_v8, %v5198_v46  ;;  %v4467_v17 = vld [vmem:[%s5951_s0 + $0x4c] sm:$0xf0]  ;;  %v3701_v43 = vld [vmem:[%s5951_s0 + $0x68] sm:$0xf] }
  0xa6   :  { %v5140_v55 = vpop.f32.mrf.mxu1  ;;  %v835_v58 = vrot.slane %v833_v49, 1  ;;  %v838_v59 = vrot.slane %v836_v50, 2  ;;  %v3829_v50 = vld [vmem:[%s5951_s0 + $0x38] sm:$0xf]  ;;  %v842_v54 = vshrl.u32 %v3682_v45, 16  ;;  %v845_v56 = vshll.u32 %v3682_v45, 16 }
  0xa7   :  { %v5148_v62 = vpop.f32.mrf.mxu3  ;;  %v863_v45 = vshll.u32 %v3690_v27, 16 }
  0xa8   :  { %v839_v38 = vor.u32 %v838_v59, %v835_v58  ;;  %v401_v42 = vpop.f32.mrf.mxu0  ;;  %v4439_v58 = vld [vmem:[%s5951_s0 + $0x5c] sm:$0xf0]  ;;  %v844_v3 = vrot.slane %v842_v54, 1  ;;  %v847_v4 = vrot.slane %v845_v56, 2 }
  0xa9   :  { %v3694_v60 = vor.u32 %v4439_v58, %v3693_v52 }
  0xaa   :  { %v840_v5 = vsel %vm779_vm1, %v821_v22, %v839_v38  ;;  %v3822_v22 = vor.u32 %v4463_v14, %v3821_v2  ;;  %v858_v44 = vsel %vm779_vm1, %v839_v38, %v857_v37 }
  0xab   :  { %1032 = vmatmul.bf16.gmra.mxu0 %v840_v5  ;;  %v869_v0 = vshrl.u32 %v3694_v60, 16  ;;  %v872_v1 = vshll.u32 %v3694_v60, 16 }
  0xac   :  { %v1232_v34 = vrot.slane %v3822_v22, 2  ;;  %v5188_v39 = vpop.f32.mrf.mxu2 }
  0xad   :  { %v871_v8 = vrot.slane %v869_v0, 1 }
  0xae   :  { %v5158_v24 = vpop.f32.mrf.mxu1  ;;  %v1233_v11 = vsel %vm1225_vm2, %v1227_v61, %v1232_v34  ;;  %v3830_v61 = vor.u32 %v4465_v51, %v3829_v50 }
  0xaf   :  { %v5163_v12 = vpop.f32.mrf.mxu3 }
  0xb0   :  { %v404_v63 = vpop.f32.mrf.mxu0 }
  0xb1   :  { %1374 = vmatmul.bf16.vlgmr.msra.gmra.mxu2 %v1228_v6  ;;  %1066 = vmatmul.bf16.vlgmr.msra.gmra.mxu1 %v813_v9  ;;  %v4468_v6 = vld [vmem:[%s5951_s0 + $0x5c] sm:$0xf]  ;;  %v874_v9 = vrot.slane %v872_v1, 2 }
  0xb2   :  { %v3850_v16 = vor.u32 %v4468_v6, %v3847_v7 }
  0xb3   :  { %v875_v14 = vor.u32 %v874_v9, %v871_v8 }
  0xb4   :  { %1428 = vmatmul.bf16.gmra.mxu3 %v1239_v18  ;;  %v5230_v18 = vor.u32 %v847_v4, %v844_v3  ;;  %v5247_v29 = vrot.slane %v3850_v16, 2 }
  0xb5   :  { %v876_v22 = vsel %vm779_vm1, %v857_v37, %v875_v14 }
  0xb6   :  { %v5178_v28 = vpop.f32.mrf.mxu1  ;;  %v849_v31 = vsel %vm779_vm1, %v830_v41, %v5230_v18  ;;  %v3837_v41 = vld [vmem:[%s5951_s0 + $0x48] sm:$0xf] }
  0xb7   :  { %v5186_v35 = vpop.f32.mrf.mxu3  ;;  %v3838_v51 = vor.u32 %v4467_v17, %v3837_v41 }
  0xb8   :  { %v406_v33 = vpop.f32.mrf.mxu0 }
  0xb9   :  { %v1240_v0 = vrot.slane %v3838_v51, 2 }
  0xbb   :  { %1037 = vmatmul.bf16.gmra.mxu0 %v858_v44 }
  0xbe   :  { %v443_v47 = vpop.f32.mrf.mxu1 }
  0xbf   :  { %v444_v48 = vadd.f32 %v443_v47, %v399_v13  ;;  %v5201_v49 = vpop.f32.mrf.mxu3  ;;  %v1247_v47 = vsel %vm1225_vm2, %v5198_v46, %v5247_v29  ;;  %v4470_v46 = vld [vmem:[%s5951_s0 + $0x6c] sm:$0xf] }
  0xc0   :  { %v409_v1 = vpop.f32.mrf.mxu0 }
  0xc1   :  { %1379 = vmatmul.bf16.gmra.mxu2 %v1233_v11  ;;  %1071 = vmatmul.bf16.gmra.mxu1 %v831_v32  ;;  %v860_v11 = vshrl.u32 %v3690_v27, 16  ;;  %v4441_v32 = vld [vmem:[%s5951_s0 + $0x6c] sm:$0xf0] }
  0xc2   :  { %v3702_v50 = vor.u32 %v4441_v32, %v3701_v43  ;;  %v4494_v27 = vld [vmem:[%s5954_s3 + $0x30] sm:$0xff]  ;;  %v4509_v32 = vld [vmem:[%s5954_s3 + $0xa8] sm:$0xff] }
  0xc3   :  { %v862_v56 = vrot.slane %v860_v11, 1 }
  0xc4   :  { %v597_v53 = vpop.f32.mrf.mxu2  ;;  %1433 = vmatmul.bf16.gmra.mxu3 %v1243_v57  ;;  %v890_v54 = vshll.u32 %v3702_v50, 16  ;;  %v865_v57 = vrot.slane %v863_v45, 2 }
  0xc5   :  { %v598_v59 = vadd.f32 %v597_v53, %v444_v48  ;;  %v887_v53 = vshrl.u32 %v3702_v50, 16 }
  0xc6   :  { %v445_v5 = vpop.f32.mrf.mxu1  ;;  %v866_v7 = vor.u32 %v865_v57, %v862_v56  ;;  %v3703_v56 = vld [vmem:[%s5951_s0 + $0x70] sm:$0xf0] }
  0xc7   :  { %v5218_v38 = vadd.f32 %v5148_v62, %v598_v59  ;;  %v446_v13 = vadd.f32 %v445_v5, %v401_v42  ;;  %v5226_v62 = vrot.slane %v3830_v61, 2  ;;  %v5228_v2 = vpop.f32.mrf.mxu3  ;;  %v4495_v42 = vld [vmem:[%s5954_s3 + $0x38] sm:$0xff]  ;;  %v3855_v59 = vld [vmem:[%s5951_s0 + $0x70] sm:$0xf0]  ;;  %v889_v60 = vrot.slane %v887_v53, 1 }
  0xc8   :  { %1726 = vmatpush.bf16.msrb.mxu1 %v4495_v42  ;;  %v892_v61 = vrot.slane %v890_v54, 2  ;;  %v3858_v5 = vor.u32 %v4470_v46, %v3855_v59  ;;  %v867_v21 = vsel %vm779_vm1, %v5230_v18, %v866_v7  ;;  %v4469_v18 = vld [vmem:[%s5951_s0 + $0x5c] sm:$0xf0]  ;;  %v4440_v54 = vld [vmem:[%s5951_s0 + $0x6c] sm:$0xf] }
  0xc9   :  { %v1237_v23 = vsel %vm1225_vm2, %v1232_v34, %v5226_v62  ;;  %v4503_v34 = vld [vmem:[%s5954_s3 + $0x78] sm:$0xff]  ;;  %v1241_v9 = vsel %vm1225_vm2, %v5226_v62, %v1240_v0  ;;  %v4501_v46 = vld [vmem:[%s5954_s3 + $0x68] sm:$0xff] }
  0xca   :  { %1635 = vmatpush.bf16.msra.mxu0 %v4503_v34  ;;  %v893_v3 = vor.u32 %v892_v61, %v889_v60  ;;  %v1250_v62 = vrot.slane %v3858_v5, 2  ;;  %v4493_v59 = vld [vmem:[%s5954_s3 + $0x28] sm:$0xff] }
  0xcb   :  { %1042 = vmatmul.bf16.gmra.mxu0 %v876_v22  ;;  %v3853_v5 = vld [vmem:[%s5951_s0 + $0x68] sm:$0xf] }
  0xcc   :  { %v599_v15 = vpop.f32.mrf.mxu2  ;;  %v894_v8 = vsel %vm779_vm1, %v875_v14, %v893_v3  ;;  %v4518_v14 = vld [vmem:[%s5954_s3 + $0xf0] sm:$0xff]  ;;  %1727 = vmatpush.bf16.msrb.mxu1 %v4494_v27 }
  0xcd   :  { %v600_v19 = vadd.f32 %v599_v15, %v446_v13  ;;  %v4438_v13 = vld [vmem:[%s5951_s0 + $0x5c] sm:$0xf]  ;;  %v3695_v15 = vld [vmem:[%s5951_s0 + $0x60] sm:$0xf0] }
  0xce   :  { %v448_v30 = vpop.f32.mrf.mxu1  ;;  %v3698_v22 = vor.u32 %v4438_v13, %v3695_v15  ;;  %1636 = vmatpush.bf16.msra.mxu0 %v4502_v26  ;;  %v4508_v26 = vld [vmem:[%s5954_s3 + $0xa0] sm:$0xff] }
  0xcf   :  { %v5242_v25 = vadd.f32 %v5163_v12, %v600_v19  ;;  %v449_v37 = vadd.f32 %v448_v30, %v404_v63  ;;  %v5251_v40 = vpop.f32.mrf.mxu3  ;;  %v4519_v12 = vld [vmem:[%s5954_s3 + $0xf8] sm:$0xff]  ;;  %v4510_v19 = vld [vmem:[%s5954_s3 + $0xb0] sm:$0xff] }
  0xd0   :  { %1995 = vmatpush.bf16.msra.mxu3 %v4519_v12  ;;  %1855 = vmatpush.bf16.msrb.mxu2 %v4510_v19  ;;  %v3845_v30 = vld [vmem:[%s5951_s0 + $0x58] sm:$0xf]  ;;  %v5324_v12 = vpop.f32.mrf.mxu0  ;;  %v878_v34 = vshrl.u32 %v3698_v22, 16  ;;  %v881_v42 = vshll.u32 %v3698_v22, 16 }
  0xd1   :  { %1384 = vmatmul.bf16.gmra.mxu2 %v1237_v23  ;;  %1076 = vmatmul.bf16.gmra.mxu1 %v849_v31  ;;  %v3846_v41 = vor.u32 %v4469_v18, %v3845_v30  ;;  %v4500_v18 = vld [vmem:[%s5954_s3 + $0x60] sm:$0xff] }
  0xd2   :  { %v883_v11 = vrot.slane %v881_v42, 2  ;;  %1637 = vmatpush.bf16.msra.mxu0 %v4501_v46  ;;  %1728 = vmatpush.bf16.msrb.mxu1 %v4493_v59 }
  0xd3   :  { %v1244_v45 = vrot.slane %v3846_v41, 2 }
  0xd4   :  { %v602_v44 = vpop.f32.mrf.mxu2  ;;  %1438 = vmatmul.bf16.gmra.mxu3 %v1247_v47  ;;  %1856 = vmatpush.bf16.msrb.mxu2 %v4509_v32 }
  0xd5   :  { %v603_v48 = vadd.f32 %v602_v44, %v449_v37  ;;  %1996 = vmatpush.bf16.msra.mxu3 %v4518_v14  ;;  %v880_v44 = vrot.slane %v878_v34, 1  ;;  %v1245_v53 = vsel %vm1225_vm2, %v1240_v0, %v1244_v45  ;;  %v3706_v0 = vor.u32 %v4440_v54, %v3703_v56 }
  0xd6   :  { %v450_v58 = vpop.f32.mrf.mxu1  ;;  %1638 = vmatpush.bf16.msra.mxu0 %v4500_v18 }
  0xd7   :  { %v5278_v52 = vadd.f32 %v5186_v35, %v603_v48  ;;  %v451_v63 = vadd.f32 %v450_v58, %v406_v33  ;;  %v5286_v35 = vpop.f32.mrf.mxu3  ;;  %v1251_v33 = vsel %vm1225_vm2, %v5247_v29, %v1250_v62  ;;  %v5334_v29 = vld [vmem:[%s5951_s0 + $0x78] sm:$0x11]  ;;  %v884_v51 = vor.u32 %v883_v11, %v880_v44  ;;  %v4517_v58 = vld [vmem:[%s5954_s3 + $0xe8] sm:$0xff] }
  0xd8   :  { %v1208_v48 = vunpack.c.h.b16 %v5334_v29  ;;  %v414_v57 = vpop.f32.mrf.mxu0  ;;  %v899_v13 = vshll.u32 %v3706_v0, 16  ;;  %1857 = vmatpush.bf16.msrb.mxu2 %v4508_v26  ;;  %v1207_v42 = vunpack.c.l.b16 %v5334_v29  ;;  %v4515_v29 = vld [vmem:[%s5954_s3 + $0xd8] sm:$0xff] }
  0xd9   :  { %1997 = vmatpush.bf16.msra.mxu3 %v4517_v58 }
  0xda   :  { %v1224_v50 = vpack.c.b16 %v1208_v48, %v1208_v48  ;;  %v4507_v48 = vld [vmem:[%s5954_s3 + $0x98] sm:$0xff] }
  0xdb   :  { %1047 = vmatmul.bf16.gmra.mxu0 %v894_v8 }
  0xdc   :  { %v604_v4 = vpop.f32.mrf.mxu2  ;;  %v1254_v60 = vrot.slane %v1224_v50, 2  ;;  %1858 = vmatpush.bf16.msrb.mxu2 %v4507_v48 }
  0xdd   :  { %v605_v6 = vadd.f32 %v604_v4, %v451_v63  ;;  %v885_v63 = vsel %vm779_vm1, %v866_v7, %v884_v51 }
  0xde   :  { %v453_v20 = vpop.f32.mrf.mxu1  ;;  %v1255_v8 = vsel %vm1225_vm2, %v1250_v62, %v1254_v60  ;;  %v4516_v62 = vld [vmem:[%s5954_s3 + $0xe0] sm:$0xff] }
  0xdf   :  { %v5298_v16 = vadd.f32 %v5201_v49, %v605_v6  ;;  %v454_v23 = vadd.f32 %v453_v20, %v409_v1  ;;  %v5308_v49 = vpop.f32.mrf.mxu3  ;;  %v4471_v6 = vld [vmem:[%s5951_s0 + $0x6c] sm:$0xf0]  ;;  %1998 = vmatpush.bf16.msra.mxu3 %v4516_v62  ;;  %v4505_v62 = vld [vmem:[%s5954_s3 + $0x88] sm:$0xff] }
  0xe0   :  { %v3854_v15 = vor.u32 %v4471_v6, %v3853_v5  ;;  %v4490_v6 = vld [vmem:[%s5954_s3 + $0x10] sm:$0xff] }
  0xe1   :  { %1389 = vmatmul.bf16.gmra.mxu2 %v1241_v9  ;;  %1081 = vmatmul.bf16.gmra.mxu1 %v867_v21  ;;  %v896_v9 = vshrl.u32 %v3706_v0, 16  ;;  %v901_v21 = vrot.slane %v899_v13, 2 }
  0xe2   :  { %v1248_v22 = vrot.slane %v3854_v15, 2 }
  0xe3   :  { %v898_v20 = vrot.slane %v896_v9, 1  ;;  %1999 = vmatpush.bf16.msra.mxu3 %v4515_v29  ;;  %v4489_v9 = vld [vmem:[%s5954_s3 + $0x8] sm:$0xff]  ;;  %v4504_v29 = vld [vmem:[%s5954_s3 + $0x80] sm:$0xff] }
  0xe4   :  { %v607_v31 = vpop.f32.mrf.mxu2  ;;  %1443 = vmatmul.bf16.gmra.mxu3 %v1251_v33  ;;  %v1249_v30 = vsel %vm1225_vm2, %v1244_v45, %v1248_v22  ;;  %v1223_v45 = vpack.c.b16 %v1207_v42, %v1207_v42 }
  0xe5   :  { %v608_v37 = vadd.f32 %v607_v31, %v454_v23  ;;  %v4492_v31 = vld [vmem:[%s5954_s3 + $0x20] sm:$0xff] }
  0xe6   :  { %v5329_v43 = vpop.f32.mrf.mxu1  ;;  %1729 = vmatpush.bf16.msrb.mxu1 %v4492_v31 }
  0xe7   :  { %v5327_v17 = vadd.f32 %v5228_v2, %v608_v37  ;;  %v661_v47 = vpop.f32.mrf.mxu3 }
  0xeb   :  { %1052 = vmatmul.bf16.gmra.mxu0 %v893_v3 }
  0xec   :  { %v5340_v2 = vpop.f32.mrf.mxu2 }
  0xee   :  { %v458_v61 = vpop.f32.mrf.mxu1 }
  0xef   :  { %v459_v1 = vadd.f32 %v458_v61, %v414_v57  ;;  %v5359_v4 = vpop.f32.mrf.mxu3  ;;  %v5412_v57 = vpop.f32.mrf.mxu0 }
  0xf1   :  { %1394 = vmatmul.bf16.gmra.mxu2 %v1245_v53  ;;  %1086 = vmatmul.bf16.gmra.mxu1 %v885_v63  ;;  %v4499_v53 = vld [vmem:[%s5954_s3 + $0x58] sm:$0xff] }
  0xf2   :  { %1639 = vmatpush.bf16.msra.mxu0 %v4499_v53  ;;  %v4512_v53 = vld [vmem:[%s5954_s3 + $0xc0] sm:$0xff] }
  0xf4   :  { %v612_v3 = vpop.f32.mrf.mxu2  ;;  %1448 = vmatmul.bf16.gmra.mxu3 %v1255_v8  ;;  %v4514_v8 = vld [vmem:[%s5954_s3 + $0xd0] sm:$0xff] }
  0xf5   :  { %v613_v7 = vadd.f32 %v612_v3, %v459_v1  ;;  %2000 = vmatpush.bf16.msra.mxu3 %v4514_v8 }
  0xf6   :  { %v5371_v14 = vpop.f32.mrf.mxu1 }
  0xf7   :  { %v5369_v19 = vadd.f32 %v5286_v35, %v613_v7  ;;  %v666_v23 = vpop.f32.mrf.mxu3  ;;  %v902_v35 = vor.u32 %v901_v21, %v898_v20  ;;  %v4498_v7 = vld [vmem:[%s5954_s3 + $0x50] sm:$0xff]  ;;  %v4488_v21 = vld [vmem:[%s5954_s3] sm:$0xff] }
  0xf8   :  { %1640 = vmatpush.bf16.msra.mxu0 %v4498_v7 }
  0xf9   :  { %v903_v37 = vsel %vm779_vm1, %v884_v51, %v902_v35  ;;  %v1252_v51 = vrot.slane %v1223_v45, 2 }
  0xfb   :  { %v1253_v56 = vsel %vm1225_vm2, %v1248_v22, %v1252_v51  ;;  %v5464_v51 = vld [vmem:[%s5953_s2] ss:$0 sm:$0xff] }
  0xfc   :  { %v5379_v27 = vpop.f32.mrf.mxu2 }
  0xfe   :  { %v463_v33 = vpop.f32.mrf.mxu1 }
  0xff   :  { %v464_v34 = vadd.f32 %v463_v33, %v5118_v36  ;;  %v5391_v41 = vpop.f32.mrf.mxu3  ;;  %v4497_v33 = vld [vmem:[%s5954_s3 + $0x48] sm:$0xff] }
 0x100   :  { %1641 = vmatpush.bf16.msra.mxu0 %v4497_v33 }
 0x101   :  { %1399 = vmatmul.bf16.gmra.mxu2 %v1249_v30  ;;  %1091 = vmatmul.bf16.gmra.mxu1 %v903_v37 }
 0x104   :  { %v617_v44 = vpop.f32.mrf.mxu2 }
 0x105   :  { %v618_v11 = vadd.f32 %v617_v44, %v464_v34  ;;  %v4496_v44 = vld [vmem:[%s5954_s3 + $0x40] sm:$0xff] }
 0x106   :  { %v5398_v50 = vpop.f32.mrf.mxu1  ;;  %v1023_v0 = vpop.f32.mrf.mxu0  ;;  %1642 = vmatpush.bf16.msra.mxu0 %v4496_v44 }
 0x107   :  { %v5393_v32 = vadd.f32 %v661_v47, %v618_v11  ;;  %v671_v36 = vpop.f32.mrf.mxu3  ;;  %v4491_v47 = vld [vmem:[%s5954_s3 + $0x18] sm:$0xff] }
 0x108   :  { %1730 = vmatpush.bf16.msrb.mxu1 %v4491_v47 }
 0x10c   :  { %v5409_v54 = vpop.f32.mrf.mxu2  ;;  %1731 = vmatpush.bf16.msrb.mxu1 %v4490_v6 }
 0x10e   :  { %v468_v58 = vpop.f32.mrf.mxu1  ;;  %v1025_v15 = vpop.f32.mrf.mxu0 }
 0x10f   :  { %v469_v46 = vadd.f32 %v468_v58, %v5158_v24  ;;  %v5415_v59 = vpop.f32.mrf.mxu3  ;;  %v4506_v24 = vld [vmem:[%s5954_s3 + $0x90] sm:$0xff] }
 0x110   :  { %1859 = vmatpush.bf16.msrb.mxu2 %v4506_v24  ;;  %1732 = vmatpush.bf16.msrb.mxu1 %v4489_v9 }
 0x111   :  { %1404 = vmatmul.bf16.gmra.mxu2 %v1253_v56  ;;  %1096 = vmatmul.bf16.gmra.mxu1 %v902_v35 }
 0x114   :  { %v622_v60 = vpop.f32.mrf.mxu2  ;;  %1733 = vmatpush.bf16.msrb.mxu1 %v4488_v21  ;;  %1860 = vmatpush.bf16.msrb.mxu2 %v4505_v62 }
 0x115   :  { %v623_v61 = vadd.f32 %v622_v60, %v469_v46 }
 0x116   :  { %v5419_v1 = vpop.f32.mrf.mxu1  ;;  %v1028_v18 = vpop.f32.mrf.mxu0 }
 0x117   :  { %v5417_v63 = vadd.f32 %v666_v23, %v623_v61  ;;  %v1419_v5 = vpop.f32.mrf.mxu3 }
 0x118   :  { %1861 = vmatpush.bf16.msrb.mxu2 %v4504_v29 }
 0x11c   :  { %v5424_v3 = vpop.f32.mrf.mxu2 }
 0x11e   :  { %v473_v13 = vpop.f32.mrf.mxu1 }
 0x11f   :  { %v474_v20 = vadd.f32 %v473_v13, %v5161_v10  ;;  %v1421_v23 = vpop.f32.mrf.mxu3  ;;  %v4513_v10 = vld [vmem:[%s5954_s3 + $0xc8] sm:$0xff] }
 0x120   :  { %2001 = vmatpush.bf16.msra.mxu3 %v4513_v10 }
 0x124   :  { %v627_v22 = vpop.f32.mrf.mxu2  ;;  %2002 = vmatpush.bf16.msra.mxu3 %v4512_v53 }
 0x125   :  { %v628_v26 = vadd.f32 %v627_v22, %v474_v20 }
 0x126   :  { %v5447_v30 = vpop.f32.mrf.mxu1 }
 0x127   :  { %v5445_v35 = vadd.f32 %v671_v36, %v628_v26  ;;  %v1424_v37 = vpop.f32.mrf.mxu3  ;;  %v1030_v36 = vpop.f32.mrf.mxu0 }
 0x12c   :  { %v5449_v31 = vpop.f32.mrf.mxu2 }
 0x12e   :  { %v1067_v34 = vpop.f32.mrf.mxu1 }
 0x12f   :  { %v1068_v42 = vadd.f32 %v1067_v34, %v1023_v0  ;;  %v1033_v24 = vpop.f32.mrf.mxu0 }
 0x131   :  { %v1102_v11 = vadd.f32 %v1068_v42, %v5218_v38  ;;  %v1426_v38 = vpop.f32.mrf.mxu3 }
 0x134   :  { %v1375_v45 = vpop.f32.mrf.mxu2 }
 0x135   :  { %v1420_v48 = vadd.f32 %v1419_v5, %v1375_v45 }
 0x136   :  { %v1069_v58 = vpop.f32.mrf.mxu1 }
 0x137   :  { %v1454_v47 = vadd.f32 %v1420_v48, %v1102_v11  ;;  %v1070_v46 = vadd.f32 %v1069_v58, %v1025_v15 }
 0x139   :  { %v1472_v56 = vadd.f32 %v5464_v51, %v1454_v47  ;;  %v1103_v61 = vadd.f32 %v1070_v46, %v5242_v25  ;;  %v1429_v13 = vpop.f32.mrf.mxu3 }
 0x13b   :  { %v1486_v60 = vmax.f32 %v1472_v56, 0.0 }
 0x13c   :  { %v1377_v0 = vpop.f32.mrf.mxu2 }
 0x13d   :  { %1500 = vst [vmem:[#allocation2] sm:$0xff] %v1486_v60  ;;  %v1422_v5 = vadd.f32 %v1421_v23, %v1377_v0  ;;  %v1035_v23 = vpop.f32.mrf.mxu0 }
 0x13e   :  { %v1072_v7 = vpop.f32.mrf.mxu1 }
 0x13f   :  { %v1455_v6 = vadd.f32 %v1422_v5, %v1103_v61  ;;  %v1073_v9 = vadd.f32 %v1072_v7, %v1028_v18 }
 0x141   :  { %v1473_v8 = vadd.f32 %v5464_v51, %v1455_v6  ;;  %v1104_v21 = vadd.f32 %v1073_v9, %v5278_v52  ;;  %v1431_v18 = vpop.f32.mrf.mxu3 }
 0x143   :  { %v1487_v20 = vmax.f32 %v1473_v8, 0.0 }
 0x144   :  { %v1380_v22 = vpop.f32.mrf.mxu2 }
 0x145   :  { %1501 = vst [vmem:[#allocation2 + $0x8] sm:$0xff] %v1487_v20  ;;  %v1425_v26 = vadd.f32 %v1424_v37, %v1380_v22  ;;  %v1527_v15 = vpack.c.bf16 %v1487_v20, %v1486_v60  ;;  %v456_v37 = vadd.f32 %v5329_v43, %v5324_v12  ;;  %v1038_v47 = vpop.f32.mrf.mxu0 }
 0x146   :  { %v1074_v10 = vpop.f32.mrf.mxu1 }
 0x147   :  { %v1456_v62 = vadd.f32 %v1425_v26, %v1104_v21  ;;  %1734 = vmatmul.bf16.vlgmr.msrb.gmra.mxu1 %v1527_v15  ;;  %v1075_v33 = vadd.f32 %v1074_v10, %v1030_v36 }
 0x149   :  { %v1474_v25 = vadd.f32 %v5464_v51, %v1456_v62  ;;  %v1105_v42 = vadd.f32 %v1075_v33, %v5298_v16  ;;  %v1434_v0 = vpop.f32.mrf.mxu3 }
 0x14b   :  { %v1488_v34 = vmax.f32 %v1474_v25, 0.0 }
 0x14c   :  { %v1382_v44 = vpop.f32.mrf.mxu2  ;;  %v1550_v58 = vld [vmem:[#allocation2 + $0x1] sm:$0xff] }
 0x14d   :  { %1502 = vst [vmem:[#allocation2 + $0x10] sm:$0xff] %v1488_v34  ;;  %v1427_v11 = vadd.f32 %v1426_v38, %v1382_v44  ;;  %v610_v38 = vadd.f32 %v5340_v2, %v456_v37  ;;  %v1040_v15 = vpop.f32.mrf.mxu0 }
 0x14e   :  { %v1077_v48 = vpop.f32.mrf.mxu1 }
 0x14f   :  { %v1457_v45 = vadd.f32 %v1427_v11, %v1105_v42  ;;  %v1078_v29 = vadd.f32 %v1077_v48, %v1033_v24  ;;  %v654_v6 = vadd.f32 %v5251_v40, %v610_v38 }
 0x151   :  { %v1475_v52 = vadd.f32 %v5464_v51, %v1457_v45  ;;  %v1106_v56 = vadd.f32 %v1078_v29, %v5327_v17  ;;  %v1436_v25 = vpop.f32.mrf.mxu3 }
 0x153   :  { %v1489_v53 = vmax.f32 %v1475_v52, 0.0 }
 0x154   :  { %v1385_v36 = vpop.f32.mrf.mxu2  ;;  %v1551_v46 = vld [vmem:[#allocation2 + $0x9] sm:$0xff] }
 0x155   :  { %1503 = vst [vmem:[#allocation2 + $0x18] sm:$0xff] %v1489_v53  ;;  %v1430_v16 = vadd.f32 %v1429_v13, %v1385_v36  ;;  %v1563_v60 = vpack.c.bf16 %v1551_v46, %v1550_v58  ;;  %v1528_v61 = vpack.c.bf16 %v1489_v53, %v1488_v34  ;;  %v1769_v8 = vld [vmem:[#allocation2 + $0xb] sm:$0xff]  ;;  %v1043_v53 = vpop.f32.mrf.mxu0 }
 0x156   :  { %v1079_v43 = vpop.f32.mrf.mxu1  ;;  %v1910_v13 = vld [vmem:[#allocation2 + $0xc] sm:$0xff] }
 0x157   :  { %v1458_v5 = vadd.f32 %v1430_v16, %v1106_v56  ;;  %1643 = vmatmul.bf16.vlgmr.msra.gmra.mxu0 %v1563_v60  ;;  %1739 = vmatmul.bf16.gmra.mxu1 %v1528_v61  ;;  %v1080_v24 = vadd.f32 %v1079_v43, %v1035_v23  ;;  %v461_v23 = vadd.f32 %v5371_v14, %v5412_v57 }
 0x159   :  { %v1476_v12 = vadd.f32 %v5464_v51, %v1458_v5  ;;  %v1107_v7 = vadd.f32 %v1080_v24, %v654_v6  ;;  %v615_v37 = vadd.f32 %v5379_v27, %v461_v23  ;;  %v466_v24 = vadd.f32 %v5398_v50, %v5140_v55 }
 0x15b   :  { %v1490_v17 = vmax.f32 %v1476_v12, 0.0  ;;  %v659_v57 = vadd.f32 %v5308_v49, %v615_v37 }
 0x15c   :  { %v1387_v9 = vpop.f32.mrf.mxu2  ;;  %v1770_v20 = vld [vmem:[#allocation2 + $0x13] sm:$0xff] }
 0x15d   :  { %v1911_v21 = vld [vmem:[#allocation2 + $0x14] sm:$0xff]  ;;  %1504 = vst [vmem:[#allocation2 + $0x20] sm:$0xff] %v1490_v17  ;;  %v1432_v22 = vadd.f32 %v1431_v18, %v1387_v9  ;;  %v1782_v2 = vpack.c.bf16 %v1770_v20, %v1769_v8  ;;  %v1045_v49 = vpop.f32.mrf.mxu0 }
 0x15e   :  { %v1923_v26 = vpack.c.bf16 %v1911_v21, %v1910_v13  ;;  %v1082_v40 = vpop.f32.mrf.mxu1  ;;  %v1552_v11 = vld [vmem:[#allocation2 + $0x11] sm:$0xff] }
 0x15f   :  { %v1459_v62 = vadd.f32 %v1432_v22, %v1107_v7  ;;  %1862 = vmatmul.bf16.vlgmr.msrb.gmra.mxu2 %v1782_v2  ;;  %v1083_v33 = vadd.f32 %v1082_v40, %v1038_v47 }
 0x160   :  { %2003 = vmatmul.bf16.vlgmr.msra.gmra.mxu3 %v1923_v26 }
 0x161   :  { %v1477_v10 = vadd.f32 %v5464_v51, %v1459_v62  ;;  %v1108_v42 = vadd.f32 %v1083_v33, %v5369_v19  ;;  %v1439_v19 = vpop.f32.mrf.mxu3 }
 0x163   :  { %v1491_v34 = vmax.f32 %v1477_v10, 0.0 }
 0x164   :  { %v1390_v44 = vpop.f32.mrf.mxu2  ;;  %v1553_v18 = vld [vmem:[#allocation2 + $0x19] sm:$0xff] }
 0x165   :  { %1505 = vst [vmem:[#allocation2 + $0x28] sm:$0xff] %v1491_v34  ;;  %v1435_v45 = vadd.f32 %v1434_v0, %v1390_v44  ;;  %v1564_v52 = vpack.c.bf16 %v1553_v18, %v1552_v11  ;;  %v1529_v48 = vpack.c.bf16 %v1491_v34, %v1490_v17  ;;  %v1771_v58 = vld [vmem:[#allocation2 + $0x1b] sm:$0xff]  ;;  %v1048_v40 = vpop.f32.mrf.mxu0 }
 0x166   :  { %v1084_v14 = vpop.f32.mrf.mxu1  ;;  %v1912_v61 = vld [vmem:[#allocation2 + $0x1c] sm:$0xff] }
 0x167   :  { %v1460_v29 = vadd.f32 %v1435_v45, %v1108_v42  ;;  %1648 = vmatmul.bf16.gmra.mxu0 %v1564_v52  ;;  %1744 = vmatmul.bf16.gmra.mxu1 %v1529_v48  ;;  %v1085_v47 = vadd.f32 %v1084_v14, %v1040_v15  ;;  %v620_v15 = vadd.f32 %v5409_v54, %v466_v24  ;;  %v4527_v52 = vld [vmem:[%s5956_s5 + $0x38] sm:$0xff] }
 0x168   :  { %2186 = vmatpush.bf16.msrb.mxu0 %v4527_v52 }
 0x169   :  { %v1478_v56 = vadd.f32 %v5464_v51, %v1460_v29  ;;  %v1109_v46 = vadd.f32 %v1085_v47, %v659_v57  ;;  %v1441_v20 = vpop.f32.mrf.mxu3  ;;  %v664_v50 = vadd.f32 %v5359_v4, %v620_v15 }
 0x16b   :  { %v1492_v36 = vmax.f32 %v1478_v56, 0.0 }
 0x16c   :  { %v1392_v16 = vpop.f32.mrf.mxu2  ;;  %v1772_v60 = vld [vmem:[#allocation2 + $0x23] sm:$0xff] }
 0x16d   :  { %v1913_v38 = vld [vmem:[#allocation2 + $0x24] sm:$0xff]  ;;  %1506 = vst [vmem:[#allocation2 + $0x30] sm:$0xff] %v1492_v36  ;;  %v1437_v27 = vadd.f32 %v1436_v25, %v1392_v16  ;;  %v1783_v0 = vpack.c.bf16 %v1772_v60, %v1771_v58  ;;  %v1050_v58 = vpop.f32.mrf.mxu0 }
 0x16e   :  { %v1924_v5 = vpack.c.bf16 %v1913_v38, %v1912_v61  ;;  %v1087_v6 = vpop.f32.mrf.mxu1  ;;  %v1554_v13 = vld [vmem:[#allocation2 + $0x21] sm:$0xff] }
 0x16f   :  { %v1461_v12 = vadd.f32 %v1437_v27, %v1109_v46  ;;  %1867 = vmatmul.bf16.gmra.mxu2 %v1783_v0  ;;  %v1088_v17 = vadd.f32 %v1087_v6, %v1043_v53  ;;  %v471_v53 = vadd.f32 %v5419_v1, %v5178_v28 }
 0x170   :  { %2008 = vmatmul.bf16.gmra.mxu3 %v1924_v5 }
 0x171   :  { %v1479_v43 = vadd.f32 %v5464_v51, %v1461_v12  ;;  %v1110_v7 = vadd.f32 %v1088_v17, %v5393_v32  ;;  %v1444_v48 = vpop.f32.mrf.mxu3  ;;  %v625_v61 = vadd.f32 %v5424_v3, %v471_v53 }
 0x173   :  { %v1493_v8 = vmax.f32 %v1479_v43, 0.0  ;;  %v669_v0 = vadd.f32 %v5391_v41, %v625_v61  ;;  %v4526_v41 = vld [vmem:[%s5956_s5 + $0x30] sm:$0xff] }
 0x174   :  { %v1395_v9 = vpop.f32.mrf.mxu2  ;;  %v1555_v21 = vld [vmem:[#allocation2 + $0x29] sm:$0xff]  ;;  %2187 = vmatpush.bf16.msrb.mxu0 %v4526_v41  ;;  %v4520_v41 = vld [vmem:[%s5956_s5] sm:$0xff] }
 0x175   :  { %1507 = vst [vmem:[#allocation2 + $0x38] sm:$0xff] %v1493_v8  ;;  %v1440_v22 = vadd.f32 %v1439_v19, %v1395_v9  ;;  %v1565_v2 = vpack.c.bf16 %v1555_v21, %v1554_v13  ;;  %v1530_v26 = vpack.c.bf16 %v1493_v8, %v1492_v36  ;;  %v1773_v23 = vld [vmem:[#allocation2 + $0x2b] sm:$0xff]  ;;  %v1053_v9 = vpop.f32.mrf.mxu0 }
 0x176   :  { %v1089_v55 = vpop.f32.mrf.mxu1  ;;  %v1914_v44 = vld [vmem:[#allocation2 + $0x2c] sm:$0xff] }
 0x177   :  { %v1462_v62 = vadd.f32 %v1440_v22, %v1110_v7  ;;  %1653 = vmatmul.bf16.gmra.mxu0 %v1565_v2  ;;  %1749 = vmatmul.bf16.gmra.mxu1 %v1530_v26  ;;  %v1090_v10 = vadd.f32 %v1089_v55, %v1045_v49  ;;  %v476_v2 = vadd.f32 %v5447_v30, %v5188_v39 }
 0x179   :  { %v1480_v25 = vadd.f32 %v5464_v51, %v1462_v62  ;;  %v1111_v33 = vadd.f32 %v1090_v10, %v664_v50  ;;  %v1446_v27 = vpop.f32.mrf.mxu3 }
 0x17b   :  { %v1494_v32 = vmax.f32 %v1480_v25, 0.0 }
 0x17c   :  { %v1397_v34 = vpop.f32.mrf.mxu2  ;;  %v1774_v42 = vld [vmem:[#allocation2 + $0x33] sm:$0xff] }
 0x17d   :  { %v1915_v11 = vld [vmem:[#allocation2 + $0x34] sm:$0xff]  ;;  %1508 = vst [vmem:[#allocation2 + $0x40] sm:$0xff] %v1494_v32  ;;  %v1442_v18 = vadd.f32 %v1441_v20, %v1397_v34  ;;  %v1784_v54 = vpack.c.bf16 %v1774_v42, %v1773_v23  ;;  %v630_v23 = vadd.f32 %v5449_v31, %v476_v2  ;;  %v1055_v34 = vpop.f32.mrf.mxu0  ;;  %v4529_v2 = vld [vmem:[%s5956_s5 + $0x48] sm:$0xff] }
 0x17e   :  { %v1925_v45 = vpack.c.bf16 %v1915_v11, %v1914_v44  ;;  %v1092_v29 = vpop.f32.mrf.mxu1  ;;  %v1556_v19 = vld [vmem:[#allocation2 + $0x31] sm:$0xff] }
 0x17f   :  { %v1463_v37 = vadd.f32 %v1442_v18, %v1111_v33  ;;  %1872 = vmatmul.bf16.gmra.mxu2 %v1784_v54  ;;  %v1093_v56 = vadd.f32 %v1092_v29, %v1048_v40  ;;  %v674_v30 = vadd.f32 %v5415_v59, %v630_v23  ;;  %v4533_v23 = vld [vmem:[%s5956_s5 + $0x68] sm:$0xff] }
 0x180   :  { %2013 = vmatmul.bf16.gmra.mxu3 %v1925_v45 }
 0x181   :  { %v1481_v4 = vadd.f32 %v5464_v51, %v1463_v37  ;;  %v1112_v57 = vadd.f32 %v1093_v56, %v5417_v63  ;;  %v1449_v13 = vpop.f32.mrf.mxu3 }
 0x183   :  { %v1495_v14 = vmax.f32 %v1481_v4, 0.0 }
 0x184   :  { %v1400_v47 = vpop.f32.mrf.mxu2  ;;  %v1557_v36 = vld [vmem:[#allocation2 + $0x39] sm:$0xff] }
 0x185   :  { %1509 = vst [vmem:[#allocation2 + $0x48] sm:$0xff] %v1495_v14  ;;  %v1445_v46 = vadd.f32 %v1444_v48, %v1400_v47  ;;  %v1566_v16 = vpack.c.bf16 %v1557_v36, %v1556_v19  ;;  %v1531_v60 = vpack.c.bf16 %v1495_v14, %v1494_v32  ;;  %v1775_v12 = vld [vmem:[#allocation2 + $0x3b] sm:$0xff] }
 0x186   :  { %v1094_v1 = vpop.f32.mrf.mxu1  ;;  %v1916_v24 = vld [vmem:[#allocation2 + $0x3c] sm:$0xff] }
 0x187   :  { %v1464_v38 = vadd.f32 %v1445_v46, %v1112_v57  ;;  %1658 = vmatmul.bf16.gmra.mxu0 %v1566_v16  ;;  %1754 = vmatmul.bf16.gmra.mxu1 %v1531_v60  ;;  %v1095_v63 = vadd.f32 %v1094_v1, %v1050_v58  ;;  %v4525_v58 = vld [vmem:[%s5956_s5 + $0x28] sm:$0xff]  ;;  %v4531_v1 = vld [vmem:[%s5956_s5 + $0x58] sm:$0xff] }
 0x188   :  { %2188 = vmatpush.bf16.msrb.mxu0 %v4525_v58  ;;  %2356 = vmatpush.bf16.msra.mxu2 %v4531_v1 }
 0x189   :  { %v1482_v28 = vadd.f32 %v5464_v51, %v1464_v38  ;;  %v1113_v43 = vadd.f32 %v1095_v63, %v669_v0 }
 0x18b   :  { %v1496_v5 = vmax.f32 %v1482_v28, 0.0 }
 0x18c   :  { %v1402_v6 = vpop.f32.mrf.mxu2  ;;  %v1776_v49 = vld [vmem:[#allocation2 + $0x43] sm:$0xff] }
 0x18d   :  { %v1917_v17 = vld [vmem:[#allocation2 + $0x44] sm:$0xff]  ;;  %1510 = vst [vmem:[#allocation2 + $0x50] sm:$0xff] %v1496_v5  ;;  %v1447_v8 = vadd.f32 %v1446_v27, %v1402_v6  ;;  %v1785_v3 = vpack.c.bf16 %v1776_v49, %v1775_v12  ;;  %v4523_v6 = vld [vmem:[%s5956_s5 + $0x18] sm:$0xff] }
 0x18e   :  { %v1926_v7 = vpack.c.bf16 %v1917_v17, %v1916_v24  ;;  %v1097_v22 = vpop.f32.mrf.mxu1  ;;  %v1558_v55 = vld [vmem:[#allocation2 + $0x41] sm:$0xff]  ;;  %2259 = vmatpush.bf16.msra.mxu1 %v4523_v6 }
 0x18f   :  { %v1465_v20 = vadd.f32 %v1447_v8, %v1113_v43  ;;  %1877 = vmatmul.bf16.gmra.mxu2 %v1785_v3  ;;  %v1098_v26 = vadd.f32 %v1097_v22, %v1053_v9  ;;  %v4535_v43 = vld [vmem:[%s5956_s5 + $0x78] sm:$0xff]  ;;  %v4524_v24 = vld [vmem:[%s5956_s5 + $0x20] sm:$0xff]  ;;  %v4522_v8 = vld [vmem:[%s5956_s5 + $0x10] sm:$0xff] }
 0x190   :  { %2018 = vmatmul.bf16.gmra.mxu3 %v1926_v7  ;;  %2189 = vmatpush.bf16.msrb.mxu0 %v4524_v24  ;;  %v4521_v9 = vld [vmem:[%s5956_s5 + $0x8] sm:$0xff] }
 0x191   :  { %v1483_v21 = vadd.f32 %v5464_v51, %v1465_v20  ;;  %v1114_v62 = vadd.f32 %v1098_v26, %v5445_v35  ;;  %v1451_v35 = vpop.f32.mrf.mxu3  ;;  %2463 = vmatpush.bf16.msrb.mxu3 %v4535_v43  ;;  %v4530_v20 = vld [vmem:[%s5956_s5 + $0x50] sm:$0xff] }
 0x192   :  { %2260 = vmatpush.bf16.msra.mxu1 %v4522_v8  ;;  %2357 = vmatpush.bf16.msra.mxu2 %v4530_v20 }
 0x193   :  { %v1497_v15 = vmax.f32 %v1483_v21, 0.0 }
 0x194   :  { %v1405_v25 = vpop.f32.mrf.mxu2  ;;  %v1559_v50 = vld [vmem:[#allocation2 + $0x49] sm:$0xff] }
 0x195   :  { %1511 = vst [vmem:[#allocation2 + $0x58] sm:$0xff] %v1497_v15  ;;  %v1450_v10 = vadd.f32 %v1449_v13, %v1405_v25  ;;  %v1567_v32 = vpack.c.bf16 %v1559_v50, %v1558_v55  ;;  %v1532_v40 = vpack.c.bf16 %v1497_v15, %v1496_v5  ;;  %v1777_v18 = vld [vmem:[#allocation2 + $0x4b] sm:$0xff]  ;;  %v4528_v15 = vld [vmem:[%s5956_s5 + $0x40] sm:$0xff] }
 0x196   :  { %v1099_v39 = vpop.f32.mrf.mxu1  ;;  %v1918_v48 = vld [vmem:[#allocation2 + $0x4c] sm:$0xff]  ;;  %2261 = vmatpush.bf16.msra.mxu1 %v4521_v9  ;;  %2358 = vmatpush.bf16.msra.mxu2 %v4529_v2  ;;  %v5559_v50 = vld [vmem:[%s5955_s4] ss:$0 sm:$0xff] }
 0x197   :  { %v1466_v33 = vadd.f32 %v1450_v10, %v1114_v62  ;;  %1663 = vmatmul.bf16.gmra.mxu0 %v1567_v32  ;;  %1759 = vmatmul.bf16.gmra.mxu1 %v1532_v40  ;;  %v1100_v44 = vadd.f32 %v1099_v39, %v1055_v34  ;;  %v4534_v13 = vld [vmem:[%s5956_s5 + $0x70] sm:$0xff]  ;;  %v4532_v39 = vld [vmem:[%s5956_s5 + $0x60] sm:$0xff] }
 0x198   :  { %2464 = vmatpush.bf16.msrb.mxu3 %v4534_v13 }
 0x199   :  { %v1484_v42 = vadd.f32 %v5464_v51, %v1466_v33  ;;  %v1115_v54 = vadd.f32 %v1100_v44, %v674_v30 }
 0x19a   :  { %2262 = vmatpush.bf16.msra.mxu1 %v4520_v41  ;;  %2359 = vmatpush.bf16.msra.mxu2 %v4528_v15 }
 0x19b   :  { %v1498_v11 = vmax.f32 %v1484_v42, 0.0 }
 0x19c   :  { %v1407_v45 = vpop.f32.mrf.mxu2  ;;  %v1778_v52 = vld [vmem:[#allocation2 + $0x53] sm:$0xff]  ;;  %2465 = vmatpush.bf16.msrb.mxu3 %v4533_v23 }
 0x19d   :  { %v1919_v37 = vld [vmem:[#allocation2 + $0x54] sm:$0xff]  ;;  %1512 = vst [vmem:[#allocation2 + $0x60] sm:$0xff] %v1498_v11  ;;  %v1452_v31 = vadd.f32 %v1451_v35, %v1407_v45  ;;  %v1786_v4 = vpack.c.bf16 %v1778_v52, %v1777_v18 }
 0x19e   :  { %v1927_v29 = vpack.c.bf16 %v1919_v37, %v1918_v48  ;;  %v1560_v59 = vld [vmem:[#allocation2 + $0x51] sm:$0xff] }
 0x19f   :  { %v1467_v53 = vadd.f32 %v1452_v31, %v1115_v54  ;;  %1882 = vmatmul.bf16.gmra.mxu2 %v1786_v4  ;;  %v4539_v11 = vld [vmem:[%s5956_s5 + $0x98] sm:$0xff] }
 0x1a0   :  { %2023 = vmatmul.bf16.gmra.mxu3 %v1927_v29  ;;  %2570 = vmatpush.bf16.msra.mxu0 %v4539_v11 }
 0x1a1   :  { %v1485_v56 = vadd.f32 %v5464_v51, %v1467_v53  ;;  %2466 = vmatpush.bf16.msrb.mxu3 %v4532_v39 }
 0x1a3   :  { %v1499_v14 = vmax.f32 %v1485_v56, 0.0 }
 0x1a4   :  { %v1561_v57 = vld [vmem:[#allocation2 + $0x59] sm:$0xff]  ;;  %v1562_v27 = vld [vmem:[#allocation2 + $0x61] sm:$0x1] }
 0x1a5   :  { %v1526_v47 = vld [vmem:[#allocation2 + $0x60] sm:$0x1]  ;;  %1513 = vst [vmem:[#allocation2 + $0x68] sm:$0x1f] %v1499_v14  ;;  %v1568_v19 = vpack.c.bf16 %v1561_v57, %v1560_v59  ;;  %v1569_v28 = vpack.c.bf16 %v1562_v27, %v1562_v27 }
 0x1a6   :  { %v1533_v36 = vpack.c.bf16 %v1526_v47, %v1526_v47  ;;  %v1779_v46 = vld [vmem:[#allocation2 + $0x5b] sm:$0xff] }
 0x1a7   :  { %1668 = vmatmul.bf16.gmra.mxu0 %v1568_v19  ;;  %v1920_v60 = vld [vmem:[#allocation2 + $0x5c] sm:$0xff] }
 0x1a8   :  { %1764 = vmatmul.bf16.gmra.mxu1 %v1533_v36 }
 0x1ac   :  { %v1780_v16 = vld [vmem:[#allocation2 + $0x63] sm:$0xff]  ;;  %v1781_v0 = vld [vmem:[#allocation2 + $0x6b] sm:$0x1]  ;;  %v1922_v63 = vld [vmem:[#allocation2 + $0x6c] sm:$0x1] }
 0x1ad   :  { %v1921_v61 = vld [vmem:[#allocation2 + $0x64] sm:$0xff]  ;;  %v1787_v38 = vpack.c.bf16 %v1780_v16, %v1779_v46  ;;  %v1788_v5 = vpack.c.bf16 %v1781_v0, %v1781_v0  ;;  %v1929_v12 = vpack.c.bf16 %v1922_v63, %v1922_v63 }
 0x1ae   :  { %v1928_v51 = vpack.c.bf16 %v1921_v61, %v1920_v60  ;;  %v4538_v61 = vld [vmem:[%s5956_s5 + $0x90] sm:$0xff] }
 0x1af   :  { %1887 = vmatmul.bf16.gmra.mxu2 %v1787_v38  ;;  %2571 = vmatpush.bf16.msra.mxu0 %v4538_v61 }
 0x1b0   :  { %2028 = vmatmul.bf16.gmra.mxu3 %v1928_v51 }
 0x1b7   :  { %1673 = vmatmul.bf16.gmra.mxu0 %v1569_v28 }
 0x1bf   :  { %1892 = vmatmul.bf16.gmra.mxu2 %v1788_v5 }
 0x1c0   :  { %2033 = vmatmul.bf16.gmra.mxu3 %v1929_v12 }
 0x1c4   :  { %v1735_v49 = vpop.f32.mrf.mxu1 }
 0x1cc   :  { %v1737_v17 = vpop.f32.mrf.mxu1 }
 0x1d4   :  { %v1644_v3 = vpop.f32.mrf.mxu0  ;;  %v1740_v7 = vpop.f32.mrf.mxu1 }
 0x1d5   :  { %v1736_v26 = vadd.f32 %v1735_v49, %v1644_v3 }
 0x1dc   :  { %v1646_v21 = vpop.f32.mrf.mxu0  ;;  %v1742_v22 = vpop.f32.mrf.mxu1 }
 0x1dd   :  { %v1738_v34 = vadd.f32 %v1737_v17, %v1646_v21 }
 0x1e2   :  { %v1863_v62 = vpop.f32.mrf.mxu2 }
 0x1e3   :  { %v2004_v25 = vpop.f32.mrf.mxu3  ;;  %v1897_v55 = vadd.f32 %v1863_v62, %v1736_v26 }
 0x1e4   :  { %v1649_v10 = vpop.f32.mrf.mxu0  ;;  %v1745_v32 = vpop.f32.mrf.mxu1 }
 0x1e5   :  { %v2038_v40 = vadd.f32 %v2004_v25, %v1897_v55  ;;  %v1741_v48 = vadd.f32 %v1740_v7, %v1649_v10 }
 0x1e7   :  { %v2055_v33 = vadd.f32 %v5559_v50, %v2038_v40 }
 0x1e9   :  { %v2068_v42 = vmax.f32 %v2055_v33, 0.0 }
 0x1ea   :  { %v1865_v30 = vpop.f32.mrf.mxu2 }
 0x1eb   :  { %v2006_v44 = vpop.f32.mrf.mxu3  ;;  %2082 = vst.msk [vmem:[#allocation3] sm:$0xff] %vm2081_vm3, %v2068_v42  ;;  %v1898_v35 = vadd.f32 %v1865_v30, %v1738_v34 }
 0x1ec   :  { %v1651_v18 = vpop.f32.mrf.mxu0  ;;  %v1747_v54 = vpop.f32.mrf.mxu1 }
 0x1ed   :  { %v2039_v45 = vadd.f32 %v2006_v44, %v1898_v35  ;;  %v1743_v57 = vadd.f32 %v1742_v22, %v1651_v18 }
 0x1ef   :  { %v2056_v52 = vadd.f32 %v5559_v50, %v2039_v45 }
 0x1f1   :  { %v2069_v37 = vmax.f32 %v2056_v52, 0.0 }
 0x1f2   :  { %v1868_v31 = vpop.f32.mrf.mxu2  ;;  %v2096_v58 = vld [vmem:[#allocation3] sm:$0xff] }
 0x1f3   :  { %v2009_v4 = vpop.f32.mrf.mxu3  ;;  %2083 = vst.msk [vmem:[#allocation3 + $0x8] sm:$0xff] %vm2081_vm3, %v2069_v37  ;;  %v1899_v29 = vadd.f32 %v1868_v31, %v1741_v48  ;;  %v4537_v37 = vld [vmem:[%s5956_s5 + $0x88] sm:$0xff] }
 0x1f4   :  { %v1654_v53 = vpop.f32.mrf.mxu0  ;;  %v1750_v56 = vpop.f32.mrf.mxu1  ;;  %2572 = vmatpush.bf16.msra.mxu0 %v4537_v37  ;;  %v4550_v37 = vld [vmem:[%s5956_s5 + $0xf0] sm:$0xff] }
 0x1f5   :  { %v2040_v14 = vadd.f32 %v2009_v4, %v1899_v29  ;;  %v1746_v1 = vadd.f32 %v1745_v32, %v1654_v53 }
 0x1f7   :  { %v2057_v59 = vadd.f32 %v5559_v50, %v2040_v14 }
 0x1f9   :  { %v2070_v47 = vmax.f32 %v2057_v59, 0.0 }
 0x1fa   :  { %v1870_v19 = vpop.f32.mrf.mxu2  ;;  %v2097_v46 = vld [vmem:[#allocation3 + $0x8] sm:$0xff] }
 0x1fb   :  { %v2011_v36 = vpop.f32.mrf.mxu3  ;;  %2084 = vst.msk [vmem:[#allocation3 + $0x10] sm:$0xff] %vm2081_vm3, %v2070_v47  ;;  %v1900_v16 = vadd.f32 %v1870_v19, %v1743_v57  ;;  %v2106_v60 = vpack.c.bf16 %v2097_v46, %v2096_v58  ;;  %v2119_v63 = vld [vmem:[#allocation3 + $0x1] sm:$0xff] }
 0x1fc   :  { %v1656_v38 = vpop.f32.mrf.mxu0  ;;  %v5579_v51 = vpop.f32.mrf.mxu1  ;;  %v2289_v6 = vld [vmem:[#allocation3 + $0x2] sm:$0xff] }
 0x1fd   :  { %v2041_v27 = vadd.f32 %v2011_v36, %v1900_v16  ;;  %4144 = vmatmul.msk.bf16.vlgmr.msra.gmra.mxu1 %vm2081_vm3, %v2106_v60  ;;  %v1748_v41 = vadd.f32 %v1747_v54, %v1656_v38 }
 0x1ff   :  { %v2058_v28 = vadd.f32 %v5559_v50, %v2041_v27 }
 0x201   :  { %v2071_v0 = vmax.f32 %v2058_v28, 0.0 }
 0x202   :  { %v1873_v5 = vpop.f32.mrf.mxu2  ;;  %v2120_v43 = vld [vmem:[#allocation3 + $0x9] sm:$0xff] }
 0x203   :  { %v2014_v12 = vpop.f32.mrf.mxu3  ;;  %v2290_v49 = vld [vmem:[#allocation3 + $0xa] sm:$0xff]  ;;  %2085 = vst.msk [vmem:[#allocation3 + $0x18] sm:$0xff] %vm2081_vm3, %v2071_v0  ;;  %v1901_v24 = vadd.f32 %v1873_v5, %v1746_v1  ;;  %v2129_v17 = vpack.c.bf16 %v2120_v43, %v2119_v63 }
 0x204   :  { %v2299_v8 = vpack.c.bf16 %v2290_v49, %v2289_v6  ;;  %v1659_v3 = vpop.f32.mrf.mxu0  ;;  %v5584_v7 = vpop.f32.mrf.mxu1  ;;  %v2098_v21 = vld [vmem:[#allocation3 + $0x10] sm:$0xff] }
 0x205   :  { %v2042_v9 = vadd.f32 %v2014_v12, %v1901_v24  ;;  %4123 = vmatmul.msk.bf16.vlgmr.msrb.gmra.mxu0 %vm2081_vm3, %v2129_v17  ;;  %v2396_v15 = vld [vmem:[#allocation3 + $0xb] sm:$0xff]  ;;  %v1751_v34 = vadd.f32 %v1750_v56, %v1659_v3  ;;  %v4542_v12 = vld [vmem:[%s5956_s5 + $0xb0] sm:$0xff] }
 0x206   :  { %4173 = vmatmul.msk.bf16.vlgmr.msra.gmra.mxu2 %vm2081_vm3, %v2299_v8 }
 0x207   :  { %v2059_v20 = vadd.f32 %v5559_v50, %v2042_v9 }
 0x209   :  { %v2072_v13 = vmax.f32 %v2059_v20, 0.0 }
 0x20a   :  { %v1875_v22 = vpop.f32.mrf.mxu2  ;;  %v5589_v26 = vld [vmem:[#allocation3 + $0x18] sm:$0xff] }
 0x20b   :  { %v2016_v2 = vpop.f32.mrf.mxu3  ;;  %v2397_v62 = vld [vmem:[#allocation3 + $0x13] sm:$0xff]  ;;  %2086 = vst.msk [vmem:[#allocation3 + $0x20] sm:$0xff] %vm2081_vm3, %v2072_v13  ;;  %v1902_v25 = vadd.f32 %v1875_v22, %v1748_v41  ;;  %v2107_v55 = vpack.c.bf16 %v5589_v26, %v2098_v21 }
 0x20c   :  { %v2406_v10 = vpack.c.bf16 %v2397_v62, %v2396_v15  ;;  %v1661_v32 = vpop.f32.mrf.mxu0  ;;  %v5593_v40 = vpop.f32.mrf.mxu1  ;;  %v2121_v39 = vld [vmem:[#allocation3 + $0x11] sm:$0xff] }
 0x20d   :  { %v2043_v23 = vadd.f32 %v2016_v2, %v1902_v25  ;;  %4145 = vmatmul.msk.bf16.gmra.mxu1 %vm2081_vm3, %v2107_v55  ;;  %v2291_v30 = vld [vmem:[#allocation3 + $0x12] sm:$0xff]  ;;  %v1753_v14 = vadd.f32 %v5579_v51, %v1661_v32  ;;  %v4543_v51 = vld [vmem:[%s5956_s5 + $0xb8] sm:$0xff] }
 0x20e   :  { %4202 = vmatmul.msk.bf16.vlgmr.msrb.gmra.mxu3 %vm2081_vm3, %v2406_v10  ;;  %2677 = vmatpush.bf16.msrb.mxu1 %v4543_v51  ;;  %v4541_v22 = vld [vmem:[%s5956_s5 + $0xa8] sm:$0xff]  ;;  %v4547_v2 = vld [vmem:[%s5956_s5 + $0xd8] sm:$0xff]  ;;  %v4540_v55 = vld [vmem:[%s5956_s5 + $0xa0] sm:$0xff] }
 0x20f   :  { %v2060_v33 = vadd.f32 %v5559_v50, %v2043_v23  ;;  %2784 = vmatpush.bf16.msrb.mxu2 %v4547_v2  ;;  %v4546_v10 = vld [vmem:[%s5956_s5 + $0xd0] sm:$0xff]  ;;  %v4555_v51 = vld [vmem:[%s5956_s5 + $0x118] sm:$0xff] }
 0x211   :  { %v2073_v42 = vmax.f32 %v2060_v33, 0.0 }
 0x212   :  { %v1878_v44 = vpop.f32.mrf.mxu2  ;;  %v2122_v11 = vld [vmem:[#allocation3 + $0x19] sm:$0xff]  ;;  %2678 = vmatpush.bf16.msrb.mxu1 %v4542_v12 }
 0x213   :  { %v2019_v35 = vpop.f32.mrf.mxu3  ;;  %v2292_v18 = vld [vmem:[#allocation3 + $0x1a] sm:$0xff]  ;;  %2087 = vst.msk [vmem:[#allocation3 + $0x28] sm:$0xff] %vm2081_vm3, %v2073_v42  ;;  %v1903_v45 = vadd.f32 %v1878_v44, %v1751_v34  ;;  %v2130_v52 = vpack.c.bf16 %v2122_v11, %v2121_v39  ;;  %2785 = vmatpush.bf16.msrb.mxu2 %v4546_v10 }
 0x214   :  { %v5598_v54 = vld [vmem:[#allocation3 + $0x20] sm:$0xff]  ;;  %v2300_v48 = vpack.c.bf16 %v2292_v18, %v2291_v30  ;;  %v1664_v4 = vpop.f32.mrf.mxu0  ;;  %v5606_v29 = vpop.f32.mrf.mxu1  ;;  %v4551_v18 = vld [vmem:[%s5956_s5 + $0xf8] sm:$0xff] }
 0x215   :  { %v2941_v31 = vpack.c.bf16 %v5598_v54, %v5589_v26  ;;  %v2044_v53 = vadd.f32 %v2019_v35, %v1903_v45  ;;  %4124 = vmatmul.msk.bf16.gmra.mxu0 %vm2081_vm3, %v2130_v52  ;;  %v2398_v36 = vld [vmem:[#allocation3 + $0x1b] sm:$0xff]  ;;  %v1756_v1 = vadd.f32 %v5584_v7, %v1664_v4  ;;  %v4536_v7 = vld [vmem:[%s5956_s5 + $0x80] sm:$0xff]  ;;  %2891 = vmatpush.bf16.msra.mxu3 %v4551_v18 }
 0x216   :  { %4174 = vmatmul.msk.bf16.gmra.mxu2 %vm2081_vm3, %v2300_v48  ;;  %2573 = vmatpush.bf16.msra.mxu0 %v4536_v7  ;;  %v4545_v45 = vld [vmem:[%s5956_s5 + $0xc8] sm:$0xff]  ;;  %v4544_v48 = vld [vmem:[%s5956_s5 + $0xc0] sm:$0xff] }
 0x217   :  { %v2061_v56 = vadd.f32 %v5559_v50, %v2044_v53  ;;  %2679 = vmatpush.bf16.msrb.mxu1 %v4541_v22  ;;  %2786 = vmatpush.bf16.msrb.mxu2 %v4545_v45  ;;  %v2610_v45 = vld [vmem:[#allocation3 + $0xd] sm:$0xff] }
 0x219   :  { %v2074_v59 = vmax.f32 %v2061_v56, 0.0  ;;  %2892 = vmatpush.bf16.msra.mxu3 %v4550_v37  ;;  %v2504_v37 = vld [vmem:[#allocation3 + $0x14] sm:$0xff] }
 0x21a   :  { %v1880_v57 = vpop.f32.mrf.mxu2  ;;  %v5612_v19 = vld [vmem:[#allocation3 + $0x28] sm:$0xff]  ;;  %2998 = vmatpush.bf16.msrb.mxu0 %v4555_v51  ;;  %v2505_v51 = vld [vmem:[#allocation3 + $0x1c] sm:$0xff] }
 0x21b   :  { %v2021_v47 = vpop.f32.mrf.mxu3  ;;  %v2399_v58 = vld [vmem:[#allocation3 + $0x23] sm:$0xff]  ;;  %2088 = vst.msk [vmem:[#allocation3 + $0x30] sm:$0xff] %vm2081_vm3, %v2074_v59  ;;  %v1904_v46 = vadd.f32 %v1880_v57, %v1753_v14  ;;  %v2108_v16 = vpack.c.bf16 %v5612_v19, %v5598_v54  ;;  %2680 = vmatpush.bf16.msrb.mxu1 %v4540_v55  ;;  %2787 = vmatpush.bf16.msrb.mxu2 %v4544_v48 }
 0x21c   :  { %v2407_v60 = vpack.c.bf16 %v2399_v58, %v2398_v36  ;;  %v1666_v61 = vpop.f32.mrf.mxu0  ;;  %v5617_v38 = vpop.f32.mrf.mxu1  ;;  %v2123_v63 = vld [vmem:[#allocation3 + $0x21] sm:$0xff] }
 0x21d   :  { %v2045_v27 = vadd.f32 %v2021_v47, %v1904_v46  ;;  %4146 = vmatmul.msk.bf16.gmra.mxu1 %vm2081_vm3, %v2108_v16  ;;  %v2293_v5 = vld [vmem:[#allocation3 + $0x22] sm:$0xff]  ;;  %v1758_v62 = vadd.f32 %v5593_v40, %v1666_v61 }
 0x21e   :  { %4203 = vmatmul.msk.bf16.gmra.mxu3 %vm2081_vm3, %v2407_v60 }
 0x21f   :  { %v2062_v28 = vadd.f32 %v5559_v50, %v2045_v27 }
 0x221   :  { %v2075_v0 = vmax.f32 %v2062_v28, 0.0  ;;  %v4549_v28 = vld [vmem:[%s5956_s5 + $0xe8] sm:$0xff] }
 0x222   :  { %v1883_v43 = vpop.f32.mrf.mxu2  ;;  %v2124_v49 = vld [vmem:[#allocation3 + $0x29] sm:$0xff]  ;;  %2893 = vmatpush.bf16.msra.mxu3 %v4549_v28 }
 0x223   :  { %v2024_v6 = vpop.f32.mrf.mxu3  ;;  %v2294_v24 = vld [vmem:[#allocation3 + $0x2a] sm:$0xff]  ;;  %2089 = vst.msk [vmem:[#allocation3 + $0x38] sm:$0xff] %vm2081_vm3, %v2075_v0  ;;  %v1905_v8 = vadd.f32 %v1883_v43, %v1756_v1  ;;  %v2131_v3 = vpack.c.bf16 %v2124_v49, %v2123_v63 }
 0x224   :  { %v5629_v17 = vld [vmem:[#allocation3 + $0x30] sm:$0xff]  ;;  %v2301_v9 = vpack.c.bf16 %v2294_v24, %v2293_v5  ;;  %v1669_v20 = vpop.f32.mrf.mxu0  ;;  %v2719_v28 = vld [vmem:[#allocation3 + $0x26] sm:$0xff] }
 0x225   :  { %v5635_v41 = vpop.f32.mrf.mxu1  ;;  %v2942_v13 = vpack.c.bf16 %v5629_v17, %v5612_v19  ;;  %v2046_v21 = vadd.f32 %v2024_v6, %v1905_v8  ;;  %4125 = vmatmul.msk.bf16.gmra.mxu0 %vm2081_vm3, %v2131_v3  ;;  %v2400_v34 = vld [vmem:[#allocation3 + $0x2b] sm:$0xff]  ;;  %v1761_v4 = vadd.f32 %v5606_v29, %v1669_v20 }
 0x226   :  { %4175 = vmatmul.msk.bf16.gmra.mxu2 %vm2081_vm3, %v2301_v9  ;;  %v4548_v0 = vld [vmem:[%s5956_s5 + $0xe0] sm:$0xff] }
 0x227   :  { %v2063_v15 = vadd.f32 %v5559_v50, %v2046_v21  ;;  %2894 = vmatpush.bf16.msra.mxu3 %v4548_v0 }
 0x229   :  { %v2076_v25 = vmax.f32 %v2063_v15, 0.0 }
 0x22a   :  { %v1885_v32 = vpop.f32.mrf.mxu2  ;;  %v5655_v33 = vld [vmem:[#allocation3 + $0x38] sm:$0xff] }
 0x22b   :  { %v2026_v23 = vpop.f32.mrf.mxu3  ;;  %v2401_v42 = vld [vmem:[#allocation3 + $0x33] sm:$0xff]  ;;  %2090 = vst.msk [vmem:[#allocation3 + $0x40] sm:$0xff] %vm2081_vm3, %v2076_v25  ;;  %v1906_v39 = vadd.f32 %v1885_v32, %v1758_v62  ;;  %v2109_v40 = vpack.c.bf16 %v5655_v33, %v5629_v17 }
 0x22c   :  { %v2408_v30 = vpack.c.bf16 %v2401_v42, %v2400_v34  ;;  %v1671_v44 = vpop.f32.mrf.mxu0  ;;  %v2125_v56 = vld [vmem:[#allocation3 + $0x31] sm:$0xff] }
 0x22d   :  { %v1767_v35 = vpop.f32.mrf.mxu1  ;;  %v2047_v11 = vadd.f32 %v2026_v23, %v1906_v39  ;;  %4147 = vmatmul.msk.bf16.gmra.mxu1 %vm2081_vm3, %v2109_v40  ;;  %v2295_v14 = vld [vmem:[#allocation3 + $0x32] sm:$0xff]  ;;  %v1763_v63 = vadd.f32 %v5617_v38, %v1671_v44  ;;  %v4554_v39 = vld [vmem:[%s5956_s5 + $0x110] sm:$0xff] }
 0x22e   :  { %4204 = vmatmul.msk.bf16.gmra.mxu3 %vm2081_vm3, %v2408_v30  ;;  %2999 = vmatpush.bf16.msrb.mxu0 %v4554_v39  ;;  %v2611_v44 = vld [vmem:[#allocation3 + $0x15] sm:$0xff] }
 0x22f   :  { %v2064_v52 = vadd.f32 %v5559_v50, %v2047_v11  ;;  %v2620_v48 = vpack.c.bf16 %v2611_v44, %v2610_v45 }
 0x231   :  { %v2077_v53 = vmax.f32 %v2064_v52, 0.0 }
 0x232   :  { %v1888_v59 = vpop.f32.mrf.mxu2  ;;  %v2126_v47 = vld [vmem:[#allocation3 + $0x39] sm:$0xff] }
 0x233   :  { %v2029_v57 = vpop.f32.mrf.mxu3  ;;  %v2296_v36 = vld [vmem:[#allocation3 + $0x3a] sm:$0xff]  ;;  %2091 = vst.msk [vmem:[#allocation3 + $0x48] sm:$0xff] %vm2081_vm3, %v2077_v53  ;;  %v1907_v46 = vadd.f32 %v1888_v59, %v1761_v4  ;;  %v2132_v16 = vpack.c.bf16 %v2126_v47, %v2125_v56  ;;  %v2613_v59 = vld [vmem:[#allocation3 + $0x25] sm:$0xff] }
 0x234   :  { %v5676_v58 = vld [vmem:[#allocation3 + $0x40] sm:$0xff]  ;;  %v2302_v60 = vpack.c.bf16 %v2296_v36, %v2295_v14  ;;  %v1674_v61 = vpop.f32.mrf.mxu0  ;;  %v2717_v53 = vld [vmem:[#allocation3 + $0x16] sm:$0xff] }
 0x235   :  { %v2943_v29 = vpack.c.bf16 %v5676_v58, %v5655_v33  ;;  %v2048_v27 = vadd.f32 %v2029_v57, %v1907_v46  ;;  %4126 = vmatmul.msk.bf16.gmra.mxu0 %vm2081_vm3, %v2132_v16  ;;  %v2402_v49 = vld [vmem:[#allocation3 + $0x3b] sm:$0xff]  ;;  %v1766_v62 = vadd.f32 %v5635_v41, %v1674_v61  ;;  %v2506_v61 = vld [vmem:[#allocation3 + $0x24] sm:$0xff] }
 0x236   :  { %4176 = vmatmul.msk.bf16.gmra.mxu2 %vm2081_vm3, %v2302_v60  ;;  %v2718_v4 = vld [vmem:[#allocation3 + $0x1e] sm:$0xff] }
 0x237   :  { %v2065_v1 = vadd.f32 %v5559_v50, %v2048_v27  ;;  %v2727_v14 = vpack.c.bf16 %v2718_v4, %v2717_v53  ;;  %v2825_v57 = vld [vmem:[#allocation3 + $0x1f] sm:$0xff]  ;;  %v2824_v36 = vld [vmem:[#allocation3 + $0x17] sm:$0xff]  ;;  %v2720_v27 = vld [vmem:[#allocation3 + $0x2e] sm:$0xff] }
 0x238   :  { %v2612_v47 = vld [vmem:[#allocation3 + $0x1d] sm:$0xff]  ;;  %v2834_v16 = vpack.c.bf16 %v2825_v57, %v2824_v36  ;;  %v2728_v0 = vpack.c.bf16 %v2720_v27, %v2719_v28 }
 0x239   :  { %v2078_v5 = vmax.f32 %v2065_v1, 0.0  ;;  %v2621_v46 = vpack.c.bf16 %v2613_v59, %v2612_v47  ;;  %v4553_v60 = vld [vmem:[%s5956_s5 + $0x108] sm:$0xff]  ;;  %v2514_v1 = vpack.c.bf16 %v2506_v61, %v2505_v51 }
 0x23a   :  { %v1890_v12 = vpop.f32.mrf.mxu2  ;;  %v2105_v6 = vld [vmem:[#allocation3 + $0x48] sm:$0x1]  ;;  %v2128_v22 = vld [vmem:[#allocation3 + $0x49] sm:$0x1]  ;;  %v2298_v15 = vld [vmem:[#allocation3 + $0x4a] sm:$0x1]  ;;  %3000 = vmatpush.bf16.msrb.mxu0 %v4553_v60 }
 0x23b   :  { %v2031_v43 = vpop.f32.mrf.mxu3  ;;  %v2403_v24 = vld [vmem:[#allocation3 + $0x43] sm:$0xff]  ;;  %2092 = vst.msk [vmem:[#allocation3 + $0x50] sm:$0xff] %vm2081_vm3, %v2078_v5  ;;  %v1908_v8 = vadd.f32 %v1890_v12, %v1763_v63  ;;  %v2110_v3 = vpack.c.bf16 %v2105_v6, %v5676_v58  ;;  %v2615_v63 = vld [vmem:[#allocation3 + $0x35] sm:$0xff]  ;;  %v2614_v12 = vld [vmem:[#allocation3 + $0x2d] sm:$0xff] }
 0x23c   :  { %v2409_v9 = vpack.c.bf16 %v2403_v24, %v2402_v49  ;;  %v1676_v7 = vpop.f32.mrf.mxu0  ;;  %v2127_v21 = vld [vmem:[#allocation3 + $0x41] sm:$0xff]  ;;  %v2827_v5 = vld [vmem:[#allocation3 + $0x2f] sm:$0xff]  ;;  %v2622_v6 = vpack.c.bf16 %v2615_v63, %v2614_v12 }
 0x23d   :  { %v2049_v20 = vadd.f32 %v2031_v43, %v1908_v8  ;;  %4148 = vmatmul.msk.bf16.gmra.mxu1 %vm2081_vm3, %v2110_v3  ;;  %v2297_v2 = vld [vmem:[#allocation3 + $0x42] sm:$0xff]  ;;  %v2133_v23 = vpack.c.bf16 %v2128_v22, %v2127_v21  ;;  %v2508_v24 = vld [vmem:[#allocation3 + $0x34] sm:$0xff] }
 0x23e   :  { %4205 = vmatmul.msk.bf16.gmra.mxu3 %vm2081_vm3, %v2409_v9  ;;  %v2303_v34 = vpack.c.bf16 %v2298_v15, %v2297_v2  ;;  %v2826_v43 = vld [vmem:[#allocation3 + $0x27] sm:$0xff]  ;;  %v2722_v8 = vld [vmem:[#allocation3 + $0x3e] sm:$0xff]  ;;  %v4552_v3 = vld [vmem:[%s5956_s5 + $0x100] sm:$0xff] }
 0x23f   :  { %v2066_v38 = vadd.f32 %v5559_v50, %v2049_v20  ;;  %v2835_v49 = vpack.c.bf16 %v2827_v5, %v2826_v43  ;;  %v2507_v9 = vld [vmem:[#allocation3 + $0x2c] sm:$0xff]  ;;  %v2721_v7 = vld [vmem:[#allocation3 + $0x36] sm:$0xff]  ;;  %3001 = vmatpush.bf16.msrb.mxu0 %v4552_v3  ;;  %v2829_v22 = vld [vmem:[#allocation3 + $0x3f] sm:$0xff] }
 0x240   :  { %v2515_v20 = vpack.c.bf16 %v2508_v24, %v2507_v9  ;;  %v2617_v21 = vld [vmem:[#allocation3 + $0x45] sm:$0xff]  ;;  %v2616_v15 = vld [vmem:[#allocation3 + $0x3d] sm:$0xff] }
 0x241   :  { %v2079_v25 = vmax.f32 %v2066_v38, 0.0  ;;  %v2729_v38 = vpack.c.bf16 %v2722_v8, %v2721_v7  ;;  %v2723_v39 = vld [vmem:[#allocation3 + $0x46] sm:$0xff] }
 0x242   :  { %v1893_v55 = vpop.f32.mrf.mxu2  ;;  %v2404_v41 = vld [vmem:[#allocation3 + $0x4b] sm:$0xff]  ;;  %v2405_v30 = vld [vmem:[#allocation3 + $0x53] sm:$0x1]  ;;  %v2512_v57 = vld [vmem:[#allocation3 + $0x54] sm:$0x1] }
 0x243   :  { %v2034_v10 = vpop.f32.mrf.mxu3  ;;  %2093 = vst.msk [vmem:[#allocation3 + $0x58] sm:$0xff] %vm2081_vm3, %v2079_v25  ;;  %v1909_v32 = vadd.f32 %v1893_v55, %v1766_v62  ;;  %v2410_v52 = vpack.c.bf16 %v2405_v30, %v2404_v41  ;;  %v2828_v62 = vld [vmem:[#allocation3 + $0x37] sm:$0xff]  ;;  %v2623_v25 = vpack.c.bf16 %v2617_v21, %v2616_v15 }
 0x244   :  { %v2836_v55 = vpack.c.bf16 %v2829_v22, %v2828_v62 }
 0x245   :  { %v2050_v42 = vadd.f32 %v2034_v10, %v1909_v32  ;;  %4127 = vmatmul.msk.bf16.gmra.mxu0 %vm2081_vm3, %v2133_v23  ;;  %v2510_v10 = vld [vmem:[#allocation3 + $0x44] sm:$0xff]  ;;  %v2724_v32 = vld [vmem:[#allocation3 + $0x4e] sm:$0xff] }
 0x246   :  { %4177 = vmatmul.msk.bf16.gmra.mxu2 %vm2081_vm3, %v2303_v34  ;;  %v2730_v30 = vpack.c.bf16 %v2724_v32, %v2723_v39 }
 0x247   :  { %v2067_v40 = vadd.f32 %v5559_v50, %v2050_v42  ;;  %v2503_v50 = vld [vmem:[#allocation3 + $0xc] sm:$0xff]  ;;  %v2509_v42 = vld [vmem:[#allocation3 + $0x3c] sm:$0xff] }
 0x248   :  { %v2513_v56 = vpack.c.bf16 %v2504_v37, %v2503_v50  ;;  %v2516_v41 = vpack.c.bf16 %v2510_v10, %v2509_v42  ;;  %v2830_v37 = vld [vmem:[#allocation3 + $0x47] sm:$0xff] }
 0x249   :  { %v2080_v35 = vmax.f32 %v2067_v40, 0.0 }
 0x24a   :  { %v1895_v11 = vpop.f32.mrf.mxu2  ;;  %v2725_v47 = vld [vmem:[#allocation3 + $0x56] sm:$0xff]  ;;  %v2726_v36 = vld [vmem:[#allocation3 + $0x5e] sm:$0x1]  ;;  %v2833_v5 = vld [vmem:[#allocation3 + $0x5f] sm:$0x1] }
 0x24b   :  { %v2036_v18 = vpop.f32.mrf.mxu3  ;;  %2095 = vst.msk [vmem:[#allocation3 + $0x60] sm:$0x1] %vm2094_vm4, %v2080_v35  ;;  %v2618_v35 = vld [vmem:[#allocation3 + $0x4d] sm:$0xff]  ;;  %v2619_v11 = vld [vmem:[#allocation3 + $0x55] sm:$0x1]  ;;  %v2731_v28 = vpack.c.bf16 %v2726_v36, %v2725_v47  ;;  %v2832_v63 = vld [vmem:[#allocation3 + $0x57] sm:$0xff] }
 0x24c   :  { %v2831_v18 = vld [vmem:[#allocation3 + $0x4f] sm:$0xff]  ;;  %v2624_v50 = vpack.c.bf16 %v2619_v11, %v2618_v35  ;;  %v2838_v8 = vpack.c.bf16 %v2833_v5, %v2832_v63  ;;  %v2939_v5 = vld [vmem:[#allocation3 + $0x58] sm:$0xff] }
 0x24d   :  { %4260 = vmatmul.msk.bf16.vlgmr.msrb.gmra.mxu1 %vm2081_vm3, %v2620_v48  ;;  %v2837_v53 = vpack.c.bf16 %v2831_v18, %v2830_v37  ;;  %v2938_v36 = vld [vmem:[#allocation3 + $0x50] sm:$0xff] }
 0x24e   :  { %4206 = vmatmul.msk.bf16.gmra.mxu3 %vm2081_vm3, %v2410_v52 }
 0x255   :  { %4231 = vmatmul.msk.bf16.vlgmr.msra.gmra.mxu0 %vm2081_vm3, %v2513_v56  ;;  %v2511_v56 = vld [vmem:[#allocation3 + $0x4c] sm:$0xff] }
 0x256   :  { %4289 = vmatmul.msk.bf16.vlgmr.msrb.gmra.mxu2 %vm2081_vm3, %v2727_v14  ;;  %v2517_v51 = vpack.c.bf16 %v2512_v57, %v2511_v56 }
 0x25d   :  { %4261 = vmatmul.msk.bf16.gmra.mxu1 %vm2081_vm3, %v2621_v46 }
 0x25e   :  { %4318 = vmatmul.msk.bf16.vlgmr.msra.gmra.mxu3 %vm2081_vm3, %v2834_v16 }
 0x265   :  { %4232 = vmatmul.msk.bf16.gmra.mxu0 %vm2081_vm3, %v2514_v1 }
 0x266   :  { %4290 = vmatmul.msk.bf16.gmra.mxu2 %vm2081_vm3, %v2728_v0 }
 0x26d   :  { %4262 = vmatmul.msk.bf16.gmra.mxu1 %vm2081_vm3, %v2622_v6 }
 0x26e   :  { %4319 = vmatmul.msk.bf16.gmra.mxu3 %vm2081_vm3, %v2835_v49 }
 0x275   :  { %4233 = vmatmul.msk.bf16.gmra.mxu0 %vm2081_vm3, %v2515_v20 }
 0x276   :  { %4291 = vmatmul.msk.bf16.gmra.mxu2 %vm2081_vm3, %v2729_v38 }
 0x27a   :  { %v2264_v2 = vpop.f32.mrf.mxu1 }
 0x27d   :  { %4263 = vmatmul.msk.bf16.gmra.mxu1 %vm2081_vm3, %v2623_v25 }
 0x27e   :  { %4320 = vmatmul.msk.bf16.gmra.mxu3 %vm2081_vm3, %v2836_v55 }
 0x282   :  { %v2191_v23 = vpop.f32.mrf.mxu0  ;;  %v2266_v34 = vpop.f32.mrf.mxu1 }
 0x283   :  { %v2265_v40 = vadd.f32 %v2264_v2, %v2191_v23 }
 0x285   :  { %4234 = vmatmul.msk.bf16.gmra.mxu0 %vm2081_vm3, %v2516_v41 }
 0x286   :  { %4292 = vmatmul.msk.bf16.gmra.mxu2 %vm2081_vm3, %v2730_v30 }
 0x289   :  { %v2361_v44 = vpop.f32.mrf.mxu2 }
 0x28a   :  { %v2386_v45 = vadd.f32 %v2361_v44, %v2265_v40  ;;  %v2193_v52 = vpop.f32.mrf.mxu0  ;;  %v2269_v48 = vpop.f32.mrf.mxu1 }
 0x28b   :  { %v2267_v4 = vadd.f32 %v2266_v34, %v2193_v52 }
 0x28d   :  { %4264 = vmatmul.msk.bf16.gmra.mxu1 %vm2081_vm3, %v2624_v50 }
 0x28e   :  { %4321 = vmatmul.msk.bf16.gmra.mxu3 %vm2081_vm3, %v2837_v53 }
 0x291   :  { %v2363_v14 = vpop.f32.mrf.mxu2  ;;  %v2468_v59 = vpop.f32.mrf.mxu3 }
 0x292   :  { %v2387_v46 = vadd.f32 %v2363_v14, %v2267_v4  ;;  %v5732_v16 = vadd.f32 %v2468_v59, %v2386_v45  ;;  %v2196_v60 = vpop.f32.mrf.mxu0  ;;  %v2271_v61 = vpop.f32.mrf.mxu1 }
 0x293   :  { %v2270_v27 = vadd.f32 %v2269_v48, %v2196_v60 }
 0x295   :  { %4235 = vmatmul.msk.bf16.gmra.mxu0 %vm2081_vm3, %v2517_v51 }
 0x296   :  { %4293 = vmatmul.msk.bf16.gmra.mxu2 %vm2081_vm3, %v2731_v28 }
 0x299   :  { %v2366_v1 = vpop.f32.mrf.mxu2  ;;  %v2470_v0 = vpop.f32.mrf.mxu3 }
 0x29a   :  { %v2388_v12 = vadd.f32 %v2366_v1, %v2270_v27  ;;  %v5736_v43 = vadd.f32 %v2470_v0, %v2387_v46  ;;  %v2198_v6 = vpop.f32.mrf.mxu0  ;;  %v2274_v49 = vpop.f32.mrf.mxu1  ;;  %v2937_v27 = vld [vmem:[#allocation3 + $0x48] sm:$0xff]  ;;  %v2940_v0 = vld [vmem:[#allocation3 + $0x60] sm:$0x1] }
 0x29b   :  { %v2272_v24 = vadd.f32 %v2271_v61, %v2198_v6  ;;  %v2944_v28 = vpack.c.bf16 %v2938_v36, %v2937_v27  ;;  %v2945_v6 = vpack.c.bf16 %v2940_v0, %v2939_v5  ;;  %v4631_v0 = vld [vmem:[%s5958_s7 + $0x78] sm:$0xff]  }
 0x29c   :  { %v4628_v5 = vld [vmem:[%s5958_s7 + $0x58] sm:$0xff]  }
 0x29e   :  { %4322 = vmatmul.msk.bf16.gmra.mxu3 %vm2081_vm3, %v2838_v8 }
 0x2a1   :  { %v2368_v3 = vpop.f32.mrf.mxu2  ;;  %v2473_v9 = vpop.f32.mrf.mxu3 }
 0x2a2   :  { %v2389_v7 = vadd.f32 %v2368_v3, %v2272_v24  ;;  %v2495_v20 = vadd.f32 %v2473_v9, %v2388_v12  ;;  %v2201_v38 = vpop.f32.mrf.mxu0  ;;  %v2276_v21 = vpop.f32.mrf.mxu1 }
 0x2a3   :  { %v2275_v22 = vadd.f32 %v2274_v49, %v2201_v38 }
 0x2a5   :  { %4347 = vmatmul.msk.bf16.vlgmr.msrb.gmra.mxu0 %vm2081_vm3, %v2941_v31 }
 0x2a9   :  { %v2371_v2 = vpop.f32.mrf.mxu2  ;;  %v2475_v15 = vpop.f32.mrf.mxu3 }
 0x2aa   :  { %v2390_v62 = vadd.f32 %v2371_v2, %v2275_v22  ;;  %v2496_v25 = vadd.f32 %v2475_v15, %v2389_v7  ;;  %v2203_v55 = vpop.f32.mrf.mxu0  ;;  %v2279_v32 = vpop.f32.mrf.mxu1 }
 0x2ab   :  { %v2277_v10 = vadd.f32 %v2276_v21, %v2203_v55 }
 0x2b1   :  { %v2373_v23 = vpop.f32.mrf.mxu2  ;;  %v2478_v34 = vpop.f32.mrf.mxu3 }
 0x2b2   :  { %v2391_v42 = vadd.f32 %v2373_v23, %v2277_v10  ;;  %v2497_v39 = vadd.f32 %v2478_v34, %v2390_v62  ;;  %v2206_v40 = vpop.f32.mrf.mxu0  ;;  %v2281_v30 = vpop.f32.mrf.mxu1 }
 0x2b3   :  { %v2280_v41 = vadd.f32 %v2279_v32, %v2206_v40 }
 0x2b5   :  { %4348 = vmatmul.msk.bf16.gmra.mxu0 %vm2081_vm3, %v2942_v13 }
 0x2b9   :  { %v2376_v26 = vpop.f32.mrf.mxu2  ;;  %v2480_v54 = vpop.f32.mrf.mxu3 }
 0x2ba   :  { %v2392_v31 = vadd.f32 %v2376_v26, %v2280_v41  ;;  %v2498_v44 = vadd.f32 %v2480_v54, %v2391_v42  ;;  %v2208_v35 = vpop.f32.mrf.mxu0  ;;  %v2284_v18 = vpop.f32.mrf.mxu1  ;;  %v5772_v41 = vld [vmem:[%s5957_s6] ss:$0 sm:$0xff]  ;;  %v4623_v54 = vld [vmem:[%s5958_s7 + $0x28] sm:$0xff]  }
 0x2bb   :  { %v2282_v11 = vadd.f32 %v2281_v30, %v2208_v35 }
 0x2c1   :  { %v2378_v45 = vpop.f32.mrf.mxu2  ;;  %v2483_v52 = vpop.f32.mrf.mxu3 }
 0x2c2   :  { %v2393_v48 = vadd.f32 %v2378_v45, %v2282_v11  ;;  %v2499_v37 = vadd.f32 %v2483_v52, %v2392_v31  ;;  %v2211_v4 = vpop.f32.mrf.mxu0  ;;  %v2286_v56 = vpop.f32.mrf.mxu1  ;;  %v5780_v31 = vld [vmem:[%s5958_s7] sm:$0xff]   ;;  %v4574_v45 = vunpack.c.l.bf16 %v4623_v54 }
 0x2c3   :  { %v2285_v50 = vadd.f32 %v2284_v18, %v2211_v4  ;;  %v4558_v52 = vunpack.c.l.bf16 %v5780_v31 }
 0x2c5   :  { %4349 = vmatmul.msk.bf16.gmra.mxu0 %vm2081_vm3, %v2943_v29 }
 0x2c9   :  { %v2381_v19 = vpop.f32.mrf.mxu2  ;;  %v2485_v17 = vpop.f32.mrf.mxu3 }
 0x2ca   :  { %v2394_v13 = vadd.f32 %v2381_v19, %v2285_v50  ;;  %v2500_v53 = vadd.f32 %v2485_v17, %v2393_v48  ;;  %v2213_v14 = vpop.f32.mrf.mxu0  ;;  %v2682_v22 = vpop.f32.mrf.mxu1  ;;  %v4627_v17 = vld [vmem:[%s5958_s7 + $0x50] sm:$0xff]  }
 0x2cb   :  { %v2287_v59 = vadd.f32 %v2286_v56, %v2213_v14 }
 0x2d1   :  { %v2383_v57 = vpop.f32.mrf.mxu2  ;;  %v2488_v47 = vpop.f32.mrf.mxu3 }
 0x2d2   :  { %v2395_v46 = vadd.f32 %v2383_v57, %v2287_v59  ;;  %v2501_v60 = vadd.f32 %v2488_v47, %v2394_v13  ;;  %v2575_v61 = vpop.f32.mrf.mxu0  ;;  %v4590_v47 = vunpack.c.l.bf16 %v4627_v17 }
 0x2d3   :  { %v2600_v51 = vadd.f32 %v2575_v61, %v5732_v16  ;;  %v4591_v61 = vunpack.c.h.bf16 %v4627_v17 }
 0x2d5   :  { %4350 = vmatmul.msk.bf16.gmra.mxu0 %vm2081_vm3, %v2944_v28  ;;  %v2707_v34 = vadd.f32 %v2682_v22, %v2600_v51 }
 0x2d9   :  { %v2490_v33 = vpop.f32.mrf.mxu3 }
 0x2da   :  { %v2502_v58 = vadd.f32 %v2490_v33, %v2395_v46  ;;  %v2577_v29 = vpop.f32.mrf.mxu0 }
 0x2db   :  { %v2601_v1 = vadd.f32 %v2577_v29, %v5736_v43 }
 0x2e1   :  { %v2896_v2 = vpop.f32.mrf.mxu3 }
 0x2e2   :  { %v2580_v63 = vpop.f32.mrf.mxu0 }
 0x2e3   :  { %v2602_v12 = vadd.f32 %v2580_v63, %v2495_v20  ;;  %v2789_v20 = vpop.f32.mrf.mxu2 }
 0x2e4   :  { %v2814_v42 = vadd.f32 %v2789_v20, %v2707_v34 }
 0x2e5   :  { %4351 = vmatmul.msk.bf16.gmra.mxu0 %vm2081_vm3, %v2945_v6 }
 0x2e6   :  { %v2921_v40 = vadd.f32 %v2896_v2, %v2814_v42  ;;  %v4594_v2 = vunpack.c.l.bf16 %v4628_v5  ;;  %v4620_v42 = vld [vmem:[%s5958_s7 + $0x8] sm:$0xff]  }
 0x2e9   :  { %v2898_v10 = vpop.f32.mrf.mxu3 }
 0x2ea   :  { %v2582_v49 = vpop.f32.mrf.mxu0 }
 0x2eb   :  { %v5755_v24 = vadd.f32 %v2582_v49, %v2496_v25  ;;  %v2684_v25 = vpop.f32.mrf.mxu1  ;;  %v2791_v55 = vpop.f32.mrf.mxu2 }
 0x2ec   :  { %v2708_v11 = vadd.f32 %v2684_v25, %v2601_v1 }
 0x2ee   :  { %v2815_v48 = vadd.f32 %v2791_v55, %v2708_v11  ;;  %v4559_v11 = vunpack.c.h.bf16 %v5780_v31  ;;  %v4624_v31 = vld [vmem:[%s5958_s7 + $0x30] sm:$0xff]  }
 0x2f0   :  { %v2922_v4 = vadd.f32 %v2898_v10, %v2815_v48 }
 0x2f1   :  { %v2901_v35 = vpop.f32.mrf.mxu3 }
 0x2f2   :  { %v2585_v8 = vpop.f32.mrf.mxu0 }
 0x2f3   :  { %v5757_v16 = vadd.f32 %v2585_v8, %v2497_v39  ;;  %v2687_v39 = vpop.f32.mrf.mxu1  ;;  %v2794_v30 = vpop.f32.mrf.mxu2  ;;  %v4607_v8 = vunpack.c.h.bf16 %v4631_v0 }
 0x2f4   :  { %v2709_v36 = vadd.f32 %v2687_v39, %v2602_v12 }
 0x2f6   :  { %v2816_v51 = vadd.f32 %v2794_v30, %v2709_v36  ;;  %v4563_v36 = vunpack.c.h.bf16 %v4620_v42 }
 0x2f9   :  { %v2903_v27 = vpop.f32.mrf.mxu3 }
 0x2fa   :  { %v2587_v3 = vpop.f32.mrf.mxu0 }
 0x2fb   :  { %v5759_v9 = vadd.f32 %v2587_v3, %v2498_v44  ;;  %v2796_v57 = vpop.f32.mrf.mxu2 }
 0x302   :  { %v2590_v7 = vpop.f32.mrf.mxu0 }
 0x303   :  { %v5761_v38 = vadd.f32 %v2590_v7, %v2499_v37  ;;  %v4606_v7 = vunpack.c.l.bf16 %v4631_v0 }
 0x30a   :  { %v2592_v43 = vpop.f32.mrf.mxu0 }
 0x30b   :  { %v5763_v21 = vadd.f32 %v2592_v43, %v2500_v53  ;;  %v2689_v53 = vpop.f32.mrf.mxu1 }
 0x30c   :  { %v2710_v22 = vadd.f32 %v2689_v53, %v5755_v24 }
 0x30e   :  { %v2817_v25 = vadd.f32 %v2796_v57, %v2710_v22 }
 0x310   :  { %v2924_v39 = vadd.f32 %v2903_v27, %v2817_v25 }
 0x312   :  { %v2595_v15 = vpop.f32.mrf.mxu0 }
 0x313   :  { %v5765_v62 = vadd.f32 %v2595_v15, %v2501_v60  ;;  %v4575_v60 = vunpack.c.h.bf16 %v4623_v54  ;;  %v2692_v43 = vpop.f32.mrf.mxu1  ;;  %v2799_v15 = vpop.f32.mrf.mxu2 }
 0x31a   :  { %v2597_v32 = vpop.f32.mrf.mxu0 }
 0x31b   :  { %v5767_v23 = vadd.f32 %v2597_v32, %v2502_v58  ;;  %v2923_v58 = vadd.f32 %v2901_v35, %v2816_v51  ;;  %v2906_v32 = vpop.f32.mrf.mxu3  ;;  %v2694_v48 = vpop.f32.mrf.mxu1 }
 0x322   :  { %v3003_v26 = vpop.f32.mrf.mxu0 }
 0x323   :  { %v3028_v44 = vadd.f32 %v3003_v26, %v2921_v40  ;;  %v2697_v0 = vpop.f32.mrf.mxu1 }
 0x325   :  { %v3042_v18 = vadd.f32 %v5772_v41, %v3028_v44  ;;  %v4562_v44 = vunpack.c.l.bf16 %v4620_v42  ;;  %v4629_v42 = vld [vmem:[%s5958_s7 + $0x60] sm:$0xff]  }
 0x327   :  { %v3052_v37 = vmax.f32 %v3042_v18, 0.0  ;;  %v2711_v18 = vadd.f32 %v2692_v43, %v5757_v16  ;;  %v2908_v16 = vpop.f32.mrf.mxu3 }
 0x329   :  { %v3166_v50 = vmul.f32 %v4574_v45, %v3052_v37  ;;  %v3085_v19 = vmul.f32 %v4558_v52, %v3052_v37  ;;  %v3246_v33 = vmul.f32 %v4590_v47, %v3052_v37  ;;  %v3326_v34 = vmul.f32 %v4606_v7, %v3052_v37 }
 0x32a   :  { %v3005_v13 = vpop.f32.mrf.mxu0  ;;  %v4595_v52 = vunpack.c.h.bf16 %v4628_v5  ;;  %v2818_v37 = vadd.f32 %v2799_v15, %v2711_v18  ;;  %v4632_v5 = vld [vmem:[%s5958_s7 + $0x80] sm:$0xff]   ;;  %v2713_v15 = vadd.f32 %v2697_v0, %v5761_v38 }
 0x32b   :  { %v3029_v56 = vadd.f32 %v3005_v13, %v2922_v4  ;;  %v3176_v14 = vsel %vm2081_vm3, %v3166_v50, 0.0  ;;  %v3095_v59 = vsel %vm2081_vm3, %v3085_v19, 0.0  ;;  %v3256_v3 = vsel %vm2081_vm3, %v3246_v33, 0.0  ;;  %v2801_v19 = vpop.f32.mrf.mxu2 }
 0x32c   :  { %3177 = vadd.xlane.f32.xlu1 %v3176_v14  ;;  %3096 = vadd.xlane.f32.xlu0 %v3095_v59  ;;  %v3336_v35 = vsel %vm2081_vm3, %v3326_v34, 0.0  ;;  %v2925_v13 = vadd.f32 %v2906_v32, %v2818_v37  ;;  %v5823_v14 = vld [vmem:[%s5958_s7 + $0x10] sm:$0xff]  }
 0x32d   :  { %v3043_v46 = vadd.f32 %v5772_v41, %v3029_v56  ;;  %v4566_v51 = vunpack.c.l.bf16 %v5823_v14 }
 0x32f   :  { %v3053_v28 = vmax.f32 %v3043_v46, 0.0  ;;  %v2911_v22 = vpop.f32.mrf.mxu3 }
 0x331   :  { %v3167_v29 = vmul.f32 %v4575_v60, %v3053_v28  ;;  %v3247_v1 = vmul.f32 %v4591_v61, %v3053_v28  ;;  %v3327_v10 = vmul.f32 %v4607_v8, %v3053_v28  ;;  %v3086_v17 = vmul.f32 %v4559_v11, %v3053_v28  ;;  %v2699_v11 = vpop.f32.mrf.mxu1 }
 0x332   :  { %v3008_v63 = vpop.f32.mrf.mxu0  ;;  %v4578_v60 = vunpack.c.l.bf16 %v4624_v31  ;;  %v2712_v61 = vadd.f32 %v2694_v48, %v5759_v9  ;;  %v2714_v48 = vadd.f32 %v2699_v11, %v5763_v21 }
 0x333   :  { %v3030_v12 = vadd.f32 %v3008_v63, %v2923_v58  ;;  %v3179_v6 = vsel %vm2081_vm3, %v3167_v29, 0.0  ;;  %v3259_v49 = vsel %vm2081_vm3, %v3247_v1, 0.0  ;;  %v3339_v54 = vsel %vm2081_vm3, %v3327_v10, 0.0  ;;  %v4625_v1 = vld [vmem:[%s5958_s7 + $0x38] sm:$0xff]  }
 0x334   :  { %3180 = vadd.xlane.f32.xlu2 %v3179_v6  ;;  %3260 = vadd.xlane.f32.xlu1 %v3259_v49  ;;  %v3098_v46 = vsel %vm2081_vm3, %v3086_v17, 0.0  ;;  %v2819_v28 = vadd.f32 %v2801_v19, %v2712_v61  ;;  %v4579_v49 = vunpack.c.h.bf16 %v4624_v31  ;;  %v4582_v43 = vunpack.c.l.bf16 %v4625_v1 }
 0x335   :  { %v3044_v20 = vadd.f32 %v5772_v41, %v3030_v12  ;;  %3257 = vadd.xlane.f32.xlu0 %v3256_v3  ;;  %v2804_v12 = vpop.f32.mrf.mxu2 }
 0x336   :  { %v2926_v63 = vadd.f32 %v2908_v16, %v2819_v28  ;;  %v2820_v25 = vadd.f32 %v2804_v12, %v2713_v15  ;;  %v4633_v16 = vld [vmem:[%s5958_s7 + $0x88] sm:$0xff]  }
 0x337   :  { %v5801_v55 = vmax.f32 %v3044_v20, 0.0 }
 0x339   :  { %v3248_v40 = vmul.f32 %v4594_v2, %v5801_v55  ;;  %v3087_v50 = vmul.f32 %v4562_v44, %v5801_v55  ;;  %v3168_v29 = vmul.f32 %v4578_v60, %v5801_v55  ;;  %v4610_v2 = vunpack.c.l.bf16 %v4632_v5  ;;  %v2702_v28 = vpop.f32.mrf.mxu1 }
 0x33a   :  { %v3010_v30 = vpop.f32.mrf.mxu0  ;;  %v4614_v60 = vunpack.c.l.bf16 %v4633_v16 }
 0x33b   :  { %v3031_v24 = vadd.f32 %v3010_v30, %v2924_v39  ;;  %v3262_v26 = vsel %vm2081_vm3, %v3248_v40, 0.0  ;;  %v3101_v47 = vsel %vm2081_vm3, %v3087_v50, 0.0  ;;  %v3182_v20 = vsel %vm2081_vm3, %v3168_v29, 0.0 }
 0x33c   :  { %3263 = vadd.xlane.f32.xlu2 %v3262_v26  ;;  %3340 = vadd.xlane.f32.xlu1 %v3339_v54  ;;  %v3328_v39 = vmul.f32 %v4610_v2, %v5801_v55  ;;  %v2927_v40 = vadd.f32 %v2911_v22, %v2820_v25  ;;  %v4583_v26 = vunpack.c.h.bf16 %v4625_v1  ;;  %v2913_v55 = vpop.f32.mrf.mxu3  ;;  %v4599_v29 = vunpack.c.h.bf16 %v4629_v42  ;;  %v4622_v1 = vld [vmem:[%s5958_s7 + $0x18] sm:$0xff]   ;;  %v4630_v22 = vld [vmem:[%s5958_s7 + $0x68] sm:$0xff]  }
 0x33d   :  { %v3045_v45 = vadd.f32 %v5772_v41, %v3031_v24  ;;  %3337 = vadd.xlane.f32.xlu0 %v3336_v35  ;;  %v4598_v24 = vunpack.c.l.bf16 %v4629_v42  ;;  %v2806_v18 = vpop.f32.mrf.mxu2  ;;  %v4602_v15 = vunpack.c.l.bf16 %v4630_v22 }
 0x33e   :  { %v2821_v37 = vadd.f32 %v2806_v18, %v2714_v48 }
 0x33f   :  { %v5813_v4 = vmax.f32 %v3045_v45, 0.0  ;;  %v3342_v45 = vsel %vm2081_vm3, %v3328_v39, 0.0 }
 0x340   :  { %v2928_v31 = vadd.f32 %v2913_v55, %v2821_v37 }
 0x341   :  { %v3249_v53 = vmul.f32 %v4595_v52, %v5813_v4  ;;  %v3088_v58 = vmul.f32 %v4563_v36, %v5813_v4  ;;  %v3169_v34 = vmul.f32 %v4579_v49, %v5813_v4  ;;  %v4611_v52 = vunpack.c.h.bf16 %v4632_v5 }
 0x342   :  { %v3013_v56 = vpop.f32.mrf.mxu0  ;;  %v4571_v5 = vunpack.c.h.bf16 %v4622_v1  ;;  %v2715_v49 = vadd.f32 %v2702_v28, %v5765_v62  ;;  %v2704_v62 = vpop.f32.mrf.mxu1  ;;  %v4371_v28 = vld [vmem:[%s5958_s7 + $0x74] sm:$0x1] }
 0x343   :  { %v3032_v59 = vadd.f32 %v3013_v56, %v2925_v13  ;;  %v3265_v57 = vsel %vm2081_vm3, %v3249_v53, 0.0  ;;  %v3104_v7 = vsel %vm2081_vm3, %v3088_v58, 0.0  ;;  %v3185_v35 = vsel %vm2081_vm3, %v3169_v34, 0.0  ;;  %v4626_v13 = vld [vmem:[%s5958_s7 + $0x40] sm:$0xff]  }
 0x344   :  { %3266 = vadd.xlane.f32.xlu2 %v3265_v57  ;;  %3102 = vadd.xlane.f32.xlu1 %v3101_v47  ;;  %v3329_v53 = vmul.f32 %v4611_v52, %v5813_v4  ;;  %v4567_v56 = vunpack.c.h.bf16 %v5823_v14  ;;  %v2916_v12 = vpop.f32.mrf.mxu3  ;;  %v4587_v34 = vunpack.c.h.bf16 %v4626_v13  ;;  %v4603_v52 = vunpack.c.h.bf16 %v4630_v22 }
 0x345   :  { %v3046_v27 = vadd.f32 %v5772_v41, %v3032_v59  ;;  %3099 = vadd.xlane.f32.xlu0 %v3098_v46  ;;  %v4586_v59 = vunpack.c.l.bf16 %v4626_v13  ;;  %v2809_v58 = vpop.f32.mrf.mxu2 }
 0x346   :  { %v3345_v4 = vsel %vm2081_vm3, %v3329_v53, 0.0 }
 0x347   :  { %v5831_v33 = vmax.f32 %v3046_v27, 0.0 }
 0x349   :  { %v3089_v9 = vmul.f32 %v4566_v51, %v5831_v33  ;;  %v3170_v32 = vmul.f32 %v4582_v43, %v5831_v33  ;;  %v3250_v19 = vmul.f32 %v4598_v24, %v5831_v33  ;;  %v3330_v14 = vmul.f32 %v4614_v60, %v5831_v33 }
 0x34a   :  { %v3015_v6 = vpop.f32.mrf.mxu0  ;;  %v4615_v33 = vunpack.c.h.bf16 %v4633_v16 }
 0x34b   :  { %v3033_v8 = vadd.f32 %v3015_v6, %v2926_v63  ;;  %v3107_v3 = vsel %vm2081_vm3, %v3089_v9, 0.0  ;;  %v3188_v44 = vsel %vm2081_vm3, %v3170_v32, 0.0  ;;  %v3268_v36 = vsel %vm2081_vm3, %v3250_v19, 0.0 }
 0x34c   :  { %3108 = vadd.xlane.f32.xlu2 %v3107_v3  ;;  %3105 = vadd.xlane.f32.xlu1 %v3104_v7  ;;  %v3348_v6 = vsel %vm2081_vm3, %v3330_v14, 0.0  ;;  %v2822_v3 = vadd.f32 %v2809_v58, %v2715_v49  ;;  %v2918_v24 = vpop.f32.mrf.mxu3  ;;  %v4370_v14 = vld [vmem:[%s5958_s7 + $0x70] sm:$0xf]  ;;  %v3074_v58 = vld [vmem:[%s5958_s7 + $0x24] sm:$0x1] }
 0x34d   :  { %3183 = vadd.xlane.f32.xlu0 %v3182_v20  ;;  %v3047_v10 = vadd.f32 %v5772_v41, %v3033_v8  ;;  %v2811_v42 = vpop.f32.mrf.mxu2  ;;  %v4380_v49 = vld [vmem:[%s5958_s7 + $0x98] sm:$0xf] }
 0x34e   :  { %v2929_v2 = vadd.f32 %v2916_v12, %v2822_v3 }
 0x34f   :  { %v3057_v54 = vmax.f32 %v3047_v10, 0.0 }
 0x351   :  { %v3171_v17 = vmul.f32 %v4583_v26, %v3057_v54  ;;  %v3090_v27 = vmul.f32 %v4567_v56, %v3057_v54  ;;  %v3251_v7 = vmul.f32 %v4599_v29, %v3057_v54  ;;  %v3331_v20 = vmul.f32 %v4615_v33, %v3057_v54 }
 0x352   :  { %v3018_v30 = vpop.f32.mrf.mxu0 }
 0x353   :  { %v3034_v38 = vadd.f32 %v3018_v30, %v2927_v40  ;;  %v3191_v46 = vsel %vm2081_vm3, %v3171_v17, 0.0  ;;  %v3110_v63 = vsel %vm2081_vm3, %v3090_v27, 0.0  ;;  %v3271_v10 = vsel %vm2081_vm3, %v3251_v7, 0.0 }
 0x354   :  { %3189 = vadd.xlane.f32.xlu2 %v3188_v44  ;;  %3186 = vadd.xlane.f32.xlu1 %v3185_v35  ;;  %v3351_v39 = vsel %vm2081_vm3, %v3331_v20, 0.0  ;;  %v4570_v40 = vunpack.c.l.bf16 %v4622_v1  ;;  %v2716_v30 = vadd.f32 %v2704_v62, %v5767_v23  ;;  %v4360_v35 = vld [vmem:[%s5958_s7 + $0x48] sm:$0xf]  ;;  %v4634_v23 = vld [vmem:[%s5958_s7 + $0x90] sm:$0xff]  }
 0x355   :  { %3343 = vadd.xlane.f32.xlu0 %v3342_v45  ;;  %v3048_v50 = vadd.f32 %v5772_v41, %v3034_v38  ;;  %v3164_v48 = vunpack.c.l.bf16 %v4360_v35  ;;  %v4618_v13 = vunpack.c.l.bf16 %v4634_v23 }
 0x356   :  { %v2823_v26 = vadd.f32 %v2811_v42, %v2716_v30 }
 0x357   :  { %v5867_v57 = vmax.f32 %v3048_v50, 0.0 }
 0x358   :  { %v2930_v45 = vadd.f32 %v2918_v24, %v2823_v26 }
 0x359   :  { %v3172_v51 = vmul.f32 %v4586_v59, %v5867_v57  ;;  %v3252_v38 = vmul.f32 %v4602_v15, %v5867_v57  ;;  %v3091_v18 = vmul.f32 %v4570_v40, %v5867_v57  ;;  %v3332_v56 = vmul.f32 %v4618_v13, %v5867_v57  ;;  %v4361_v59 = vld [vmem:[%s5958_s7 + $0x4c] sm:$0x1] }
 0x35a   :  { %v3020_v21 = vpop.f32.mrf.mxu0 }
 0x35b   :  { %v3035_v47 = vadd.f32 %v3020_v21, %v2928_v31  ;;  %v3194_v9 = vsel %vm2081_vm3, %v3172_v51, 0.0  ;;  %v3274_v50 = vsel %vm2081_vm3, %v3252_v38, 0.0  ;;  %v3113_v17 = vsel %vm2081_vm3, %v3091_v18, 0.0  ;;  %v3073_v21 = vld [vmem:[%s5958_s7 + $0x20] sm:$0xf] }
 0x35c   :  { %3269 = vadd.xlane.f32.xlu2 %v3268_v36  ;;  %3192 = vadd.xlane.f32.xlu1 %v3191_v46  ;;  %v3354_v60 = vsel %vm2081_vm3, %v3332_v56, 0.0 }
 0x35d   :  { %3346 = vadd.xlane.f32.xlu0 %v3345_v4  ;;  %v3049_v61 = vadd.f32 %v5772_v41, %v3035_v47  ;;  %v3083_v47 = vunpack.c.l.bf16 %v3073_v21 }
 0x35f   :  { %v5878_v0 = vmax.f32 %v3049_v61, 0.0  ;;  %v4619_v61 = vunpack.c.h.bf16 %v4634_v23 }
 0x361   :  { %v3092_v43 = vmul.f32 %v4571_v5, %v5878_v0  ;;  %v3173_v44 = vmul.f32 %v4587_v34, %v5878_v0  ;;  %v3253_v31 = vmul.f32 %v4603_v52, %v5878_v0  ;;  %v3333_v57 = vmul.f32 %v4619_v61, %v5878_v0 }
 0x362   :  { %v3023_v8 = vpop.f32.mrf.mxu0  ;;  %v3084_v5 = vunpack.c.l.bf16 %v3074_v58 }
 0x363   :  { %v3036_v25 = vadd.f32 %v3023_v8, %v2929_v2  ;;  %v3116_v32 = vsel %vm2081_vm3, %v3092_v43, 0.0  ;;  %v3197_v19 = vsel %vm2081_vm3, %v3173_v44, 0.0  ;;  %v3277_v46 = vsel %vm2081_vm3, %v3253_v31, 0.0  ;;  %v4381_v8 = vld [vmem:[%s5958_s7 + $0x9c] sm:$0x1] }
 0x364   :  { %3111 = vadd.xlane.f32.xlu2 %v3110_v63  ;;  %3195 = vadd.xlane.f32.xlu1 %v3194_v9  ;;  %v3244_v63 = vunpack.c.l.bf16 %v4370_v14  ;;  %v3245_v9 = vunpack.c.l.bf16 %v4371_v28  ;;  %v3357_v0 = vsel %vm2081_vm3, %v3333_v57, 0.0  ;;  %v3324_v43 = vunpack.c.l.bf16 %v4380_v49 }
 0x365   :  { %3349 = vadd.xlane.f32.xlu0 %v3348_v6  ;;  %v3050_v54 = vadd.f32 %v5772_v41, %v3036_v25  ;;  %v3325_v20 = vunpack.c.l.bf16 %v4381_v8 }
 0x367   :  { %v3060_v55 = vmax.f32 %v3050_v54, 0.0 }
 0x369   :  { %v3174_v16 = vmul.f32 %v3164_v48, %v3060_v55  ;;  %v3093_v27 = vmul.f32 %v3083_v47, %v3060_v55  ;;  %v3254_v12 = vmul.f32 %v3244_v63, %v3060_v55  ;;  %v3334_v2 = vmul.f32 %v3324_v43, %v3060_v55 }
 0x36a   :  { %v3025_v11 = vpop.f32.mrf.mxu0 }
 0x36b   :  { %v3037_v37 = vadd.f32 %v3025_v11, %v2930_v45  ;;  %v3200_v4 = vsel %vm2081_vm3, %v3174_v16, 0.0  ;;  %v3119_v29 = vsel %vm2081_vm3, %v3093_v27, 0.0  ;;  %v3280_v3 = vsel %vm2081_vm3, %v3254_v12, 0.0 }
 0x36c   :  { %3272 = vadd.xlane.f32.xlu2 %v3271_v10  ;;  %3117 = vadd.xlane.f32.xlu1 %v3116_v32  ;;  %v3360_v25 = vsel %vm2081_vm3, %v3334_v2, 0.0 }
 0x36d   :  { %3352 = vadd.xlane.f32.xlu0 %v3351_v39  ;;  %v3051_v53 = vadd.f32 %v5772_v41, %v3037_v37  ;;  %v3165_v41 = vunpack.c.l.bf16 %v4361_v59 }
 0x36f   :  { %v3061_v36 = vmax.f32 %v3051_v53, 0.0 }
 0x371   :  { %v3175_v51 = vmul.f32 %v3165_v41, %v3061_v36  ;;  %v3255_v6 = vmul.f32 %v3245_v9, %v3061_v36  ;;  %v3094_v33 = vmul.f32 %v3084_v5, %v3061_v36  ;;  %v3335_v15 = vmul.f32 %v3325_v20, %v3061_v36 }
 0x373   :  { %v3203_v1 = vsel %vm2094_vm4, %v3175_v51, 0.0  ;;  %v3283_v7 = vsel %vm2094_vm4, %v3255_v6, 0.0  ;;  %v3122_v22 = vsel %vm2094_vm4, %v3094_v33, 0.0  ;;  %v3363_v10 = vsel %vm2094_vm4, %v3335_v15, 0.0 }
 0x374   :  { %3275 = vadd.xlane.f32.xlu2 %v3274_v50  ;;  %3198 = vadd.xlane.f32.xlu1 %v3197_v19 }
 0x375   :  { %3114 = vadd.xlane.f32.xlu0 %v3113_v17 }
 0x37c   :  { %3278 = vadd.xlane.f32.xlu2 %v3277_v46  ;;  %3201 = vadd.xlane.f32.xlu1 %v3200_v4 }
 0x37d   :  { %3355 = vadd.xlane.f32.xlu0 %v3354_v60 }
 0x384   :  { %3120 = vadd.xlane.f32.xlu2 %v3119_v29  ;;  %3204 = vadd.xlane.f32.xlu1 %v3203_v1 }
 0x385   :  { %3358 = vadd.xlane.f32.xlu0 %v3357_v0 }
 0x38c   :  { %3281 = vadd.xlane.f32.xlu2 %v3280_v3  ;;  %3284 = vadd.xlane.f32.xlu1 %v3283_v7 }
 0x38d   :  { %3123 = vadd.xlane.f32.xlu0 %v3122_v22 }
 0x394   :  { %3361 = vadd.xlane.f32.xlu2 %v3360_v25 }
 0x395   :  { %3364 = vadd.xlane.f32.xlu0 %v3363_v10 }
 0x39f   :  { %v3178_v32 = vpop.xlane.xlu1 %3177  ;;  %v3097_v34 = vpop.xlane.xlu0 %3096 }
 0x3a7   :  { %v3181_v62 = vpop.xlane.xlu2 %3180  ;;  %v3261_v42 = vpop.xlane.xlu1 %3260 }
 0x3a8   :  { %v3206_v39 = vadd.f32 %v3181_v62, %v3178_v32  ;;  %v3258_v40 = vpop.xlane.xlu0 %3257 }
 0x3a9   :  { %v3286_v30 = vadd.f32 %v3261_v42, %v3258_v40 }
 0x3af   :  { %v3264_v24 = vpop.xlane.xlu2 %3263  ;;  %v3341_v26 = vpop.xlane.xlu1 %3340 }
 0x3b0   :  { %v3287_v54 = vadd.f32 %v3286_v30, %v3264_v24  ;;  %v3338_v38 = vpop.xlane.xlu0 %3337 }
 0x3b1   :  { %v3366_v44 = vadd.f32 %v3341_v26, %v3338_v38 }
 0x3b7   :  { %v3267_v35 = vpop.xlane.xlu2 %3266  ;;  %v3103_v11 = vpop.xlane.xlu1 %3102 }
 0x3b8   :  { %v3288_v18 = vadd.f32 %v3287_v54, %v3267_v35  ;;  %v3100_v45 = vpop.xlane.xlu0 %3099 }
 0x3b9   :  { %v3125_v60 = vadd.f32 %v3100_v45, %v3097_v34 }
 0x3bb   :  { %v3126_v57 = vadd.f32 %v3125_v60, %v3103_v11 }
 0x3bf   :  { %v3109_v23 = vpop.xlane.xlu2 %3108  ;;  %v3106_v52 = vpop.xlane.xlu1 %3105 }
 0x3c0   :  { %v3184_v48 = vpop.xlane.xlu0 %3183  ;;  %v3127_v58 = vadd.f32 %v3126_v57, %v3106_v52 }
 0x3c1   :  { %v3207_v4 = vadd.f32 %v3206_v39, %v3184_v48 }
 0x3c2   :  { %v3128_v63 = vadd.f32 %v3127_v58, %v3109_v23 }
 0x3c7   :  { %v3190_v55 = vpop.xlane.xlu2 %3189  ;;  %v3187_v37 = vpop.xlane.xlu1 %3186 }
 0x3c8   :  { %v3344_v50 = vpop.xlane.xlu0 %3343  ;;  %v3208_v41 = vadd.f32 %v3207_v4, %v3187_v37 }
 0x3c9   :  { %v3367_v22 = vadd.f32 %v3366_v44, %v3344_v50 }
 0x3ca   :  { %v3209_v61 = vadd.f32 %v3208_v41, %v3190_v55  ;;  %v3062_v55 = vlaneseq  ;;  %v3064_v41 = vld [vmem:[%s5959_s8] sm:$0x1] }
 0x3cf   :  { %v3270_v19 = vpop.xlane.xlu2 %3269  ;;  %v3193_v17 = vpop.xlane.xlu1 %3192 }
 0x3d0   :  { %v3347_v13 = vpop.xlane.xlu0 %3346  ;;  %v3210_v28 = vadd.f32 %v3209_v61, %v3193_v17  ;;  %v3289_v12 = vadd.f32 %v3288_v18, %v3270_v19 }
 0x3d1   :  { %v3368_v2 = vadd.f32 %v3367_v22, %v3347_v13 }
 0x3d7   :  { %v3112_v53 = vpop.xlane.xlu2 %3111  ;;  %v3196_v31 = vpop.xlane.xlu1 %3195 }
 0x3d8   :  { %v3350_v16 = vpop.xlane.xlu0 %3349  ;;  %v3211_v29 = vadd.f32 %v3210_v28, %v3196_v31  ;;  %v3129_v6 = vadd.f32 %v3128_v63, %v3112_v53 }
 0x3d9   :  { %v3369_v62 = vadd.f32 %v3368_v2, %v3350_v16 }
 0x3df   :  { %v3273_v21 = vpop.xlane.xlu2 %3272  ;;  %v3118_v56 = vpop.xlane.xlu1 %3117 }
 0x3e0   :  { %v3353_v59 = vpop.xlane.xlu0 %3352  ;;  %v3290_v3 = vadd.f32 %v3289_v12, %v3273_v21 }
 0x3e1   :  { %v3370_v26 = vadd.f32 %v3369_v62, %v3353_v59  ;;  %v3063_v59 = vand.u32 127, %v3062_v55 }
 0x3e3   :  { %vm3142_vm6 = vcmp.eq.s32.totalorder %v3063_v59, 0  ;;  %vm3222_vm7 = vcmp.eq.s32.totalorder %v3063_v59, 1  ;;  %vm3302_vm8 = vcmp.eq.s32.totalorder %v3063_v59, 2  ;;  %vm3382_vm9 = vcmp.eq.s32.totalorder %v3063_v59, 3 }
 0x3e7   :  { %v3276_v47 = vpop.xlane.xlu2 %3275  ;;  %v3199_v36 = vpop.xlane.xlu1 %3198 }
 0x3e8   :  { %v3115_v46 = vpop.xlane.xlu0 %3114  ;;  %v3212_v1 = vadd.f32 %v3211_v29, %v3199_v36  ;;  %v3291_v20 = vadd.f32 %v3290_v3, %v3276_v47 }
 0x3e9   :  { %v3130_v7 = vadd.f32 %v3129_v6, %v3115_v46 }
 0x3eb   :  { %v3131_v25 = vadd.f32 %v3130_v7, %v3118_v56 }
 0x3ef   :  { %v3279_v27 = vpop.xlane.xlu2 %3278  ;;  %v3202_v51 = vpop.xlane.xlu1 %3201 }
 0x3f0   :  { %v3356_v14 = vpop.xlane.xlu0 %3355  ;;  %v3213_v9 = vadd.f32 %v3212_v1, %v3202_v51  ;;  %v3292_v15 = vadd.f32 %v3291_v20, %v3279_v27 }
 0x3f1   :  { %v3371_v44 = vadd.f32 %v3370_v26, %v3356_v14 }
 0x3f7   :  { %v3121_v0 = vpop.xlane.xlu2 %3120  ;;  %v3205_v5 = vpop.xlane.xlu1 %3204 }
 0x3f8   :  { %v3214_v33 = vsel %vm3133_vm5, %v3205_v5, 0.0  ;;  %v3359_v49 = vpop.xlane.xlu0 %3358  ;;  %v3132_v42 = vadd.f32 %v3131_v25, %v3121_v0 }
 0x3f9   :  { %v3215_v8 = vadd.f32 %v3214_v33, %v3213_v9  ;;  %v3372_v23 = vadd.f32 %v3371_v44, %v3359_v49 }
 0x3fb   :  { %v3216_v43 = vrot.slane %v3215_v8, 4 }
 0x3fd   :  { %v3217_v10 = vadd.f32 %v3216_v43, %v3215_v8 }
 0x3ff   :  { %v3282_v32 = vpop.xlane.xlu2 %3281  ;;  %v3285_v34 = vpop.xlane.xlu1 %3284  ;;  %v3218_v54 = vrot.slane %v3217_v10, 2 }
 0x400   :  { %v3293_v39 = vadd.f32 %v3292_v15, %v3282_v32  ;;  %v3294_v40 = vsel %vm3133_vm5, %v3285_v34, 0.0  ;;  %v3124_v30 = vpop.xlane.xlu0 %3123 }
 0x401   :  { %v3134_v24 = vsel %vm3133_vm5, %v3124_v30, 0.0  ;;  %v3219_v45 = vadd.f32 %v3218_v54, %v3217_v10 }
 0x402   :  { %v3295_v38 = vadd.f32 %v3294_v40, %v3293_v39  ;;  %v3135_v35 = vadd.f32 %v3134_v24, %v3132_v42 }
 0x403   :  { %v3220_v31 = vrot.slane %v3219_v45, 1 }
 0x404   :  { %v3296_v11 = vrot.slane %v3295_v38, 4  ;;  %v3136_v18 = vrot.slane %v3135_v35, 4 }
 0x405   :  { %v3221_v4 = vadd.f32 %v3220_v31, %v3219_v45 }
 0x406   :  { %v3297_v52 = vadd.f32 %v3296_v11, %v3295_v38  ;;  %v3137_v48 = vadd.f32 %v3136_v18, %v3135_v35 }
 0x407   :  { %v3362_v37 = vpop.xlane.xlu2 %3361  ;;  %v3223_v28 = vsel %vm3222_vm7, %v3221_v4, 0.0 }
 0x408   :  { %v3298_v50 = vrot.slane %v3297_v52, 2  ;;  %v3138_v19 = vrot.slane %v3137_v48, 2  ;;  %v3373_v17 = vadd.f32 %v3372_v23, %v3362_v37  ;;  %v3365_v13 = vpop.xlane.xlu0 %3364 }
 0x409   :  { %v3374_v53 = vsel %vm3133_vm5, %v3365_v13, 0.0 }
 0x40a   :  { %v3299_v16 = vadd.f32 %v3298_v50, %v3297_v52  ;;  %v3139_v21 = vadd.f32 %v3138_v19, %v3137_v48  ;;  %v3375_v56 = vadd.f32 %v3374_v53, %v3373_v17 }
 0x40c   :  { %v3300_v47 = vrot.slane %v3299_v16, 1  ;;  %v3140_v36 = vrot.slane %v3139_v21, 1  ;;  %v3376_v46 = vrot.slane %v3375_v56, 4 }
 0x40e   :  { %v3141_v60 = vadd.f32 %v3140_v36, %v3139_v21  ;;  %v3377_v61 = vadd.f32 %v3376_v46, %v3375_v56  ;;  %v3301_v27 = vadd.f32 %v3300_v47, %v3299_v16 }
 0x410   :  { %v3143_v51 = vsel %vm3142_vm6, %v3141_v60, 0.0  ;;  %v3378_v57 = vrot.slane %v3377_v61, 2  ;;  %v3303_v63 = vsel %vm3302_vm8, %v3301_v27, 0.0 }
 0x411   :  { %v3144_v14 = vadd.f32 %v3143_v51, %v3064_v41 }
 0x412   :  { %v3379_v58 = vadd.f32 %v3378_v57, %v3377_v61 }
 0x413   :  { %v3224_v29 = vadd.f32 %v3223_v28, %v3144_v14 }
 0x414   :  { %v3380_v1 = vrot.slane %v3379_v58, 1 }
 0x415   :  { %v3304_v9 = vadd.f32 %v3303_v63, %v3224_v29 }
 0x416   :  { %v3381_v0 = vadd.f32 %v3380_v1, %v3379_v58 }
 0x418   :  { %v3383_v5 = vsel %vm3382_vm9, %v3381_v0, 0.0 }
 0x419   :  { %v3384_v12 = vadd.f32 %v3383_v5, %v3304_v9 }
 0x41b   :  { %3386 = vst.msk [vmem:[#allocation4] sm:$0x1] %vm3385_vm10, %v3384_v12 }
 0x41c   :  { %3397 = dma.vmem_to_hbm [thread:$0]  %s3393_s20, 16, %s3395_s22, [#allocation5]  }
 0x41d   :  { %4679 = dma.done.wait [#allocation5], 16  }
 0x41e   :  { %4680 = vsyncadd [#allocation5], 4294967280 }
 0x41f   :  { %3402 = vsyncpa [#allocation5], 1 }

</bundles_post_ra>
